<compile_context>
chip_gen: v5e
topology: v5e:2x2
jax: 0.10.0
libtpu: 0.0.40
codegen_flags: <defaults>
</compile_context>

<pallas_src>
import functools

import jax
import jax.numpy as jnp
from jax import lax
from jax.experimental import pallas as pl
from jax.experimental.pallas import tpu as pltpu


def _round_up(x, m):
    return ((x + m - 1) // m) * m


def _pick_chunk(T, target):
    # Largest divisor of T that is <= target (keeps the grid exact, no padding).
    for c in range(min(T, target), 0, -1):
        if T % c == 0:
            return c
    return 1


def _buffered(n):
    """pl.Buffered(n) if available/valid, else None (default pipelining)."""
    try:
        return pl.Buffered(buffer_count=n)
    except Exception:
        return None


def _try_modes(build, modes):
    """Build + run the pallas_call with the first pipeline mode that compiles."""
    last_err = None
    for mode in modes:
        try:
            call, operands = build(mode)
            return call(*operands)
        except Exception as e:       # fallback: plain double-buffered specs
            last_err = e
    raise last_err


# ---------------------------------------------------------------------------
# Kernel 1: fused multi-layer LSTM over a chunk of timesteps (layer-major).
#   grid axis 0 = time chunk ("arbitrary": recurrence is strictly sequential).
#   PyTorch gate order/math: gates = x@W_ih^T + h@W_hh^T + (b_ih + b_hh)
#     i = sigmoid(g[:, 0H:1H]); f = sigmoid(g[:, 1H:2H])
#     g = tanh   (g[:, 2H:3H]); o = sigmoid(g[:, 3H:4H])
#     c = f*c + i*g ; h = o*tanh(c)
# ---------------------------------------------------------------------------
def _fused_lstm_kernel(*refs, num_layers, hidden_dim, batch, time_chunk, unroll):
    H, B, L = hidden_dim, batch, num_layers
    if L > 1:
        (x_ref, wih0_ref, wihr_ref, whh_ref, b_ref,
         out_ref, xg_sc, act_sc, h_sc, c_sc) = refs
    else:
        (x_ref, wih0_ref, whh_ref, b_ref,
         out_ref, xg_sc, h_sc, c_sc) = refs
        wihr_ref = act_sc = None

    @pl.when(pl.program_id(0) == 0)
    def _():
        h_sc[...] = jnp.zeros_like(h_sc)
        c_sc[...] = jnp.zeros_like(c_sc)

    cdt = wih0_ref.dtype                 # MXU input dtype (bf16 default / f32)

    for l in range(L):                   # static layer loop — layer-major chunk
        # Whole-chunk input projection for this layer: ONE full-width MXU matmul
        # (time_chunk*B rows) with the combined bias folded in, instead of
        # time_chunk tiny B-row matmuls on the serial recurrence chain.
        if l == 0:
            xg_sc[...] = (
                jnp.dot(x_ref[...], wih0_ref[...],
                        preferred_element_type=jnp.float32) + b_ref[0])
        else:
            xg_sc[...] = (
                jnp.dot(act_sc[...], wihr_ref[l - 1],
                        preferred_element_type=jnp.float32) + b_ref[l])

        write_act = (l < L - 1)          # last layer's per-step slab never needed

        def step(t, carry, l=l, write_act=write_act):
            row = pl.multiple_of(t * B, B)
            # Only h_prev @ W_hh remains on the serial dependency chain.
            gates = xg_sc[pl.ds(row, B)] + jnp.dot(
                h_sc[l].astype(cdt), whh_ref[l],
                preferred_element_type=jnp.float32)
            # NOTE: use H % 128 == 0 at realistic sizes so these slices fall on
            # lane-tile boundaries (free); otherwise each materializes a copy.
            i_g = jax.nn.sigmoid(gates[:, 0 * H:1 * H])
            f_g = jax.nn.sigmoid(gates[:, 1 * H:2 * H])
            g_g = jnp.tanh(gates[:, 2 * H:3 * H])
            o_g = jax.nn.sigmoid(gates[:, 3 * H:4 * H])
            c_new = f_g * c_sc[l] + i_g * g_g      # f32 cell state
            h_new = o_g * jnp.tanh(c_new)
            c_sc[l] = c_new
            h_sc[l] = h_new
            if write_act:                          # feed next layer's projection
                act_sc[pl.ds(row, B)] = h_new.astype(act_sc.dtype)
            return carry

        # Bounded unroll: keeps LLO visibility without blowing the vreg budget
        # at realistic H (full unroll spills once (B,4H) f32 gate slabs pile up).
        lax.fori_loop(0, time_chunk, step, 0, unroll=unroll)

    # Resident output block — only write it on the last chunk (one HBM flush).
    @pl.when(pl.program_id(0) == pl.num_programs(0) - 1)
    def _():
        out_ref[...] = h_sc[L - 1].astype(out_ref.dtype)


def fused_lstm(x_flat, w_ih0, w_ih_rest, w_hh, b, *, seq_len, batch, num_layers,
               hidden_dim, time_chunk, unroll=4,
               vmem_limit_bytes=64 * 1024 * 1024):
    """x_flat: (T*B, E) time-major-flattened inputs -> (B, H) last-step hidden."""
    T, B, H, L = seq_len, batch, hidden_dim, num_layers
    E = x_flat.shape[-1]
    kernel = functools.partial(_fused_lstm_kernel, num_layers=L, hidden_dim=H,
                               batch=B, time_chunk=time_chunk,
                               unroll=min(unroll, time_chunk))

    def build(weight_mode):
        def wspec(shape):
            nd = len(shape)
            # Grid-invariant weights: single-buffer (halves their VMEM footprint).
            return pl.BlockSpec(shape, lambda t, _n=nd: (0,) * _n,
                                pipeline_mode=weight_mode)

        in_specs = [pl.BlockSpec((time_chunk * B, E), lambda t: (t, 0)),
                    wspec((E, 4 * H))]
        operands = [x_flat, w_ih0]
        if L > 1:                        # skip the dummy w_ih_rest DMA when L==1
            in_specs.append(wspec((L - 1, H, 4 * H)))
            operands.append(w_ih_rest)
        in_specs += [wspec((L, H, 4 * H)), wspec((L, 1, 4 * H))]
        operands += [w_hh, b]

        scratch = [pltpu.VMEM((time_chunk * B, 4 * H), jnp.float32)]  # gate slab
        if L > 1:
            scratch.append(pltpu.VMEM((time_chunk * B, H), w_ih0.dtype))  # layer acts
        scratch += [pltpu.VMEM((L, B, H), jnp.float32),               # h state
                    pltpu.VMEM((L, B, H), jnp.float32)]               # c state

        call = pl.pallas_call(
            kernel,
            out_shape=jax.ShapeDtypeStruct((B, H), jnp.float32),
            grid_spec=pltpu.PrefetchScalarGridSpec(
                num_scalar_prefetch=0,
                grid=(T // time_chunk,),
                in_specs=in_specs,
                out_specs=pl.BlockSpec((B, H), lambda t: (0, 0)),
                scratch_shapes=scratch),
            compiler_params=pltpu.CompilerParams(
                dimension_semantics=("arbitrary",),   # recurrence: sequential
                vmem_limit_bytes=vmem_limit_bytes))
        return call, operands

    return _try_modes(build, (_buffered(1), None))


# ---------------------------------------------------------------------------
# Kernel 2: fc (Linear) + log_softmax, tiled lane-dense over the vocab axis
# with an online logsumexp accumulated across vocab tiles.
# ---------------------------------------------------------------------------
def _fc_logsoftmax_kernel(h_ref, w_ref, b_ref, logits_ref, lse_ref, m_sc, l_sc):
    j = pl.program_id(0)

    @pl.when(j == 0)
    def _():
        m_sc[...] = jnp.full_like(m_sc, -1e30)
        l_sc[...] = jnp.zeros_like(l_sc)

    logits = (
        jnp.dot(h_ref[...].astype(w_ref.dtype), w_ref[...],
                preferred_element_type=jnp.float32)
        + b_ref[...]
    )
    logits_ref[...] = logits

    m_new = jnp.maximum(m_sc[...], jnp.max(logits, axis=-1, keepdims=True))
    l_sc[...] = (l_sc[...] * jnp.exp(m_sc[...] - m_new)
                 + jnp.sum(jnp.exp(logits - m_new), axis=-1, keepdims=True))
    m_sc[...] = m_new

    @pl.when(j == pl.num_programs(0) - 1)
    def _():
        lse_ref[...] = m_sc[...] + jnp.log(l_sc[...])


def fc_logsoftmax(h_last, w_fc, b_fc, *, vocab_tile=1024,
                  vmem_limit_bytes=64 * 1024 * 1024):
    """h_last: (B, H); w_fc: (H, V); b_fc: (1, V) -> (B, V) log-probs."""
    B, H = h_last.shape
    V = w_fc.shape[1]
    tv = min(vocab_tile, _round_up(V, 128))       # lane-dense tile (multiple of 128)
    V_pad = _round_up(V, tv)
    if V_pad != V:
        w_fc = jnp.pad(w_fc, ((0, 0), (0, V_pad - V)))
        b_fc = jnp.pad(b_fc, ((0, 0), (0, V_pad - V)), constant_values=-1e9)

    def build(w_mode):
        call = pl.pallas_call(
            _fc_logsoftmax_kernel,
            out_shape=(jax.ShapeDtypeStruct((B, V_pad), jnp.float32),
                       jax.ShapeDtypeStruct((B, 1), jnp.float32)),
            grid_spec=pltpu.PrefetchScalarGridSpec(
                num_scalar_prefetch=0,
                grid=(V_pad // tv,),
                in_specs=[
                    pl.BlockSpec((B, H), lambda j: (0, 0)),
                    pl.BlockSpec((H, tv), lambda j: (0, j), pipeline_mode=w_mode),
                    pl.BlockSpec((1, tv), lambda j: (0, j)),
                ],
                out_specs=(
                    pl.BlockSpec((B, tv), lambda j: (0, j)),
                    pl.BlockSpec((B, 1), lambda j: (0, 0)),
                ),
                scratch_shapes=[
                    pltpu.VMEM((B, 1), jnp.float32),   # running max
                    pltpu.VMEM((B, 1), jnp.float32),   # running sum-exp
                ],
            ),
            compiler_params=pltpu.CompilerParams(
                dimension_semantics=("arbitrary",),    # online lse across tiles
                vmem_limit_bytes=vmem_limit_bytes))
        return call, (h_last, w_fc, b_fc)

    # Deeper buffering for the streamed weight (pure HBM-bound kernel).
    logits, lse = _try_modes(build, (_buffered(3), None))

    # TODO(synk): on v7x, split the vocab range across the two TensorCores
    # (two-pass partial-lse + combine) instead of one sequential online-lse axis.
    return (logits - lse)[:, :V]


# ---------------------------------------------------------------------------
# Parameters + forward (glue in plain JAX, hot path in Pallas).
# ---------------------------------------------------------------------------
def init_params(key, vocab_size, embedding_dim, hidden_dim, num_layers):
    keys = jax.random.split(key, 2 + 4 * num_layers + 2)
    ki = iter(keys)
    params = {}
    params["embedding"] = jax.random.normal(
        next(ki), (vocab_size, embedding_dim), jnp.float32)
    bound = 1.0 / jnp.sqrt(hidden_dim)
    layers = []
    for layer in range(num_layers):
        in_dim = embedding_dim if layer == 0 else hidden_dim
        w_ih = jax.random.uniform(
            next(ki), (in_dim, 4 * hidden_dim), jnp.float32, -bound, bound)
        w_hh = jax.random.uniform(
            next(ki), (hidden_dim, 4 * hidden_dim), jnp.float32, -bound, bound)
        b_ih = jax.random.uniform(
            next(ki), (4 * hidden_dim,), jnp.float32, -bound, bound)
        b_hh = jax.random.uniform(
            next(ki), (4 * hidden_dim,), jnp.float32, -bound, bound)
        layers.append({"w_ih": w_ih, "w_hh": w_hh, "b": (b_ih + b_hh)[None, :]})
    params["lstm"] = layers
    fbound = 1.0 / jnp.sqrt(hidden_dim)
    params["w_fc"] = jax.random.uniform(
        next(ki), (hidden_dim, vocab_size), jnp.float32, -fbound, fbound)
    params["b_fc"] = jax.random.uniform(
        next(ki), (1, vocab_size), jnp.float32, -fbound, fbound)
    return params


def next_word_lstm_forward(params, x_ids, *, time_chunk=32, unroll=4,
                           compute_dtype=jnp.bfloat16, vocab_tile=1024):
    """x_ids: (B, T) int32 token indices -> (B, V) log-probabilities.

    compute_dtype=jnp.bfloat16 (default) halves weight/activation HBM + VMEM
    traffic and doubles MXU rate on v5e/v6e/v7x; gates, cell state and all
    accumulation stay in f32 either way.
    """
    B, T = x_ids.shape
    L = len(params["lstm"])
    H = params["lstm"][0]["w_hh"].shape[0]
    E = params["embedding"].shape[1]

    # Pad batch to a sublane-friendly multiple of 8 (padded rows discarded later).
    B_pad = max(_round_up(B, 8), 8)
    if B_pad != B:
        x_ids = jnp.pad(x_ids, ((0, B_pad - B), (0, 0)))

    # Embedding gather directly in time-major (T, B_pad, E) — no transpose copy.
    # TODO(synk): fuse this gather into the LSTM kernel (scalar-prefetched token
    # ids + per-row DMA gather) to avoid one (T*B*E) HBM round trip.
    emb = params["embedding"].astype(compute_dtype)[x_ids.T]
    x_flat = emb.reshape(T * B_pad, E)            # row = t*B_pad + b (time-major)

    # Stack per-layer LSTM weights for the fused kernel.
    w_ih0 = params["lstm"][0]["w_ih"].astype(compute_dtype)
    if L > 1:
        w_ih_rest = jnp.stack(
            [params["lstm"][l]["w_ih"] for l in range(1, L)]).astype(compute_dtype)
    else:
        w_ih_rest = None                          # not passed to the kernel
    w_hh = jnp.stack([params["lstm"][l]["w_hh"] for l in range(L)]).astype(compute_dtype)
    b = jnp.stack([params["lstm"][l]["b"] for l in range(L)]).astype(jnp.float32)

    tc = _pick_chunk(T, time_chunk)
    h_last = fused_lstm(x_flat, w_ih0, w_ih_rest, w_hh, b,
                        seq_len=T, batch=B_pad, num_layers=L,
                        hidden_dim=H, time_chunk=tc, unroll=unroll)

    # Dropout is identity in eval/inference mode (as in model.eval()).
    log_probs = fc_logsoftmax(h_last,
                              params["w_fc"].astype(compute_dtype),
                              params["b_fc"].astype(jnp.float32),
                              vocab_tile=vocab_tile)
    return log_probs[:B]


# Pure-JAX reference of the same forward pass (for correctness checking).
def reference_forward(params, x_ids):
    emb = params["embedding"][x_ids]              # (B, T, E)
    B, T, _ = emb.shape
    H = params["lstm"][0]["w_hh"].shape[0]
    x = emb
    for layer in params["lstm"]:
        w_ih, w_hh, bb = layer["w_ih"], layer["w_hh"], layer["b"]
        h = jnp.zeros((B, H), jnp.float32)
        c = jnp.zeros((B, H), jnp.float32)
        outs = []
        for t in range(T):
            g = x[:, t] @ w_ih + h @ w_hh + bb
            i = jax.nn.sigmoid(g[:, 0 * H:1 * H])
            f = jax.nn.sigmoid(g[:, 1 * H:2 * H])
            gg = jnp.tanh(g[:, 2 * H:3 * H])
            o = jax.nn.sigmoid(g[:, 3 * H:4 * H])
            c = f * c + i * gg
            h = o * jnp.tanh(c)
            outs.append(h)
        x = jnp.stack(outs, axis=1)
    h_last = x[:, -1]
    logits = h_last @ params["w_fc"] + params["b_fc"]
    return jax.nn.log_softmax(logits, axis=1)


if __name__ == "__main__":
    vocab_size = 32
    embedding_dim = 16
    hidden_dim = 32
    num_layers = 2
    batch = 2
    seq_len = 8

    key = jax.random.PRNGKey(0)
    k_param, k_data = jax.random.split(key)
    params = init_params(k_param, vocab_size, embedding_dim, hidden_dim, num_layers)
    x_ids = jax.random.randint(k_data, (batch, seq_len), 0, vocab_size, jnp.int32)

    ref = reference_forward(params, x_ids)

    # f32 compute path: tight parity with the PyTorch-equivalent reference.
    # time_chunk=4 -> grid=(2,) so the cross-chunk state carry is exercised.
    lp_f32 = next_word_lstm_forward(params, x_ids, time_chunk=4,
                                    compute_dtype=jnp.float32)
    jax.block_until_ready(lp_f32)
    assert lp_f32.shape == (batch, vocab_size)
    assert bool(jnp.all(jnp.abs(jnp.sum(jnp.exp(lp_f32), axis=1) - 1.0) < 1e-4))
    max_err = float(jnp.max(jnp.abs(lp_f32 - ref)))
    assert max_err < 5e-2, max_err

    # Default bf16 MXU path (halved weight HBM/VMEM traffic): looser tolerance.
    lp_bf16 = next_word_lstm_forward(params, x_ids, time_chunk=4)
    jax.block_until_ready(lp_bf16)
    assert lp_bf16.shape == (batch, vocab_size)
    assert bool(jnp.all(jnp.isfinite(lp_bf16)))
    assert bool(jnp.all(jnp.abs(jnp.sum(jnp.exp(lp_bf16), axis=1) - 1.0) < 1e-3))
    assert float(jnp.max(jnp.abs(lp_bf16 - ref))) < 0.5

    print("KERNEL_OK")
</pallas_src>

<mosaic_0001>
module attributes {stable_mosaic.version = 11 : i64} {
  func.func @_fused_lstm_kernel(%arg0: i32, %arg1: memref<32x16xf32, #tpu.memory_space<vmem>>, %arg2: memref<16x128xf32, #tpu.memory_space<vmem>>, %arg3: memref<1x32x128xf32, #tpu.memory_space<vmem>>, %arg4: memref<2x32x128xf32, #tpu.memory_space<vmem>>, %arg5: memref<2x1x128xf32, #tpu.memory_space<vmem>>, %arg6: memref<8x32xf32, #tpu.memory_space<vmem>>, %arg7: memref<32x128xf32, #tpu.memory_space<vmem>>, %arg8: memref<32x32xf32, #tpu.memory_space<vmem>>, %arg9: memref<2x8x32xf32, #tpu.memory_space<vmem>>, %arg10: memref<2x8x32xf32, #tpu.memory_space<vmem>>) attributes {dimension_semantics = [#tpu.dimension_semantics<arbitrary>], iteration_bounds = array<i64: 2>, scalar_prefetch = 0 : i64, scratch_operands = 4 : i64, tpu.core_type = #tpu.core_type<tc>, window_params = [{transform_indices = @transform_0, window_bounds = array<i64: 32, 16>}, {pipeline_mode = #tpu.pipeline_mode<synchronous>, transform_indices = @transform_1, window_bounds = array<i64: 16, 128>}, {pipeline_mode = #tpu.pipeline_mode<synchronous>, transform_indices = @transform_2, window_bounds = array<i64: 1, 32, 128>}, {pipeline_mode = #tpu.pipeline_mode<synchronous>, transform_indices = @transform_3, window_bounds = array<i64: 2, 32, 128>}, {pipeline_mode = #tpu.pipeline_mode<synchronous>, transform_indices = @transform_4, window_bounds = array<i64: 2, 1, 128>}, {pipeline_mode = #tpu.pipeline_mode<synchronous>, transform_indices = @transform_5, window_bounds = array<i64: 8, 32>}]} {
    %c0_i32 = arith.constant 0 : i32
    %0 = arith.cmpi eq, %arg0, %c0_i32 : i32
    %1 = arith.extui %0 : i1 to i32
    %c0_i32_0 = arith.constant 0 : i32
    %2 = arith.cmpi ne, %1, %c0_i32_0 : i32
    scf.if %2 {
      %cst_198 = arith.constant 0.000000e+00 : f32
      %375 = vector.broadcast %cst_198 : f32 to vector<2x8x32xf32>
      %c0_199 = arith.constant 0 : index
      %c0_200 = arith.constant 0 : index
      %c0_201 = arith.constant 0 : index
      %376 = vector.load %arg9[%c0_199, %c0_200, %c0_201] : memref<2x8x32xf32, #tpu.memory_space<vmem>>, vector<2x8x32xf32>
      tpu.vector_store %arg9[%c0_199, %c0_200, %c0_201], %375 {strides = array<i32>} : memref<2x8x32xf32, #tpu.memory_space<vmem>>, vector<2x8x32xf32>,
      %cst_202 = arith.constant 0.000000e+00 : f32
      %377 = vector.broadcast %cst_202 : f32 to vector<2x8x32xf32>
      %c0_203 = arith.constant 0 : index
      %c0_204 = arith.constant 0 : index
      %c0_205 = arith.constant 0 : index
      %378 = vector.load %arg10[%c0_203, %c0_204, %c0_205] : memref<2x8x32xf32, #tpu.memory_space<vmem>>, vector<2x8x32xf32>
      tpu.vector_store %arg10[%c0_203, %c0_204, %c0_205], %377 {strides = array<i32>} : memref<2x8x32xf32, #tpu.memory_space<vmem>>, vector<2x8x32xf32>,
    } else {
    }
    %c0 = arith.constant 0 : index
    %c0_1 = arith.constant 0 : index
    %3 = vector.load %arg1[%c0, %c0_1] : memref<32x16xf32, #tpu.memory_space<vmem>>, vector<32x16xf32>
    %c0_2 = arith.constant 0 : index
    %c0_3 = arith.constant 0 : index
    %4 = vector.load %arg2[%c0_2, %c0_3] : memref<16x128xf32, #tpu.memory_space<vmem>>, vector<16x128xf32>
    %cst = arith.constant dense<0.000000e+00> : vector<32x128xf32>
    %5 = tpu.matmul %3, %4, %cst {dimension_numbers = #tpu.dot_dimension_numbers<[1], [0], [0], [1], [0, 0, 1, 1], [], []>} : vector<32x16xf32>, vector<16x128xf32>, vector<32x128xf32> -> vector<32x128xf32>
    %c0_4 = arith.constant 0 : index
    %c0_5 = arith.constant 0 : index
    %c0_6 = arith.constant 0 : index
    %6 = vector.load %arg5[%c0_4, %c0_5, %c0_6] : memref<2x1x128xf32, #tpu.memory_space<vmem>>, vector<1x1x128xf32>
    %7 = vector.shape_cast %6 : vector<1x1x128xf32> to vector<1x128xf32>
    %8 = vector.broadcast %7 : vector<1x128xf32> to vector<32x128xf32>
    %9 = arith.addf %5, %8 : vector<32x128xf32>
    %c0_7 = arith.constant 0 : index
    %c0_8 = arith.constant 0 : index
    %10 = vector.load %arg7[%c0_7, %c0_8] : memref<32x128xf32, #tpu.memory_space<vmem>>, vector<32x128xf32>
    tpu.vector_store %arg7[%c0_7, %c0_8], %9 {strides = array<i32>} : memref<32x128xf32, #tpu.memory_space<vmem>>, vector<32x128xf32>,
    %c0_i32_9 = arith.constant 0 : i32
    %c8_i32 = arith.constant 8 : i32
    %11 = arith.muli %c0_i32_9, %c8_i32 : i32
    %12 = tpu.assume_multiple %11, 8 : i32
    %13 = arith.index_cast %12 : i32 to index
    %c0_10 = arith.constant 0 : index
    %14 = vector.load %arg7[%13, %c0_10] : memref<32x128xf32, #tpu.memory_space<vmem>>, vector<8x128xf32>
    %c0_11 = arith.constant 0 : index
    %c0_12 = arith.constant 0 : index
    %c0_13 = arith.constant 0 : index
    %15 = vector.load %arg9[%c0_11, %c0_12, %c0_13] : memref<2x8x32xf32, #tpu.memory_space<vmem>>, vector<1x8x32xf32>
    %16 = vector.shape_cast %15 : vector<1x8x32xf32> to vector<8x32xf32>
    %c0_14 = arith.constant 0 : index
    %c0_15 = arith.constant 0 : index
    %c0_16 = arith.constant 0 : index
    %17 = vector.load %arg4[%c0_14, %c0_15, %c0_16] : memref<2x32x128xf32, #tpu.memory_space<vmem>>, vector<1x32x128xf32>
    %18 = vector.shape_cast %17 : vector<1x32x128xf32> to vector<32x128xf32>
    %cst_17 = arith.constant dense<0.000000e+00> : vector<8x128xf32>
    %19 = tpu.matmul %16, %18, %cst_17 {dimension_numbers = #tpu.dot_dimension_numbers<[1], [0], [0], [1], [0, 0, 1, 1], [], []>} : vector<8x32xf32>, vector<32x128xf32>, vector<8x128xf32> -> vector<8x128xf32>
    %20 = arith.addf %14, %19 : vector<8x128xf32>
    %21 = vector.extract_strided_slice %20 {offsets = [0, 0], sizes = [8, 32], strides = [1, 1]} : vector<8x128xf32> to vector<8x32xf32>
    %22 = arith.negf %21 : vector<8x32xf32>
    %23 = math.exp %22 : vector<8x32xf32>
    %cst_18 = arith.constant 1.000000e+00 : f32
    %24 = vector.broadcast %cst_18 : f32 to vector<8x32xf32>
    %25 = arith.addf %24, %23 : vector<8x32xf32>
    %26 = arith.divf %24, %25 : vector<8x32xf32>
    %27 = vector.extract_strided_slice %20 {offsets = [0, 32], sizes = [8, 32], strides = [1, 1]} : vector<8x128xf32> to vector<8x32xf32>
    %28 = arith.negf %27 : vector<8x32xf32>
    %29 = math.exp %28 : vector<8x32xf32>
    %cst_19 = arith.constant 1.000000e+00 : f32
    %30 = vector.broadcast %cst_19 : f32 to vector<8x32xf32>
    %31 = arith.addf %30, %29 : vector<8x32xf32>
    %32 = arith.divf %30, %31 : vector<8x32xf32>
    %33 = vector.extract_strided_slice %20 {offsets = [0, 64], sizes = [8, 32], strides = [1, 1]} : vector<8x128xf32> to vector<8x32xf32>
    %34 = math.tanh %33 : vector<8x32xf32>
    %35 = vector.extract_strided_slice %20 {offsets = [0, 96], sizes = [8, 32], strides = [1, 1]} : vector<8x128xf32> to vector<8x32xf32>
    %36 = arith.negf %35 : vector<8x32xf32>
    %37 = math.exp %36 : vector<8x32xf32>
    %cst_20 = arith.constant 1.000000e+00 : f32
    %38 = vector.broadcast %cst_20 : f32 to vector<8x32xf32>
    %39 = arith.addf %38, %37 : vector<8x32xf32>
    %40 = arith.divf %38, %39 : vector<8x32xf32>
    %c0_21 = arith.constant 0 : index
    %c0_22 = arith.constant 0 : index
    %c0_23 = arith.constant 0 : index
    %41 = vector.load %arg10[%c0_21, %c0_22, %c0_23] : memref<2x8x32xf32, #tpu.memory_space<vmem>>, vector<1x8x32xf32>
    %42 = vector.shape_cast %41 : vector<1x8x32xf32> to vector<8x32xf32>
    %43 = arith.mulf %32, %42 : vector<8x32xf32>
    %44 = arith.mulf %26, %34 : vector<8x32xf32>
    %45 = arith.addf %43, %44 : vector<8x32xf32>
    %46 = math.tanh %45 : vector<8x32xf32>
    %47 = arith.mulf %40, %46 : vector<8x32xf32>
    %c0_24 = arith.constant 0 : index
    %c0_25 = arith.constant 0 : index
    %c0_26 = arith.constant 0 : index
    %48 = vector.load %arg10[%c0_24, %c0_25, %c0_26] : memref<2x8x32xf32, #tpu.memory_space<vmem>>, vector<1x8x32xf32>
    %49 = vector.shape_cast %48 : vector<1x8x32xf32> to vector<8x32xf32>
    %50 = vector.shape_cast %45 : vector<8x32xf32> to vector<1x8x32xf32>
    tpu.vector_store %arg10[%c0_24, %c0_25, %c0_26], %50 {strides = array<i32>} : memref<2x8x32xf32, #tpu.memory_space<vmem>>, vector<1x8x32xf32>,
    %c0_27 = arith.constant 0 : index
    %c0_28 = arith.constant 0 : index
    %c0_29 = arith.constant 0 : index
    %51 = vector.load %arg9[%c0_27, %c0_28, %c0_29] : memref<2x8x32xf32, #tpu.memory_space<vmem>>, vector<1x8x32xf32>
    %52 = vector.shape_cast %51 : vector<1x8x32xf32> to vector<8x32xf32>
    %53 = vector.shape_cast %47 : vector<8x32xf32> to vector<1x8x32xf32>
    tpu.vector_store %arg9[%c0_27, %c0_28, %c0_29], %53 {strides = array<i32>} : memref<2x8x32xf32, #tpu.memory_space<vmem>>, vector<1x8x32xf32>,
    %54 = arith.index_cast %12 : i32 to index
    %c0_30 = arith.constant 0 : index
    %55 = vector.load %arg8[%54, %c0_30] : memref<32x32xf32, #tpu.memory_space<vmem>>, vector<8x32xf32>
    tpu.vector_store %arg8[%54, %c0_30], %47 {strides = array<i32>} : memref<32x32xf32, #tpu.memory_space<vmem>>, vector<8x32xf32>,
    %c1_i32 = arith.constant 1 : i32
    %c8_i32_31 = arith.constant 8 : i32
    %56 = arith.muli %c1_i32, %c8_i32_31 : i32
    %57 = tpu.assume_multiple %56, 8 : i32
    %58 = arith.index_cast %57 : i32 to index
    %c0_32 = arith.constant 0 : index
    %59 = vector.load %arg7[%58, %c0_32] : memref<32x128xf32, #tpu.memory_space<vmem>>, vector<8x128xf32>
    %c0_33 = arith.constant 0 : index
    %c0_34 = arith.constant 0 : index
    %c0_35 = arith.constant 0 : index
    %60 = vector.load %arg9[%c0_33, %c0_34, %c0_35] : memref<2x8x32xf32, #tpu.memory_space<vmem>>, vector<1x8x32xf32>
    %61 = vector.shape_cast %60 : vector<1x8x32xf32> to vector<8x32xf32>
    %c0_36 = arith.constant 0 : index
    %c0_37 = arith.constant 0 : index
    %c0_38 = arith.constant 0 : index
    %62 = vector.load %arg4[%c0_36, %c0_37, %c0_38] : memref<2x32x128xf32, #tpu.memory_space<vmem>>, vector<1x32x128xf32>
    %63 = vector.shape_cast %62 : vector<1x32x128xf32> to vector<32x128xf32>
    %cst_39 = arith.constant dense<0.000000e+00> : vector<8x128xf32>
    %64 = tpu.matmul %61, %63, %cst_39 {dimension_numbers = #tpu.dot_dimension_numbers<[1], [0], [0], [1], [0, 0, 1, 1], [], []>} : vector<8x32xf32>, vector<32x128xf32>, vector<8x128xf32> -> vector<8x128xf32>
    %65 = arith.addf %59, %64 : vector<8x128xf32>
    %66 = vector.extract_strided_slice %65 {offsets = [0, 0], sizes = [8, 32], strides = [1, 1]} : vector<8x128xf32> to vector<8x32xf32>
    %67 = arith.negf %66 : vector<8x32xf32>
    %68 = math.exp %67 : vector<8x32xf32>
    %cst_40 = arith.constant 1.000000e+00 : f32
    %69 = vector.broadcast %cst_40 : f32 to vector<8x32xf32>
    %70 = arith.addf %69, %68 : vector<8x32xf32>
    %71 = arith.divf %69, %70 : vector<8x32xf32>
    %72 = vector.extract_strided_slice %65 {offsets = [0, 32], sizes = [8, 32], strides = [1, 1]} : vector<8x128xf32> to vector<8x32xf32>
    %73 = arith.negf %72 : vector<8x32xf32>
    %74 = math.exp %73 : vector<8x32xf32>
    %cst_41 = arith.constant 1.000000e+00 : f32
    %75 = vector.broadcast %cst_41 : f32 to vector<8x32xf32>
    %76 = arith.addf %75, %74 : vector<8x32xf32>
    %77 = arith.divf %75, %76 : vector<8x32xf32>
    %78 = vector.extract_strided_slice %65 {offsets = [0, 64], sizes = [8, 32], strides = [1, 1]} : vector<8x128xf32> to vector<8x32xf32>
    %79 = math.tanh %78 : vector<8x32xf32>
    %80 = vector.extract_strided_slice %65 {offsets = [0, 96], sizes = [8, 32], strides = [1, 1]} : vector<8x128xf32> to vector<8x32xf32>
    %81 = arith.negf %80 : vector<8x32xf32>
    %82 = math.exp %81 : vector<8x32xf32>
    %cst_42 = arith.constant 1.000000e+00 : f32
    %83 = vector.broadcast %cst_42 : f32 to vector<8x32xf32>
    %84 = arith.addf %83, %82 : vector<8x32xf32>
    %85 = arith.divf %83, %84 : vector<8x32xf32>
    %c0_43 = arith.constant 0 : index
    %c0_44 = arith.constant 0 : index
    %c0_45 = arith.constant 0 : index
    %86 = vector.load %arg10[%c0_43, %c0_44, %c0_45] : memref<2x8x32xf32, #tpu.memory_space<vmem>>, vector<1x8x32xf32>
    %87 = vector.shape_cast %86 : vector<1x8x32xf32> to vector<8x32xf32>
    %88 = arith.mulf %77, %87 : vector<8x32xf32>
    %89 = arith.mulf %71, %79 : vector<8x32xf32>
    %90 = arith.addf %88, %89 : vector<8x32xf32>
    %91 = math.tanh %90 : vector<8x32xf32>
    %92 = arith.mulf %85, %91 : vector<8x32xf32>
    %c0_46 = arith.constant 0 : index
    %c0_47 = arith.constant 0 : index
    %c0_48 = arith.constant 0 : index
    %93 = vector.load %arg10[%c0_46, %c0_47, %c0_48] : memref<2x8x32xf32, #tpu.memory_space<vmem>>, vector<1x8x32xf32>
    %94 = vector.shape_cast %93 : vector<1x8x32xf32> to vector<8x32xf32>
    %95 = vector.shape_cast %90 : vector<8x32xf32> to vector<1x8x32xf32>
    tpu.vector_store %arg10[%c0_46, %c0_47, %c0_48], %95 {strides = array<i32>} : memref<2x8x32xf32, #tpu.memory_space<vmem>>, vector<1x8x32xf32>,
    %c0_49 = arith.constant 0 : index
    %c0_50 = arith.constant 0 : index
    %c0_51 = arith.constant 0 : index
    %96 = vector.load %arg9[%c0_49, %c0_50, %c0_51] : memref<2x8x32xf32, #tpu.memory_space<vmem>>, vector<1x8x32xf32>
    %97 = vector.shape_cast %96 : vector<1x8x32xf32> to vector<8x32xf32>
    %98 = vector.shape_cast %92 : vector<8x32xf32> to vector<1x8x32xf32>
    tpu.vector_store %arg9[%c0_49, %c0_50, %c0_51], %98 {strides = array<i32>} : memref<2x8x32xf32, #tpu.memory_space<vmem>>, vector<1x8x32xf32>,
    %99 = arith.index_cast %57 : i32 to index
    %c0_52 = arith.constant 0 : index
    %100 = vector.load %arg8[%99, %c0_52] : memref<32x32xf32, #tpu.memory_space<vmem>>, vector<8x32xf32>
    tpu.vector_store %arg8[%99, %c0_52], %92 {strides = array<i32>} : memref<32x32xf32, #tpu.memory_space<vmem>>, vector<8x32xf32>,
    %c2_i32 = arith.constant 2 : i32
    %c8_i32_53 = arith.constant 8 : i32
    %101 = arith.muli %c2_i32, %c8_i32_53 : i32
    %102 = tpu.assume_multiple %101, 8 : i32
    %103 = arith.index_cast %102 : i32 to index
    %c0_54 = arith.constant 0 : index
    %104 = vector.load %arg7[%103, %c0_54] : memref<32x128xf32, #tpu.memory_space<vmem>>, vector<8x128xf32>
    %c0_55 = arith.constant 0 : index
    %c0_56 = arith.constant 0 : index
    %c0_57 = arith.constant 0 : index
    %105 = vector.load %arg9[%c0_55, %c0_56, %c0_57] : memref<2x8x32xf32, #tpu.memory_space<vmem>>, vector<1x8x32xf32>
    %106 = vector.shape_cast %105 : vector<1x8x32xf32> to vector<8x32xf32>
    %c0_58 = arith.constant 0 : index
    %c0_59 = arith.constant 0 : index
    %c0_60 = arith.constant 0 : index
    %107 = vector.load %arg4[%c0_58, %c0_59, %c0_60] : memref<2x32x128xf32, #tpu.memory_space<vmem>>, vector<1x32x128xf32>
    %108 = vector.shape_cast %107 : vector<1x32x128xf32> to vector<32x128xf32>
    %cst_61 = arith.constant dense<0.000000e+00> : vector<8x128xf32>
    %109 = tpu.matmul %106, %108, %cst_61 {dimension_numbers = #tpu.dot_dimension_numbers<[1], [0], [0], [1], [0, 0, 1, 1], [], []>} : vector<8x32xf32>, vector<32x128xf32>, vector<8x128xf32> -> vector<8x128xf32>
    %110 = arith.addf %104, %109 : vector<8x128xf32>
    %111 = vector.extract_strided_slice %110 {offsets = [0, 0], sizes = [8, 32], strides = [1, 1]} : vector<8x128xf32> to vector<8x32xf32>
    %112 = arith.negf %111 : vector<8x32xf32>
    %113 = math.exp %112 : vector<8x32xf32>
    %cst_62 = arith.constant 1.000000e+00 : f32
    %114 = vector.broadcast %cst_62 : f32 to vector<8x32xf32>
    %115 = arith.addf %114, %113 : vector<8x32xf32>
    %116 = arith.divf %114, %115 : vector<8x32xf32>
    %117 = vector.extract_strided_slice %110 {offsets = [0, 32], sizes = [8, 32], strides = [1, 1]} : vector<8x128xf32> to vector<8x32xf32>
    %118 = arith.negf %117 : vector<8x32xf32>
    %119 = math.exp %118 : vector<8x32xf32>
    %cst_63 = arith.constant 1.000000e+00 : f32
    %120 = vector.broadcast %cst_63 : f32 to vector<8x32xf32>
    %121 = arith.addf %120, %119 : vector<8x32xf32>
    %122 = arith.divf %120, %121 : vector<8x32xf32>
    %123 = vector.extract_strided_slice %110 {offsets = [0, 64], sizes = [8, 32], strides = [1, 1]} : vector<8x128xf32> to vector<8x32xf32>
    %124 = math.tanh %123 : vector<8x32xf32>
    %125 = vector.extract_strided_slice %110 {offsets = [0, 96], sizes = [8, 32], strides = [1, 1]} : vector<8x128xf32> to vector<8x32xf32>
    %126 = arith.negf %125 : vector<8x32xf32>
    %127 = math.exp %126 : vector<8x32xf32>
    %cst_64 = arith.constant 1.000000e+00 : f32
    %128 = vector.broadcast %cst_64 : f32 to vector<8x32xf32>
    %129 = arith.addf %128, %127 : vector<8x32xf32>
    %130 = arith.divf %128, %129 : vector<8x32xf32>
    %c0_65 = arith.constant 0 : index
    %c0_66 = arith.constant 0 : index
    %c0_67 = arith.constant 0 : index
    %131 = vector.load %arg10[%c0_65, %c0_66, %c0_67] : memref<2x8x32xf32, #tpu.memory_space<vmem>>, vector<1x8x32xf32>
    %132 = vector.shape_cast %131 : vector<1x8x32xf32> to vector<8x32xf32>
    %133 = arith.mulf %122, %132 : vector<8x32xf32>
    %134 = arith.mulf %116, %124 : vector<8x32xf32>
    %135 = arith.addf %133, %134 : vector<8x32xf32>
    %136 = math.tanh %135 : vector<8x32xf32>
    %137 = arith.mulf %130, %136 : vector<8x32xf32>
    %c0_68 = arith.constant 0 : index
    %c0_69 = arith.constant 0 : index
    %c0_70 = arith.constant 0 : index
    %138 = vector.load %arg10[%c0_68, %c0_69, %c0_70] : memref<2x8x32xf32, #tpu.memory_space<vmem>>, vector<1x8x32xf32>
    %139 = vector.shape_cast %138 : vector<1x8x32xf32> to vector<8x32xf32>
    %140 = vector.shape_cast %135 : vector<8x32xf32> to vector<1x8x32xf32>
    tpu.vector_store %arg10[%c0_68, %c0_69, %c0_70], %140 {strides = array<i32>} : memref<2x8x32xf32, #tpu.memory_space<vmem>>, vector<1x8x32xf32>,
    %c0_71 = arith.constant 0 : index
    %c0_72 = arith.constant 0 : index
    %c0_73 = arith.constant 0 : index
    %141 = vector.load %arg9[%c0_71, %c0_72, %c0_73] : memref<2x8x32xf32, #tpu.memory_space<vmem>>, vector<1x8x32xf32>
    %142 = vector.shape_cast %141 : vector<1x8x32xf32> to vector<8x32xf32>
    %143 = vector.shape_cast %137 : vector<8x32xf32> to vector<1x8x32xf32>
    tpu.vector_store %arg9[%c0_71, %c0_72, %c0_73], %143 {strides = array<i32>} : memref<2x8x32xf32, #tpu.memory_space<vmem>>, vector<1x8x32xf32>,
    %144 = arith.index_cast %102 : i32 to index
    %c0_74 = arith.constant 0 : index
    %145 = vector.load %arg8[%144, %c0_74] : memref<32x32xf32, #tpu.memory_space<vmem>>, vector<8x32xf32>
    tpu.vector_store %arg8[%144, %c0_74], %137 {strides = array<i32>} : memref<32x32xf32, #tpu.memory_space<vmem>>, vector<8x32xf32>,
    %c3_i32 = arith.constant 3 : i32
    %c8_i32_75 = arith.constant 8 : i32
    %146 = arith.muli %c3_i32, %c8_i32_75 : i32
    %147 = tpu.assume_multiple %146, 8 : i32
    %148 = arith.index_cast %147 : i32 to index
    %c0_76 = arith.constant 0 : index
    %149 = vector.load %arg7[%148, %c0_76] : memref<32x128xf32, #tpu.memory_space<vmem>>, vector<8x128xf32>
    %c0_77 = arith.constant 0 : index
    %c0_78 = arith.constant 0 : index
    %c0_79 = arith.constant 0 : index
    %150 = vector.load %arg9[%c0_77, %c0_78, %c0_79] : memref<2x8x32xf32, #tpu.memory_space<vmem>>, vector<1x8x32xf32>
    %151 = vector.shape_cast %150 : vector<1x8x32xf32> to vector<8x32xf32>
    %c0_80 = arith.constant 0 : index
    %c0_81 = arith.constant 0 : index
    %c0_82 = arith.constant 0 : index
    %152 = vector.load %arg4[%c0_80, %c0_81, %c0_82] : memref<2x32x128xf32, #tpu.memory_space<vmem>>, vector<1x32x128xf32>
    %153 = vector.shape_cast %152 : vector<1x32x128xf32> to vector<32x128xf32>
    %cst_83 = arith.constant dense<0.000000e+00> : vector<8x128xf32>
    %154 = tpu.matmul %151, %153, %cst_83 {dimension_numbers = #tpu.dot_dimension_numbers<[1], [0], [0], [1], [0, 0, 1, 1], [], []>} : vector<8x32xf32>, vector<32x128xf32>, vector<8x128xf32> -> vector<8x128xf32>
    %155 = arith.addf %149, %154 : vector<8x128xf32>
    %156 = vector.extract_strided_slice %155 {offsets = [0, 0], sizes = [8, 32], strides = [1, 1]} : vector<8x128xf32> to vector<8x32xf32>
    %157 = arith.negf %156 : vector<8x32xf32>
    %158 = math.exp %157 : vector<8x32xf32>
    %cst_84 = arith.constant 1.000000e+00 : f32
    %159 = vector.broadcast %cst_84 : f32 to vector<8x32xf32>
    %160 = arith.addf %159, %158 : vector<8x32xf32>
    %161 = arith.divf %159, %160 : vector<8x32xf32>
    %162 = vector.extract_strided_slice %155 {offsets = [0, 32], sizes = [8, 32], strides = [1, 1]} : vector<8x128xf32> to vector<8x32xf32>
    %163 = arith.negf %162 : vector<8x32xf32>
    %164 = math.exp %163 : vector<8x32xf32>
    %cst_85 = arith.constant 1.000000e+00 : f32
    %165 = vector.broadcast %cst_85 : f32 to vector<8x32xf32>
    %166 = arith.addf %165, %164 : vector<8x32xf32>
    %167 = arith.divf %165, %166 : vector<8x32xf32>
    %168 = vector.extract_strided_slice %155 {offsets = [0, 64], sizes = [8, 32], strides = [1, 1]} : vector<8x128xf32> to vector<8x32xf32>
    %169 = math.tanh %168 : vector<8x32xf32>
    %170 = vector.extract_strided_slice %155 {offsets = [0, 96], sizes = [8, 32], strides = [1, 1]} : vector<8x128xf32> to vector<8x32xf32>
    %171 = arith.negf %170 : vector<8x32xf32>
    %172 = math.exp %171 : vector<8x32xf32>
    %cst_86 = arith.constant 1.000000e+00 : f32
    %173 = vector.broadcast %cst_86 : f32 to vector<8x32xf32>
    %174 = arith.addf %173, %172 : vector<8x32xf32>
    %175 = arith.divf %173, %174 : vector<8x32xf32>
    %c0_87 = arith.constant 0 : index
    %c0_88 = arith.constant 0 : index
    %c0_89 = arith.constant 0 : index
    %176 = vector.load %arg10[%c0_87, %c0_88, %c0_89] : memref<2x8x32xf32, #tpu.memory_space<vmem>>, vector<1x8x32xf32>
    %177 = vector.shape_cast %176 : vector<1x8x32xf32> to vector<8x32xf32>
    %178 = arith.mulf %167, %177 : vector<8x32xf32>
    %179 = arith.mulf %161, %169 : vector<8x32xf32>
    %180 = arith.addf %178, %179 : vector<8x32xf32>
    %181 = math.tanh %180 : vector<8x32xf32>
    %182 = arith.mulf %175, %181 : vector<8x32xf32>
    %c0_90 = arith.constant 0 : index
    %c0_91 = arith.constant 0 : index
    %c0_92 = arith.constant 0 : index
    %183 = vector.load %arg10[%c0_90, %c0_91, %c0_92] : memref<2x8x32xf32, #tpu.memory_space<vmem>>, vector<1x8x32xf32>
    %184 = vector.shape_cast %183 : vector<1x8x32xf32> to vector<8x32xf32>
    %185 = vector.shape_cast %180 : vector<8x32xf32> to vector<1x8x32xf32>
    tpu.vector_store %arg10[%c0_90, %c0_91, %c0_92], %185 {strides = array<i32>} : memref<2x8x32xf32, #tpu.memory_space<vmem>>, vector<1x8x32xf32>,
    %c0_93 = arith.constant 0 : index
    %c0_94 = arith.constant 0 : index
    %c0_95 = arith.constant 0 : index
    %186 = vector.load %arg9[%c0_93, %c0_94, %c0_95] : memref<2x8x32xf32, #tpu.memory_space<vmem>>, vector<1x8x32xf32>
    %187 = vector.shape_cast %186 : vector<1x8x32xf32> to vector<8x32xf32>
    %188 = vector.shape_cast %182 : vector<8x32xf32> to vector<1x8x32xf32>
    tpu.vector_store %arg9[%c0_93, %c0_94, %c0_95], %188 {strides = array<i32>} : memref<2x8x32xf32, #tpu.memory_space<vmem>>, vector<1x8x32xf32>,
    %189 = arith.index_cast %147 : i32 to index
    %c0_96 = arith.constant 0 : index
    %190 = vector.load %arg8[%189, %c0_96] : memref<32x32xf32, #tpu.memory_space<vmem>>, vector<8x32xf32>
    tpu.vector_store %arg8[%189, %c0_96], %182 {strides = array<i32>} : memref<32x32xf32, #tpu.memory_space<vmem>>, vector<8x32xf32>,
    %c4_i32 = arith.constant 4 : i32
    %c0_97 = arith.constant 0 : index
    %c0_98 = arith.constant 0 : index
    %191 = vector.load %arg8[%c0_97, %c0_98] : memref<32x32xf32, #tpu.memory_space<vmem>>, vector<32x32xf32>
    %c0_99 = arith.constant 0 : index
    %c0_100 = arith.constant 0 : index
    %c0_101 = arith.constant 0 : index
    %192 = vector.load %arg3[%c0_99, %c0_100, %c0_101] : memref<1x32x128xf32, #tpu.memory_space<vmem>>, vector<1x32x128xf32>
    %193 = vector.shape_cast %192 : vector<1x32x128xf32> to vector<32x128xf32>
    %cst_102 = arith.constant dense<0.000000e+00> : vector<32x128xf32>
    %194 = tpu.matmul %191, %193, %cst_102 {dimension_numbers = #tpu.dot_dimension_numbers<[1], [0], [0], [1], [0, 0, 1, 1], [], []>} : vector<32x32xf32>, vector<32x128xf32>, vector<32x128xf32> -> vector<32x128xf32>
    %c1 = arith.constant 1 : index
    %c0_103 = arith.constant 0 : index
    %c0_104 = arith.constant 0 : index
    %195 = vector.load %arg5[%c1, %c0_103, %c0_104] : memref<2x1x128xf32, #tpu.memory_space<vmem>>, vector<1x1x128xf32>
    %196 = vector.shape_cast %195 : vector<1x1x128xf32> to vector<1x128xf32>
    %197 = vector.broadcast %196 : vector<1x128xf32> to vector<32x128xf32>
    %198 = arith.addf %194, %197 : vector<32x128xf32>
    %c0_105 = arith.constant 0 : index
    %c0_106 = arith.constant 0 : index
    %199 = vector.load %arg7[%c0_105, %c0_106] : memref<32x128xf32, #tpu.memory_space<vmem>>, vector<32x128xf32>
    tpu.vector_store %arg7[%c0_105, %c0_106], %198 {strides = array<i32>} : memref<32x128xf32, #tpu.memory_space<vmem>>, vector<32x128xf32>,
    %c0_i32_107 = arith.constant 0 : i32
    %c8_i32_108 = arith.constant 8 : i32
    %200 = arith.muli %c0_i32_107, %c8_i32_108 : i32
    %201 = tpu.assume_multiple %200, 8 : i32
    %202 = arith.index_cast %201 : i32 to index
    %c0_109 = arith.constant 0 : index
    %203 = vector.load %arg7[%202, %c0_109] : memref<32x128xf32, #tpu.memory_space<vmem>>, vector<8x128xf32>
    %c1_110 = arith.constant 1 : index
    %c0_111 = arith.constant 0 : index
    %c0_112 = arith.constant 0 : index
    %204 = vector.load %arg9[%c1_110, %c0_111, %c0_112] : memref<2x8x32xf32, #tpu.memory_space<vmem>>, vector<1x8x32xf32>
    %205 = vector.shape_cast %204 : vector<1x8x32xf32> to vector<8x32xf32>
    %c1_113 = arith.constant 1 : index
    %c0_114 = arith.constant 0 : index
    %c0_115 = arith.constant 0 : index
    %206 = vector.load %arg4[%c1_113, %c0_114, %c0_115] : memref<2x32x128xf32, #tpu.memory_space<vmem>>, vector<1x32x128xf32>
    %207 = vector.shape_cast %206 : vector<1x32x128xf32> to vector<32x128xf32>
    %cst_116 = arith.constant dense<0.000000e+00> : vector<8x128xf32>
    %208 = tpu.matmul %205, %207, %cst_116 {dimension_numbers = #tpu.dot_dimension_numbers<[1], [0], [0], [1], [0, 0, 1, 1], [], []>} : vector<8x32xf32>, vector<32x128xf32>, vector<8x128xf32> -> vector<8x128xf32>
    %209 = arith.addf %203, %208 : vector<8x128xf32>
    %210 = vector.extract_strided_slice %209 {offsets = [0, 0], sizes = [8, 32], strides = [1, 1]} : vector<8x128xf32> to vector<8x32xf32>
    %211 = arith.negf %210 : vector<8x32xf32>
    %212 = math.exp %211 : vector<8x32xf32>
    %cst_117 = arith.constant 1.000000e+00 : f32
    %213 = vector.broadcast %cst_117 : f32 to vector<8x32xf32>
    %214 = arith.addf %213, %212 : vector<8x32xf32>
    %215 = arith.divf %213, %214 : vector<8x32xf32>
    %216 = vector.extract_strided_slice %209 {offsets = [0, 32], sizes = [8, 32], strides = [1, 1]} : vector<8x128xf32> to vector<8x32xf32>
    %217 = arith.negf %216 : vector<8x32xf32>
    %218 = math.exp %217 : vector<8x32xf32>
    %cst_118 = arith.constant 1.000000e+00 : f32
    %219 = vector.broadcast %cst_118 : f32 to vector<8x32xf32>
    %220 = arith.addf %219, %218 : vector<8x32xf32>
    %221 = arith.divf %219, %220 : vector<8x32xf32>
    %222 = vector.extract_strided_slice %209 {offsets = [0, 64], sizes = [8, 32], strides = [1, 1]} : vector<8x128xf32> to vector<8x32xf32>
    %223 = math.tanh %222 : vector<8x32xf32>
    %224 = vector.extract_strided_slice %209 {offsets = [0, 96], sizes = [8, 32], strides = [1, 1]} : vector<8x128xf32> to vector<8x32xf32>
    %225 = arith.negf %224 : vector<8x32xf32>
    %226 = math.exp %225 : vector<8x32xf32>
    %cst_119 = arith.constant 1.000000e+00 : f32
    %227 = vector.broadcast %cst_119 : f32 to vector<8x32xf32>
    %228 = arith.addf %227, %226 : vector<8x32xf32>
    %229 = arith.divf %227, %228 : vector<8x32xf32>
    %c1_120 = arith.constant 1 : index
    %c0_121 = arith.constant 0 : index
    %c0_122 = arith.constant 0 : index
    %230 = vector.load %arg10[%c1_120, %c0_121, %c0_122] : memref<2x8x32xf32, #tpu.memory_space<vmem>>, vector<1x8x32xf32>
    %231 = vector.shape_cast %230 : vector<1x8x32xf32> to vector<8x32xf32>
    %232 = arith.mulf %221, %231 : vector<8x32xf32>
    %233 = arith.mulf %215, %223 : vector<8x32xf32>
    %234 = arith.addf %232, %233 : vector<8x32xf32>
    %235 = math.tanh %234 : vector<8x32xf32>
    %236 = arith.mulf %229, %235 : vector<8x32xf32>
    %c1_123 = arith.constant 1 : index
    %c0_124 = arith.constant 0 : index
    %c0_125 = arith.constant 0 : index
    %237 = vector.load %arg10[%c1_123, %c0_124, %c0_125] : memref<2x8x32xf32, #tpu.memory_space<vmem>>, vector<1x8x32xf32>
    %238 = vector.shape_cast %237 : vector<1x8x32xf32> to vector<8x32xf32>
    %239 = vector.shape_cast %234 : vector<8x32xf32> to vector<1x8x32xf32>
    tpu.vector_store %arg10[%c1_123, %c0_124, %c0_125], %239 {strides = array<i32>} : memref<2x8x32xf32, #tpu.memory_space<vmem>>, vector<1x8x32xf32>,
    %c1_126 = arith.constant 1 : index
    %c0_127 = arith.constant 0 : index
    %c0_128 = arith.constant 0 : index
    %240 = vector.load %arg9[%c1_126, %c0_127, %c0_128] : memref<2x8x32xf32, #tpu.memory_space<vmem>>, vector<1x8x32xf32>
    %241 = vector.shape_cast %240 : vector<1x8x32xf32> to vector<8x32xf32>
    %242 = vector.shape_cast %236 : vector<8x32xf32> to vector<1x8x32xf32>
    tpu.vector_store %arg9[%c1_126, %c0_127, %c0_128], %242 {strides = array<i32>} : memref<2x8x32xf32, #tpu.memory_space<vmem>>, vector<1x8x32xf32>,
    %c1_i32_129 = arith.constant 1 : i32
    %c8_i32_130 = arith.constant 8 : i32
    %243 = arith.muli %c1_i32_129, %c8_i32_130 : i32
    %244 = tpu.assume_multiple %243, 8 : i32
    %245 = arith.index_cast %244 : i32 to index
    %c0_131 = arith.constant 0 : index
    %246 = vector.load %arg7[%245, %c0_131] : memref<32x128xf32, #tpu.memory_space<vmem>>, vector<8x128xf32>
    %c1_132 = arith.constant 1 : index
    %c0_133 = arith.constant 0 : index
    %c0_134 = arith.constant 0 : index
    %247 = vector.load %arg9[%c1_132, %c0_133, %c0_134] : memref<2x8x32xf32, #tpu.memory_space<vmem>>, vector<1x8x32xf32>
    %248 = vector.shape_cast %247 : vector<1x8x32xf32> to vector<8x32xf32>
    %c1_135 = arith.constant 1 : index
    %c0_136 = arith.constant 0 : index
    %c0_137 = arith.constant 0 : index
    %249 = vector.load %arg4[%c1_135, %c0_136, %c0_137] : memref<2x32x128xf32, #tpu.memory_space<vmem>>, vector<1x32x128xf32>
    %250 = vector.shape_cast %249 : vector<1x32x128xf32> to vector<32x128xf32>
    %cst_138 = arith.constant dense<0.000000e+00> : vector<8x128xf32>
    %251 = tpu.matmul %248, %250, %cst_138 {dimension_numbers = #tpu.dot_dimension_numbers<[1], [0], [0], [1], [0, 0, 1, 1], [], []>} : vector<8x32xf32>, vector<32x128xf32>, vector<8x128xf32> -> vector<8x128xf32>
    %252 = arith.addf %246, %251 : vector<8x128xf32>
    %253 = vector.extract_strided_slice %252 {offsets = [0, 0], sizes = [8, 32], strides = [1, 1]} : vector<8x128xf32> to vector<8x32xf32>
    %254 = arith.negf %253 : vector<8x32xf32>
    %255 = math.exp %254 : vector<8x32xf32>
    %cst_139 = arith.constant 1.000000e+00 : f32
    %256 = vector.broadcast %cst_139 : f32 to vector<8x32xf32>
    %257 = arith.addf %256, %255 : vector<8x32xf32>
    %258 = arith.divf %256, %257 : vector<8x32xf32>
    %259 = vector.extract_strided_slice %252 {offsets = [0, 32], sizes = [8, 32], strides = [1, 1]} : vector<8x128xf32> to vector<8x32xf32>
    %260 = arith.negf %259 : vector<8x32xf32>
    %261 = math.exp %260 : vector<8x32xf32>
    %cst_140 = arith.constant 1.000000e+00 : f32
    %262 = vector.broadcast %cst_140 : f32 to vector<8x32xf32>
    %263 = arith.addf %262, %261 : vector<8x32xf32>
    %264 = arith.divf %262, %263 : vector<8x32xf32>
    %265 = vector.extract_strided_slice %252 {offsets = [0, 64], sizes = [8, 32], strides = [1, 1]} : vector<8x128xf32> to vector<8x32xf32>
    %266 = math.tanh %265 : vector<8x32xf32>
    %267 = vector.extract_strided_slice %252 {offsets = [0, 96], sizes = [8, 32], strides = [1, 1]} : vector<8x128xf32> to vector<8x32xf32>
    %268 = arith.negf %267 : vector<8x32xf32>
    %269 = math.exp %268 : vector<8x32xf32>
    %cst_141 = arith.constant 1.000000e+00 : f32
    %270 = vector.broadcast %cst_141 : f32 to vector<8x32xf32>
    %271 = arith.addf %270, %269 : vector<8x32xf32>
    %272 = arith.divf %270, %271 : vector<8x32xf32>
    %c1_142 = arith.constant 1 : index
    %c0_143 = arith.constant 0 : index
    %c0_144 = arith.constant 0 : index
    %273 = vector.load %arg10[%c1_142, %c0_143, %c0_144] : memref<2x8x32xf32, #tpu.memory_space<vmem>>, vector<1x8x32xf32>
    %274 = vector.shape_cast %273 : vector<1x8x32xf32> to vector<8x32xf32>
    %275 = arith.mulf %264, %274 : vector<8x32xf32>
    %276 = arith.mulf %258, %266 : vector<8x32xf32>
    %277 = arith.addf %275, %276 : vector<8x32xf32>
    %278 = math.tanh %277 : vector<8x32xf32>
    %279 = arith.mulf %272, %278 : vector<8x32xf32>
    %c1_145 = arith.constant 1 : index
    %c0_146 = arith.constant 0 : index
    %c0_147 = arith.constant 0 : index
    %280 = vector.load %arg10[%c1_145, %c0_146, %c0_147] : memref<2x8x32xf32, #tpu.memory_space<vmem>>, vector<1x8x32xf32>
    %281 = vector.shape_cast %280 : vector<1x8x32xf32> to vector<8x32xf32>
    %282 = vector.shape_cast %277 : vector<8x32xf32> to vector<1x8x32xf32>
    tpu.vector_store %arg10[%c1_145, %c0_146, %c0_147], %282 {strides = array<i32>} : memref<2x8x32xf32, #tpu.memory_space<vmem>>, vector<1x8x32xf32>,
    %c1_148 = arith.constant 1 : index
    %c0_149 = arith.constant 0 : index
    %c0_150 = arith.constant 0 : index
    %283 = vector.load %arg9[%c1_148, %c0_149, %c0_150] : memref<2x8x32xf32, #tpu.memory_space<vmem>>, vector<1x8x32xf32>
    %284 = vector.shape_cast %283 : vector<1x8x32xf32> to vector<8x32xf32>
    %285 = vector.shape_cast %279 : vector<8x32xf32> to vector<1x8x32xf32>
    tpu.vector_store %arg9[%c1_148, %c0_149, %c0_150], %285 {strides = array<i32>} : memref<2x8x32xf32, #tpu.memory_space<vmem>>, vector<1x8x32xf32>,
    %c2_i32_151 = arith.constant 2 : i32
    %c8_i32_152 = arith.constant 8 : i32
    %286 = arith.muli %c2_i32_151, %c8_i32_152 : i32
    %287 = tpu.assume_multiple %286, 8 : i32
    %288 = arith.index_cast %287 : i32 to index
    %c0_153 = arith.constant 0 : index
    %289 = vector.load %arg7[%288, %c0_153] : memref<32x128xf32, #tpu.memory_space<vmem>>, vector<8x128xf32>
    %c1_154 = arith.constant 1 : index
    %c0_155 = arith.constant 0 : index
    %c0_156 = arith.constant 0 : index
    %290 = vector.load %arg9[%c1_154, %c0_155, %c0_156] : memref<2x8x32xf32, #tpu.memory_space<vmem>>, vector<1x8x32xf32>
    %291 = vector.shape_cast %290 : vector<1x8x32xf32> to vector<8x32xf32>
    %c1_157 = arith.constant 1 : index
    %c0_158 = arith.constant 0 : index
    %c0_159 = arith.constant 0 : index
    %292 = vector.load %arg4[%c1_157, %c0_158, %c0_159] : memref<2x32x128xf32, #tpu.memory_space<vmem>>, vector<1x32x128xf32>
    %293 = vector.shape_cast %292 : vector<1x32x128xf32> to vector<32x128xf32>
    %cst_160 = arith.constant dense<0.000000e+00> : vector<8x128xf32>
    %294 = tpu.matmul %291, %293, %cst_160 {dimension_numbers = #tpu.dot_dimension_numbers<[1], [0], [0], [1], [0, 0, 1, 1], [], []>} : vector<8x32xf32>, vector<32x128xf32>, vector<8x128xf32> -> vector<8x128xf32>
    %295 = arith.addf %289, %294 : vector<8x128xf32>
    %296 = vector.extract_strided_slice %295 {offsets = [0, 0], sizes = [8, 32], strides = [1, 1]} : vector<8x128xf32> to vector<8x32xf32>
    %297 = arith.negf %296 : vector<8x32xf32>
    %298 = math.exp %297 : vector<8x32xf32>
    %cst_161 = arith.constant 1.000000e+00 : f32
    %299 = vector.broadcast %cst_161 : f32 to vector<8x32xf32>
    %300 = arith.addf %299, %298 : vector<8x32xf32>
    %301 = arith.divf %299, %300 : vector<8x32xf32>
    %302 = vector.extract_strided_slice %295 {offsets = [0, 32], sizes = [8, 32], strides = [1, 1]} : vector<8x128xf32> to vector<8x32xf32>
    %303 = arith.negf %302 : vector<8x32xf32>
    %304 = math.exp %303 : vector<8x32xf32>
    %cst_162 = arith.constant 1.000000e+00 : f32
    %305 = vector.broadcast %cst_162 : f32 to vector<8x32xf32>
    %306 = arith.addf %305, %304 : vector<8x32xf32>
    %307 = arith.divf %305, %306 : vector<8x32xf32>
    %308 = vector.extract_strided_slice %295 {offsets = [0, 64], sizes = [8, 32], strides = [1, 1]} : vector<8x128xf32> to vector<8x32xf32>
    %309 = math.tanh %308 : vector<8x32xf32>
    %310 = vector.extract_strided_slice %295 {offsets = [0, 96], sizes = [8, 32], strides = [1, 1]} : vector<8x128xf32> to vector<8x32xf32>
    %311 = arith.negf %310 : vector<8x32xf32>
    %312 = math.exp %311 : vector<8x32xf32>
    %cst_163 = arith.constant 1.000000e+00 : f32
    %313 = vector.broadcast %cst_163 : f32 to vector<8x32xf32>
    %314 = arith.addf %313, %312 : vector<8x32xf32>
    %315 = arith.divf %313, %314 : vector<8x32xf32>
    %c1_164 = arith.constant 1 : index
    %c0_165 = arith.constant 0 : index
    %c0_166 = arith.constant 0 : index
    %316 = vector.load %arg10[%c1_164, %c0_165, %c0_166] : memref<2x8x32xf32, #tpu.memory_space<vmem>>, vector<1x8x32xf32>
    %317 = vector.shape_cast %316 : vector<1x8x32xf32> to vector<8x32xf32>
    %318 = arith.mulf %307, %317 : vector<8x32xf32>
    %319 = arith.mulf %301, %309 : vector<8x32xf32>
    %320 = arith.addf %318, %319 : vector<8x32xf32>
    %321 = math.tanh %320 : vector<8x32xf32>
    %322 = arith.mulf %315, %321 : vector<8x32xf32>
    %c1_167 = arith.constant 1 : index
    %c0_168 = arith.constant 0 : index
    %c0_169 = arith.constant 0 : index
    %323 = vector.load %arg10[%c1_167, %c0_168, %c0_169] : memref<2x8x32xf32, #tpu.memory_space<vmem>>, vector<1x8x32xf32>
    %324 = vector.shape_cast %323 : vector<1x8x32xf32> to vector<8x32xf32>
    %325 = vector.shape_cast %320 : vector<8x32xf32> to vector<1x8x32xf32>
    tpu.vector_store %arg10[%c1_167, %c0_168, %c0_169], %325 {strides = array<i32>} : memref<2x8x32xf32, #tpu.memory_space<vmem>>, vector<1x8x32xf32>,
    %c1_170 = arith.constant 1 : index
    %c0_171 = arith.constant 0 : index
    %c0_172 = arith.constant 0 : index
    %326 = vector.load %arg9[%c1_170, %c0_171, %c0_172] : memref<2x8x32xf32, #tpu.memory_space<vmem>>, vector<1x8x32xf32>
    %327 = vector.shape_cast %326 : vector<1x8x32xf32> to vector<8x32xf32>
    %328 = vector.shape_cast %322 : vector<8x32xf32> to vector<1x8x32xf32>
    tpu.vector_store %arg9[%c1_170, %c0_171, %c0_172], %328 {strides = array<i32>} : memref<2x8x32xf32, #tpu.memory_space<vmem>>, vector<1x8x32xf32>,
    %c3_i32_173 = arith.constant 3 : i32
    %c8_i32_174 = arith.constant 8 : i32
    %329 = arith.muli %c3_i32_173, %c8_i32_174 : i32
    %330 = tpu.assume_multiple %329, 8 : i32
    %331 = arith.index_cast %330 : i32 to index
    %c0_175 = arith.constant 0 : index
    %332 = vector.load %arg7[%331, %c0_175] : memref<32x128xf32, #tpu.memory_space<vmem>>, vector<8x128xf32>
    %c1_176 = arith.constant 1 : index
    %c0_177 = arith.constant 0 : index
    %c0_178 = arith.constant 0 : index
    %333 = vector.load %arg9[%c1_176, %c0_177, %c0_178] : memref<2x8x32xf32, #tpu.memory_space<vmem>>, vector<1x8x32xf32>
    %334 = vector.shape_cast %333 : vector<1x8x32xf32> to vector<8x32xf32>
    %c1_179 = arith.constant 1 : index
    %c0_180 = arith.constant 0 : index
    %c0_181 = arith.constant 0 : index
    %335 = vector.load %arg4[%c1_179, %c0_180, %c0_181] : memref<2x32x128xf32, #tpu.memory_space<vmem>>, vector<1x32x128xf32>
    %336 = vector.shape_cast %335 : vector<1x32x128xf32> to vector<32x128xf32>
    %cst_182 = arith.constant dense<0.000000e+00> : vector<8x128xf32>
    %337 = tpu.matmul %334, %336, %cst_182 {dimension_numbers = #tpu.dot_dimension_numbers<[1], [0], [0], [1], [0, 0, 1, 1], [], []>} : vector<8x32xf32>, vector<32x128xf32>, vector<8x128xf32> -> vector<8x128xf32>
    %338 = arith.addf %332, %337 : vector<8x128xf32>
    %339 = vector.extract_strided_slice %338 {offsets = [0, 0], sizes = [8, 32], strides = [1, 1]} : vector<8x128xf32> to vector<8x32xf32>
    %340 = arith.negf %339 : vector<8x32xf32>
    %341 = math.exp %340 : vector<8x32xf32>
    %cst_183 = arith.constant 1.000000e+00 : f32
    %342 = vector.broadcast %cst_183 : f32 to vector<8x32xf32>
    %343 = arith.addf %342, %341 : vector<8x32xf32>
    %344 = arith.divf %342, %343 : vector<8x32xf32>
    %345 = vector.extract_strided_slice %338 {offsets = [0, 32], sizes = [8, 32], strides = [1, 1]} : vector<8x128xf32> to vector<8x32xf32>
    %346 = arith.negf %345 : vector<8x32xf32>
    %347 = math.exp %346 : vector<8x32xf32>
    %cst_184 = arith.constant 1.000000e+00 : f32
    %348 = vector.broadcast %cst_184 : f32 to vector<8x32xf32>
    %349 = arith.addf %348, %347 : vector<8x32xf32>
    %350 = arith.divf %348, %349 : vector<8x32xf32>
    %351 = vector.extract_strided_slice %338 {offsets = [0, 64], sizes = [8, 32], strides = [1, 1]} : vector<8x128xf32> to vector<8x32xf32>
    %352 = math.tanh %351 : vector<8x32xf32>
    %353 = vector.extract_strided_slice %338 {offsets = [0, 96], sizes = [8, 32], strides = [1, 1]} : vector<8x128xf32> to vector<8x32xf32>
    %354 = arith.negf %353 : vector<8x32xf32>
    %355 = math.exp %354 : vector<8x32xf32>
    %cst_185 = arith.constant 1.000000e+00 : f32
    %356 = vector.broadcast %cst_185 : f32 to vector<8x32xf32>
    %357 = arith.addf %356, %355 : vector<8x32xf32>
    %358 = arith.divf %356, %357 : vector<8x32xf32>
    %c1_186 = arith.constant 1 : index
    %c0_187 = arith.constant 0 : index
    %c0_188 = arith.constant 0 : index
    %359 = vector.load %arg10[%c1_186, %c0_187, %c0_188] : memref<2x8x32xf32, #tpu.memory_space<vmem>>, vector<1x8x32xf32>
    %360 = vector.shape_cast %359 : vector<1x8x32xf32> to vector<8x32xf32>
    %361 = arith.mulf %350, %360 : vector<8x32xf32>
    %362 = arith.mulf %344, %352 : vector<8x32xf32>
    %363 = arith.addf %361, %362 : vector<8x32xf32>
    %364 = math.tanh %363 : vector<8x32xf32>
    %365 = arith.mulf %358, %364 : vector<8x32xf32>
    %c1_189 = arith.constant 1 : index
    %c0_190 = arith.constant 0 : index
    %c0_191 = arith.constant 0 : index
    %366 = vector.load %arg10[%c1_189, %c0_190, %c0_191] : memref<2x8x32xf32, #tpu.memory_space<vmem>>, vector<1x8x32xf32>
    %367 = vector.shape_cast %366 : vector<1x8x32xf32> to vector<8x32xf32>
    %368 = vector.shape_cast %363 : vector<8x32xf32> to vector<1x8x32xf32>
    tpu.vector_store %arg10[%c1_189, %c0_190, %c0_191], %368 {strides = array<i32>} : memref<2x8x32xf32, #tpu.memory_space<vmem>>, vector<1x8x32xf32>,
    %c1_192 = arith.constant 1 : index
    %c0_193 = arith.constant 0 : index
    %c0_194 = arith.constant 0 : index
    %369 = vector.load %arg9[%c1_192, %c0_193, %c0_194] : memref<2x8x32xf32, #tpu.memory_space<vmem>>, vector<1x8x32xf32>
    %370 = vector.shape_cast %369 : vector<1x8x32xf32> to vector<8x32xf32>
    %371 = vector.shape_cast %365 : vector<8x32xf32> to vector<1x8x32xf32>
    tpu.vector_store %arg9[%c1_192, %c0_193, %c0_194], %371 {strides = array<i32>} : memref<2x8x32xf32, #tpu.memory_space<vmem>>, vector<1x8x32xf32>,
    %c4_i32_195 = arith.constant 4 : i32
    %c1_i32_196 = arith.constant 1 : i32
    %372 = arith.cmpi eq, %arg0, %c1_i32_196 : i32
    %373 = arith.extui %372 : i1 to i32
    %c0_i32_197 = arith.constant 0 : i32
    %374 = arith.cmpi ne, %373, %c0_i32_197 : i32
    scf.if %374 {
      %c1_198 = arith.constant 1 : index
      %c0_199 = arith.constant 0 : index
      %c0_200 = arith.constant 0 : index
      %375 = vector.load %arg9[%c1_198, %c0_199, %c0_200] : memref<2x8x32xf32, #tpu.memory_space<vmem>>, vector<1x8x32xf32>
      %376 = vector.shape_cast %375 : vector<1x8x32xf32> to vector<8x32xf32>
      %c0_201 = arith.constant 0 : index
      %c0_202 = arith.constant 0 : index
      %377 = vector.load %arg6[%c0_201, %c0_202] : memref<8x32xf32, #tpu.memory_space<vmem>>, vector<8x32xf32>
      tpu.vector_store %arg6[%c0_201, %c0_202], %376 {strides = array<i32>} : memref<8x32xf32, #tpu.memory_space<vmem>>, vector<8x32xf32>,
    } else {
    }
    return
  }
  func.func @transform_0(%arg0: i32) -> (i32, i32) {
    %c0_i32 = arith.constant 0 : i32
    %c0_i32_0 = arith.constant 0 : i32
    return %arg0, %c0_i32 : i32, i32
  }
  func.func @transform_1(%arg0: i32) -> (i32, i32) {
    %c0_i32 = arith.constant 0 : i32
    %c0_i32_0 = arith.constant 0 : i32
    %c0_i32_1 = arith.constant 0 : i32
    return %c0_i32, %c0_i32_0 : i32, i32
  }
  func.func @transform_2(%arg0: i32) -> (i32, i32, i32) {
    %c0_i32 = arith.constant 0 : i32
    %c0_i32_0 = arith.constant 0 : i32
    %c0_i32_1 = arith.constant 0 : i32
    %c0_i32_2 = arith.constant 0 : i32
    return %c0_i32, %c0_i32_0, %c0_i32_1 : i32, i32, i32
  }
  func.func @transform_3(%arg0: i32) -> (i32, i32, i32) {
    %c0_i32 = arith.constant 0 : i32
    %c0_i32_0 = arith.constant 0 : i32
    %c0_i32_1 = arith.constant 0 : i32
    %c0_i32_2 = arith.constant 0 : i32
    return %c0_i32, %c0_i32_0, %c0_i32_1 : i32, i32, i32
  }
  func.func @transform_4(%arg0: i32) -> (i32, i32, i32) {
    %c0_i32 = arith.constant 0 : i32
    %c0_i32_0 = arith.constant 0 : i32
    %c0_i32_1 = arith.constant 0 : i32
    %c0_i32_2 = arith.constant 0 : i32
    return %c0_i32, %c0_i32_0, %c0_i32_1 : i32, i32, i32
  }
  func.func @transform_5(%arg0: i32) -> (i32, i32) {
    %c0_i32 = arith.constant 0 : i32
    %c0_i32_0 = arith.constant 0 : i32
    %c0_i32_1 = arith.constant 0 : i32
    return %c0_i32, %c0_i32_0 : i32, i32
  }
}

module attributes {stable_mosaic.version = 11 : i64} {
  func.func @_fused_lstm_kernel(%arg0: i32, %arg1: memref<32x16xf32, #tpu.memory_space<vmem>>, %arg2: memref<16x128xf32, #tpu.memory_space<vmem>>, %arg3: memref<1x32x128xf32, #tpu.memory_space<vmem>>, %arg4: memref<2x32x128xf32, #tpu.memory_space<vmem>>, %arg5: memref<2x1x128xf32, #tpu.memory_space<vmem>>, %arg6: memref<8x32xf32, #tpu.memory_space<vmem>>, %arg7: memref<32x128xf32, #tpu.memory_space<vmem>>, %arg8: memref<32x32xf32, #tpu.memory_space<vmem>>, %arg9: memref<2x8x32xf32, #tpu.memory_space<vmem>>, %arg10: memref<2x8x32xf32, #tpu.memory_space<vmem>>) attributes {dimension_semantics = [#tpu.dimension_semantics<arbitrary>], iteration_bounds = array<i64: 2>, scalar_prefetch = 0 : i64, scratch_operands = 4 : i64, tpu.core_type = #tpu.core_type<tc>, window_params = [{transform_indices = @transform_0, window_bounds = array<i64: 32, 16>}, {pipeline_mode = #tpu.pipeline_mode<synchronous>, transform_indices = @transform_1, window_bounds = array<i64: 16, 128>}, {pipeline_mode = #tpu.pipeline_mode<synchronous>, transform_indices = @transform_2, window_bounds = array<i64: 1, 32, 128>}, {pipeline_mode = #tpu.pipeline_mode<synchronous>, transform_indices = @transform_3, window_bounds = array<i64: 2, 32, 128>}, {pipeline_mode = #tpu.pipeline_mode<synchronous>, transform_indices = @transform_4, window_bounds = array<i64: 2, 1, 128>}, {pipeline_mode = #tpu.pipeline_mode<synchronous>, transform_indices = @transform_5, window_bounds = array<i64: 8, 32>}]} {
    %c0_i32 = arith.constant 0 : i32
    %0 = arith.cmpi eq, %arg0, %c0_i32 : i32
    %1 = arith.extui %0 : i1 to i32
    %c0_i32_0 = arith.constant 0 : i32
    %2 = arith.cmpi ne, %1, %c0_i32_0 : i32
    scf.if %2 {
      %cst_198 = arith.constant 0.000000e+00 : f32
      %375 = vector.broadcast %cst_198 : f32 to vector<2x8x32xf32>
      %c0_199 = arith.constant 0 : index
      %c0_200 = arith.constant 0 : index
      %c0_201 = arith.constant 0 : index
      %376 = vector.load %arg9[%c0_199, %c0_200, %c0_201] : memref<2x8x32xf32, #tpu.memory_space<vmem>>, vector<2x8x32xf32>
      tpu.vector_store %arg9[%c0_199, %c0_200, %c0_201], %375 {strides = array<i32>} : memref<2x8x32xf32, #tpu.memory_space<vmem>>, vector<2x8x32xf32>,
      %cst_202 = arith.constant 0.000000e+00 : f32
      %377 = vector.broadcast %cst_202 : f32 to vector<2x8x32xf32>
      %c0_203 = arith.constant 0 : index
      %c0_204 = arith.constant 0 : index
      %c0_205 = arith.constant 0 : index
      %378 = vector.load %arg10[%c0_203, %c0_204, %c0_205] : memref<2x8x32xf32, #tpu.memory_space<vmem>>, vector<2x8x32xf32>
      tpu.vector_store %arg10[%c0_203, %c0_204, %c0_205], %377 {strides = array<i32>} : memref<2x8x32xf32, #tpu.memory_space<vmem>>, vector<2x8x32xf32>,
    } else {
    }
    %c0 = arith.constant 0 : index
    %c0_1 = arith.constant 0 : index
    %3 = vector.load %arg1[%c0, %c0_1] : memref<32x16xf32, #tpu.memory_space<vmem>>, vector<32x16xf32>
    %c0_2 = arith.constant 0 : index
    %c0_3 = arith.constant 0 : index
    %4 = vector.load %arg2[%c0_2, %c0_3] : memref<16x128xf32, #tpu.memory_space<vmem>>, vector<16x128xf32>
    %cst = arith.constant dense<0.000000e+00> : vector<32x128xf32>
    %5 = tpu.matmul %3, %4, %cst {dimension_numbers = #tpu.dot_dimension_numbers<[1], [0], [0], [1], [0, 0, 1, 1], [], []>} : vector<32x16xf32>, vector<16x128xf32>, vector<32x128xf32> -> vector<32x128xf32>
    %c0_4 = arith.constant 0 : index
    %c0_5 = arith.constant 0 : index
    %c0_6 = arith.constant 0 : index
    %6 = vector.load %arg5[%c0_4, %c0_5, %c0_6] : memref<2x1x128xf32, #tpu.memory_space<vmem>>, vector<1x1x128xf32>
    %7 = vector.shape_cast %6 : vector<1x1x128xf32> to vector<1x128xf32>
    %8 = vector.broadcast %7 : vector<1x128xf32> to vector<32x128xf32>
    %9 = arith.addf %5, %8 : vector<32x128xf32>
    %c0_7 = arith.constant 0 : index
    %c0_8 = arith.constant 0 : index
    %10 = vector.load %arg7[%c0_7, %c0_8] : memref<32x128xf32, #tpu.memory_space<vmem>>, vector<32x128xf32>
    tpu.vector_store %arg7[%c0_7, %c0_8], %9 {strides = array<i32>} : memref<32x128xf32, #tpu.memory_space<vmem>>, vector<32x128xf32>,
    %c0_i32_9 = arith.constant 0 : i32
    %c8_i32 = arith.constant 8 : i32
    %11 = arith.muli %c0_i32_9, %c8_i32 : i32
    %12 = tpu.assume_multiple %11, 8 : i32
    %13 = arith.index_cast %12 : i32 to index
    %c0_10 = arith.constant 0 : index
    %14 = vector.load %arg7[%13, %c0_10] : memref<32x128xf32, #tpu.memory_space<vmem>>, vector<8x128xf32>
    %c0_11 = arith.constant 0 : index
    %c0_12 = arith.constant 0 : index
    %c0_13 = arith.constant 0 : index
    %15 = vector.load %arg9[%c0_11, %c0_12, %c0_13] : memref<2x8x32xf32, #tpu.memory_space<vmem>>, vector<1x8x32xf32>
    %16 = vector.shape_cast %15 : vector<1x8x32xf32> to vector<8x32xf32>
    %c0_14 = arith.constant 0 : index
    %c0_15 = arith.constant 0 : index
    %c0_16 = arith.constant 0 : index
    %17 = vector.load %arg4[%c0_14, %c0_15, %c0_16] : memref<2x32x128xf32, #tpu.memory_space<vmem>>, vector<1x32x128xf32>
    %18 = vector.shape_cast %17 : vector<1x32x128xf32> to vector<32x128xf32>
    %cst_17 = arith.constant dense<0.000000e+00> : vector<8x128xf32>
    %19 = tpu.matmul %16, %18, %cst_17 {dimension_numbers = #tpu.dot_dimension_numbers<[1], [0], [0], [1], [0, 0, 1, 1], [], []>} : vector<8x32xf32>, vector<32x128xf32>, vector<8x128xf32> -> vector<8x128xf32>
    %20 = arith.addf %14, %19 : vector<8x128xf32>
    %21 = vector.extract_strided_slice %20 {offsets = [0, 0], sizes = [8, 32], strides = [1, 1]} : vector<8x128xf32> to vector<8x32xf32>
    %22 = arith.negf %21 : vector<8x32xf32>
    %23 = math.exp %22 : vector<8x32xf32>
    %cst_18 = arith.constant 1.000000e+00 : f32
    %24 = vector.broadcast %cst_18 : f32 to vector<8x32xf32>
    %25 = arith.addf %24, %23 : vector<8x32xf32>
    %26 = arith.divf %24, %25 : vector<8x32xf32>
    %27 = vector.extract_strided_slice %20 {offsets = [0, 32], sizes = [8, 32], strides = [1, 1]} : vector<8x128xf32> to vector<8x32xf32>
    %28 = arith.negf %27 : vector<8x32xf32>
    %29 = math.exp %28 : vector<8x32xf32>
    %cst_19 = arith.constant 1.000000e+00 : f32
    %30 = vector.broadcast %cst_19 : f32 to vector<8x32xf32>
    %31 = arith.addf %30, %29 : vector<8x32xf32>
    %32 = arith.divf %30, %31 : vector<8x32xf32>
    %33 = vector.extract_strided_slice %20 {offsets = [0, 64], sizes = [8, 32], strides = [1, 1]} : vector<8x128xf32> to vector<8x32xf32>
    %34 = math.tanh %33 : vector<8x32xf32>
    %35 = vector.extract_strided_slice %20 {offsets = [0, 96], sizes = [8, 32], strides = [1, 1]} : vector<8x128xf32> to vector<8x32xf32>
    %36 = arith.negf %35 : vector<8x32xf32>
    %37 = math.exp %36 : vector<8x32xf32>
    %cst_20 = arith.constant 1.000000e+00 : f32
    %38 = vector.broadcast %cst_20 : f32 to vector<8x32xf32>
    %39 = arith.addf %38, %37 : vector<8x32xf32>
    %40 = arith.divf %38, %39 : vector<8x32xf32>
    %c0_21 = arith.constant 0 : index
    %c0_22 = arith.constant 0 : index
    %c0_23 = arith.constant 0 : index
    %41 = vector.load %arg10[%c0_21, %c0_22, %c0_23] : memref<2x8x32xf32, #tpu.memory_space<vmem>>, vector<1x8x32xf32>
    %42 = vector.shape_cast %41 : vector<1x8x32xf32> to vector<8x32xf32>
    %43 = arith.mulf %32, %42 : vector<8x32xf32>
    %44 = arith.mulf %26, %34 : vector<8x32xf32>
    %45 = arith.addf %43, %44 : vector<8x32xf32>
    %46 = math.tanh %45 : vector<8x32xf32>
    %47 = arith.mulf %40, %46 : vector<8x32xf32>
    %c0_24 = arith.constant 0 : index
    %c0_25 = arith.constant 0 : index
    %c0_26 = arith.constant 0 : index
    %48 = vector.load %arg10[%c0_24, %c0_25, %c0_26] : memref<2x8x32xf32, #tpu.memory_space<vmem>>, vector<1x8x32xf32>
    %49 = vector.shape_cast %48 : vector<1x8x32xf32> to vector<8x32xf32>
    %50 = vector.shape_cast %45 : vector<8x32xf32> to vector<1x8x32xf32>
    tpu.vector_store %arg10[%c0_24, %c0_25, %c0_26], %50 {strides = array<i32>} : memref<2x8x32xf32, #tpu.memory_space<vmem>>, vector<1x8x32xf32>,
    %c0_27 = arith.constant 0 : index
    %c0_28 = arith.constant 0 : index
    %c0_29 = arith.constant 0 : index
    %51 = vector.load %arg9[%c0_27, %c0_28, %c0_29] : memref<2x8x32xf32, #tpu.memory_space<vmem>>, vector<1x8x32xf32>
    %52 = vector.shape_cast %51 : vector<1x8x32xf32> to vector<8x32xf32>
    %53 = vector.shape_cast %47 : vector<8x32xf32> to vector<1x8x32xf32>
    tpu.vector_store %arg9[%c0_27, %c0_28, %c0_29], %53 {strides = array<i32>} : memref<2x8x32xf32, #tpu.memory_space<vmem>>, vector<1x8x32xf32>,
    %54 = arith.index_cast %12 : i32 to index
    %c0_30 = arith.constant 0 : index
    %55 = vector.load %arg8[%54, %c0_30] : memref<32x32xf32, #tpu.memory_space<vmem>>, vector<8x32xf32>
    tpu.vector_store %arg8[%54, %c0_30], %47 {strides = array<i32>} : memref<32x32xf32, #tpu.memory_space<vmem>>, vector<8x32xf32>,
    %c1_i32 = arith.constant 1 : i32
    %c8_i32_31 = arith.constant 8 : i32
    %56 = arith.muli %c1_i32, %c8_i32_31 : i32
    %57 = tpu.assume_multiple %56, 8 : i32
    %58 = arith.index_cast %57 : i32 to index
    %c0_32 = arith.constant 0 : index
    %59 = vector.load %arg7[%58, %c0_32] : memref<32x128xf32, #tpu.memory_space<vmem>>, vector<8x128xf32>
    %c0_33 = arith.constant 0 : index
    %c0_34 = arith.constant 0 : index
    %c0_35 = arith.constant 0 : index
    %60 = vector.load %arg9[%c0_33, %c0_34, %c0_35] : memref<2x8x32xf32, #tpu.memory_space<vmem>>, vector<1x8x32xf32>
    %61 = vector.shape_cast %60 : vector<1x8x32xf32> to vector<8x32xf32>
    %c0_36 = arith.constant 0 : index
    %c0_37 = arith.constant 0 : index
    %c0_38 = arith.constant 0 : index
    %62 = vector.load %arg4[%c0_36, %c0_37, %c0_38] : memref<2x32x128xf32, #tpu.memory_space<vmem>>, vector<1x32x128xf32>
    %63 = vector.shape_cast %62 : vector<1x32x128xf32> to vector<32x128xf32>
    %cst_39 = arith.constant dense<0.000000e+00> : vector<8x128xf32>
    %64 = tpu.matmul %61, %63, %cst_39 {dimension_numbers = #tpu.dot_dimension_numbers<[1], [0], [0], [1], [0, 0, 1, 1], [], []>} : vector<8x32xf32>, vector<32x128xf32>, vector<8x128xf32> -> vector<8x128xf32>
    %65 = arith.addf %59, %64 : vector<8x128xf32>
    %66 = vector.extract_strided_slice %65 {offsets = [0, 0], sizes = [8, 32], strides = [1, 1]} : vector<8x128xf32> to vector<8x32xf32>
    %67 = arith.negf %66 : vector<8x32xf32>
    %68 = math.exp %67 : vector<8x32xf32>
    %cst_40 = arith.constant 1.000000e+00 : f32
    %69 = vector.broadcast %cst_40 : f32 to vector<8x32xf32>
    %70 = arith.addf %69, %68 : vector<8x32xf32>
    %71 = arith.divf %69, %70 : vector<8x32xf32>
    %72 = vector.extract_strided_slice %65 {offsets = [0, 32], sizes = [8, 32], strides = [1, 1]} : vector<8x128xf32> to vector<8x32xf32>
    %73 = arith.negf %72 : vector<8x32xf32>
    %74 = math.exp %73 : vector<8x32xf32>
    %cst_41 = arith.constant 1.000000e+00 : f32
    %75 = vector.broadcast %cst_41 : f32 to vector<8x32xf32>
    %76 = arith.addf %75, %74 : vector<8x32xf32>
    %77 = arith.divf %75, %76 : vector<8x32xf32>
    %78 = vector.extract_strided_slice %65 {offsets = [0, 64], sizes = [8, 32], strides = [1, 1]} : vector<8x128xf32> to vector<8x32xf32>
    %79 = math.tanh %78 : vector<8x32xf32>
    %80 = vector.extract_strided_slice %65 {offsets = [0, 96], sizes = [8, 32], strides = [1, 1]} : vector<8x128xf32> to vector<8x32xf32>
    %81 = arith.negf %80 : vector<8x32xf32>
    %82 = math.exp %81 : vector<8x32xf32>
    %cst_42 = arith.constant 1.000000e+00 : f32
    %83 = vector.broadcast %cst_42 : f32 to vector<8x32xf32>
    %84 = arith.addf %83, %82 : vector<8x32xf32>
    %85 = arith.divf %83, %84 : vector<8x32xf32>
    %c0_43 = arith.constant 0 : index
    %c0_44 = arith.constant 0 : index
    %c0_45 = arith.constant 0 : index
    %86 = vector.load %arg10[%c0_43, %c0_44, %c0_45] : memref<2x8x32xf32, #tpu.memory_space<vmem>>, vector<1x8x32xf32>
    %87 = vector.shape_cast %86 : vector<1x8x32xf32> to vector<8x32xf32>
    %88 = arith.mulf %77, %87 : vector<8x32xf32>
    %89 = arith.mulf %71, %79 : vector<8x32xf32>
    %90 = arith.addf %88, %89 : vector<8x32xf32>
    %91 = math.tanh %90 : vector<8x32xf32>
    %92 = arith.mulf %85, %91 : vector<8x32xf32>
    %c0_46 = arith.constant 0 : index
    %c0_47 = arith.constant 0 : index
    %c0_48 = arith.constant 0 : index
    %93 = vector.load %arg10[%c0_46, %c0_47, %c0_48] : memref<2x8x32xf32, #tpu.memory_space<vmem>>, vector<1x8x32xf32>
    %94 = vector.shape_cast %93 : vector<1x8x32xf32> to vector<8x32xf32>
    %95 = vector.shape_cast %90 : vector<8x32xf32> to vector<1x8x32xf32>
    tpu.vector_store %arg10[%c0_46, %c0_47, %c0_48], %95 {strides = array<i32>} : memref<2x8x32xf32, #tpu.memory_space<vmem>>, vector<1x8x32xf32>,
    %c0_49 = arith.constant 0 : index
    %c0_50 = arith.constant 0 : index
    %c0_51 = arith.constant 0 : index
    %96 = vector.load %arg9[%c0_49, %c0_50, %c0_51] : memref<2x8x32xf32, #tpu.memory_space<vmem>>, vector<1x8x32xf32>
    %97 = vector.shape_cast %96 : vector<1x8x32xf32> to vector<8x32xf32>
    %98 = vector.shape_cast %92 : vector<8x32xf32> to vector<1x8x32xf32>
    tpu.vector_store %arg9[%c0_49, %c0_50, %c0_51], %98 {strides = array<i32>} : memref<2x8x32xf32, #tpu.memory_space<vmem>>, vector<1x8x32xf32>,
    %99 = arith.index_cast %57 : i32 to index
    %c0_52 = arith.constant 0 : index
    %100 = vector.load %arg8[%99, %c0_52] : memref<32x32xf32, #tpu.memory_space<vmem>>, vector<8x32xf32>
    tpu.vector_store %arg8[%99, %c0_52], %92 {strides = array<i32>} : memref<32x32xf32, #tpu.memory_space<vmem>>, vector<8x32xf32>,
    %c2_i32 = arith.constant 2 : i32
    %c8_i32_53 = arith.constant 8 : i32
    %101 = arith.muli %c2_i32, %c8_i32_53 : i32
    %102 = tpu.assume_multiple %101, 8 : i32
    %103 = arith.index_cast %102 : i32 to index
    %c0_54 = arith.constant 0 : index
    %104 = vector.load %arg7[%103, %c0_54] : memref<32x128xf32, #tpu.memory_space<vmem>>, vector<8x128xf32>
    %c0_55 = arith.constant 0 : index
    %c0_56 = arith.constant 0 : index
    %c0_57 = arith.constant 0 : index
    %105 = vector.load %arg9[%c0_55, %c0_56, %c0_57] : memref<2x8x32xf32, #tpu.memory_space<vmem>>, vector<1x8x32xf32>
    %106 = vector.shape_cast %105 : vector<1x8x32xf32> to vector<8x32xf32>
    %c0_58 = arith.constant 0 : index
    %c0_59 = arith.constant 0 : index
    %c0_60 = arith.constant 0 : index
    %107 = vector.load %arg4[%c0_58, %c0_59, %c0_60] : memref<2x32x128xf32, #tpu.memory_space<vmem>>, vector<1x32x128xf32>
    %108 = vector.shape_cast %107 : vector<1x32x128xf32> to vector<32x128xf32>
    %cst_61 = arith.constant dense<0.000000e+00> : vector<8x128xf32>
    %109 = tpu.matmul %106, %108, %cst_61 {dimension_numbers = #tpu.dot_dimension_numbers<[1], [0], [0], [1], [0, 0, 1, 1], [], []>} : vector<8x32xf32>, vector<32x128xf32>, vector<8x128xf32> -> vector<8x128xf32>
    %110 = arith.addf %104, %109 : vector<8x128xf32>
    %111 = vector.extract_strided_slice %110 {offsets = [0, 0], sizes = [8, 32], strides = [1, 1]} : vector<8x128xf32> to vector<8x32xf32>
    %112 = arith.negf %111 : vector<8x32xf32>
    %113 = math.exp %112 : vector<8x32xf32>
    %cst_62 = arith.constant 1.000000e+00 : f32
    %114 = vector.broadcast %cst_62 : f32 to vector<8x32xf32>
    %115 = arith.addf %114, %113 : vector<8x32xf32>
    %116 = arith.divf %114, %115 : vector<8x32xf32>
    %117 = vector.extract_strided_slice %110 {offsets = [0, 32], sizes = [8, 32], strides = [1, 1]} : vector<8x128xf32> to vector<8x32xf32>
    %118 = arith.negf %117 : vector<8x32xf32>
    %119 = math.exp %118 : vector<8x32xf32>
    %cst_63 = arith.constant 1.000000e+00 : f32
    %120 = vector.broadcast %cst_63 : f32 to vector<8x32xf32>
    %121 = arith.addf %120, %119 : vector<8x32xf32>
    %122 = arith.divf %120, %121 : vector<8x32xf32>
    %123 = vector.extract_strided_slice %110 {offsets = [0, 64], sizes = [8, 32], strides = [1, 1]} : vector<8x128xf32> to vector<8x32xf32>
    %124 = math.tanh %123 : vector<8x32xf32>
    %125 = vector.extract_strided_slice %110 {offsets = [0, 96], sizes = [8, 32], strides = [1, 1]} : vector<8x128xf32> to vector<8x32xf32>
    %126 = arith.negf %125 : vector<8x32xf32>
    %127 = math.exp %126 : vector<8x32xf32>
    %cst_64 = arith.constant 1.000000e+00 : f32
    %128 = vector.broadcast %cst_64 : f32 to vector<8x32xf32>
    %129 = arith.addf %128, %127 : vector<8x32xf32>
    %130 = arith.divf %128, %129 : vector<8x32xf32>
    %c0_65 = arith.constant 0 : index
    %c0_66 = arith.constant 0 : index
    %c0_67 = arith.constant 0 : index
    %131 = vector.load %arg10[%c0_65, %c0_66, %c0_67] : memref<2x8x32xf32, #tpu.memory_space<vmem>>, vector<1x8x32xf32>
    %132 = vector.shape_cast %131 : vector<1x8x32xf32> to vector<8x32xf32>
    %133 = arith.mulf %122, %132 : vector<8x32xf32>
    %134 = arith.mulf %116, %124 : vector<8x32xf32>
    %135 = arith.addf %133, %134 : vector<8x32xf32>
    %136 = math.tanh %135 : vector<8x32xf32>
    %137 = arith.mulf %130, %136 : vector<8x32xf32>
    %c0_68 = arith.constant 0 : index
    %c0_69 = arith.constant 0 : index
    %c0_70 = arith.constant 0 : index
    %138 = vector.load %arg10[%c0_68, %c0_69, %c0_70] : memref<2x8x32xf32, #tpu.memory_space<vmem>>, vector<1x8x32xf32>
    %139 = vector.shape_cast %138 : vector<1x8x32xf32> to vector<8x32xf32>
    %140 = vector.shape_cast %135 : vector<8x32xf32> to vector<1x8x32xf32>
    tpu.vector_store %arg10[%c0_68, %c0_69, %c0_70], %140 {strides = array<i32>} : memref<2x8x32xf32, #tpu.memory_space<vmem>>, vector<1x8x32xf32>,
    %c0_71 = arith.constant 0 : index
    %c0_72 = arith.constant 0 : index
    %c0_73 = arith.constant 0 : index
    %141 = vector.load %arg9[%c0_71, %c0_72, %c0_73] : memref<2x8x32xf32, #tpu.memory_space<vmem>>, vector<1x8x32xf32>
    %142 = vector.shape_cast %141 : vector<1x8x32xf32> to vector<8x32xf32>
    %143 = vector.shape_cast %137 : vector<8x32xf32> to vector<1x8x32xf32>
    tpu.vector_store %arg9[%c0_71, %c0_72, %c0_73], %143 {strides = array<i32>} : memref<2x8x32xf32, #tpu.memory_space<vmem>>, vector<1x8x32xf32>,
    %144 = arith.index_cast %102 : i32 to index
    %c0_74 = arith.constant 0 : index
    %145 = vector.load %arg8[%144, %c0_74] : memref<32x32xf32, #tpu.memory_space<vmem>>, vector<8x32xf32>
    tpu.vector_store %arg8[%144, %c0_74], %137 {strides = array<i32>} : memref<32x32xf32, #tpu.memory_space<vmem>>, vector<8x32xf32>,
    %c3_i32 = arith.constant 3 : i32
    %c8_i32_75 = arith.constant 8 : i32
    %146 = arith.muli %c3_i32, %c8_i32_75 : i32
    %147 = tpu.assume_multiple %146, 8 : i32
    %148 = arith.index_cast %147 : i32 to index
    %c0_76 = arith.constant 0 : index
    %149 = vector.load %arg7[%148, %c0_76] : memref<32x128xf32, #tpu.memory_space<vmem>>, vector<8x128xf32>
    %c0_77 = arith.constant 0 : index
    %c0_78 = arith.constant 0 : index
    %c0_79 = arith.constant 0 : index
    %150 = vector.load %arg9[%c0_77, %c0_78, %c0_79] : memref<2x8x32xf32, #tpu.memory_space<vmem>>, vector<1x8x32xf32>
    %151 = vector.shape_cast %150 : vector<1x8x32xf32> to vector<8x32xf32>
    %c0_80 = arith.constant 0 : index
    %c0_81 = arith.constant 0 : index
    %c0_82 = arith.constant 0 : index
    %152 = vector.load %arg4[%c0_80, %c0_81, %c0_82] : memref<2x32x128xf32, #tpu.memory_space<vmem>>, vector<1x32x128xf32>
    %153 = vector.shape_cast %152 : vector<1x32x128xf32> to vector<32x128xf32>
    %cst_83 = arith.constant dense<0.000000e+00> : vector<8x128xf32>
    %154 = tpu.matmul %151, %153, %cst_83 {dimension_numbers = #tpu.dot_dimension_numbers<[1], [0], [0], [1], [0, 0, 1, 1], [], []>} : vector<8x32xf32>, vector<32x128xf32>, vector<8x128xf32> -> vector<8x128xf32>
    %155 = arith.addf %149, %154 : vector<8x128xf32>
    %156 = vector.extract_strided_slice %155 {offsets = [0, 0], sizes = [8, 32], strides = [1, 1]} : vector<8x128xf32> to vector<8x32xf32>
    %157 = arith.negf %156 : vector<8x32xf32>
    %158 = math.exp %157 : vector<8x32xf32>
    %cst_84 = arith.constant 1.000000e+00 : f32
    %159 = vector.broadcast %cst_84 : f32 to vector<8x32xf32>
    %160 = arith.addf %159, %158 : vector<8x32xf32>
    %161 = arith.divf %159, %160 : vector<8x32xf32>
    %162 = vector.extract_strided_slice %155 {offsets = [0, 32], sizes = [8, 32], strides = [1, 1]} : vector<8x128xf32> to vector<8x32xf32>
    %163 = arith.negf %162 : vector<8x32xf32>
    %164 = math.exp %163 : vector<8x32xf32>
    %cst_85 = arith.constant 1.000000e+00 : f32
    %165 = vector.broadcast %cst_85 : f32 to vector<8x32xf32>
    %166 = arith.addf %165, %164 : vector<8x32xf32>
    %167 = arith.divf %165, %166 : vector<8x32xf32>
    %168 = vector.extract_strided_slice %155 {offsets = [0, 64], sizes = [8, 32], strides = [1, 1]} : vector<8x128xf32> to vector<8x32xf32>
    %169 = math.tanh %168 : vector<8x32xf32>
    %170 = vector.extract_strided_slice %155 {offsets = [0, 96], sizes = [8, 32], strides = [1, 1]} : vector<8x128xf32> to vector<8x32xf32>
    %171 = arith.negf %170 : vector<8x32xf32>
    %172 = math.exp %171 : vector<8x32xf32>
    %cst_86 = arith.constant 1.000000e+00 : f32
    %173 = vector.broadcast %cst_86 : f32 to vector<8x32xf32>
    %174 = arith.addf %173, %172 : vector<8x32xf32>
    %175 = arith.divf %173, %174 : vector<8x32xf32>
    %c0_87 = arith.constant 0 : index
    %c0_88 = arith.constant 0 : index
    %c0_89 = arith.constant 0 : index
    %176 = vector.load %arg10[%c0_87, %c0_88, %c0_89] : memref<2x8x32xf32, #tpu.memory_space<vmem>>, vector<1x8x32xf32>
    %177 = vector.shape_cast %176 : vector<1x8x32xf32> to vector<8x32xf32>
    %178 = arith.mulf %167, %177 : vector<8x32xf32>
    %179 = arith.mulf %161, %169 : vector<8x32xf32>
    %180 = arith.addf %178, %179 : vector<8x32xf32>
    %181 = math.tanh %180 : vector<8x32xf32>
    %182 = arith.mulf %175, %181 : vector<8x32xf32>
    %c0_90 = arith.constant 0 : index
    %c0_91 = arith.constant 0 : index
    %c0_92 = arith.constant 0 : index
    %183 = vector.load %arg10[%c0_90, %c0_91, %c0_92] : memref<2x8x32xf32, #tpu.memory_space<vmem>>, vector<1x8x32xf32>
    %184 = vector.shape_cast %183 : vector<1x8x32xf32> to vector<8x32xf32>
    %185 = vector.shape_cast %180 : vector<8x32xf32> to vector<1x8x32xf32>
    tpu.vector_store %arg10[%c0_90, %c0_91, %c0_92], %185 {strides = array<i32>} : memref<2x8x32xf32, #tpu.memory_space<vmem>>, vector<1x8x32xf32>,
    %c0_93 = arith.constant 0 : index
    %c0_94 = arith.constant 0 : index
    %c0_95 = arith.constant 0 : index
    %186 = vector.load %arg9[%c0_93, %c0_94, %c0_95] : memref<2x8x32xf32, #tpu.memory_space<vmem>>, vector<1x8x32xf32>
    %187 = vector.shape_cast %186 : vector<1x8x32xf32> to vector<8x32xf32>
    %188 = vector.shape_cast %182 : vector<8x32xf32> to vector<1x8x32xf32>
    tpu.vector_store %arg9[%c0_93, %c0_94, %c0_95], %188 {strides = array<i32>} : memref<2x8x32xf32, #tpu.memory_space<vmem>>, vector<1x8x32xf32>,
    %189 = arith.index_cast %147 : i32 to index
    %c0_96 = arith.constant 0 : index
    %190 = vector.load %arg8[%189, %c0_96] : memref<32x32xf32, #tpu.memory_space<vmem>>, vector<8x32xf32>
    tpu.vector_store %arg8[%189, %c0_96], %182 {strides = array<i32>} : memref<32x32xf32, #tpu.memory_space<vmem>>, vector<8x32xf32>,
    %c4_i32 = arith.constant 4 : i32
    %c0_97 = arith.constant 0 : index
    %c0_98 = arith.constant 0 : index
    %191 = vector.load %arg8[%c0_97, %c0_98] : memref<32x32xf32, #tpu.memory_space<vmem>>, vector<32x32xf32>
    %c0_99 = arith.constant 0 : index
    %c0_100 = arith.constant 0 : index
    %c0_101 = arith.constant 0 : index
    %192 = vector.load %arg3[%c0_99, %c0_100, %c0_101] : memref<1x32x128xf32, #tpu.memory_space<vmem>>, vector<1x32x128xf32>
    %193 = vector.shape_cast %192 : vector<1x32x128xf32> to vector<32x128xf32>
    %cst_102 = arith.constant dense<0.000000e+00> : vector<32x128xf32>
    %194 = tpu.matmul %191, %193, %cst_102 {dimension_numbers = #tpu.dot_dimension_numbers<[1], [0], [0], [1], [0, 0, 1, 1], [], []>} : vector<32x32xf32>, vector<32x128xf32>, vector<32x128xf32> -> vector<32x128xf32>
    %c1 = arith.constant 1 : index
    %c0_103 = arith.constant 0 : index
    %c0_104 = arith.constant 0 : index
    %195 = vector.load %arg5[%c1, %c0_103, %c0_104] : memref<2x1x128xf32, #tpu.memory_space<vmem>>, vector<1x1x128xf32>
    %196 = vector.shape_cast %195 : vector<1x1x128xf32> to vector<1x128xf32>
    %197 = vector.broadcast %196 : vector<1x128xf32> to vector<32x128xf32>
    %198 = arith.addf %194, %197 : vector<32x128xf32>
    %c0_105 = arith.constant 0 : index
    %c0_106 = arith.constant 0 : index
    %199 = vector.load %arg7[%c0_105, %c0_106] : memref<32x128xf32, #tpu.memory_space<vmem>>, vector<32x128xf32>
    tpu.vector_store %arg7[%c0_105, %c0_106], %198 {strides = array<i32>} : memref<32x128xf32, #tpu.memory_space<vmem>>, vector<32x128xf32>,
    %c0_i32_107 = arith.constant 0 : i32
    %c8_i32_108 = arith.constant 8 : i32
    %200 = arith.muli %c0_i32_107, %c8_i32_108 : i32
    %201 = tpu.assume_multiple %200, 8 : i32
    %202 = arith.index_cast %201 : i32 to index
    %c0_109 = arith.constant 0 : index
    %203 = vector.load %arg7[%202, %c0_109] : memref<32x128xf32, #tpu.memory_space<vmem>>, vector<8x128xf32>
    %c1_110 = arith.constant 1 : index
    %c0_111 = arith.constant 0 : index
    %c0_112 = arith.constant 0 : index
    %204 = vector.load %arg9[%c1_110, %c0_111, %c0_112] : memref<2x8x32xf32, #tpu.memory_space<vmem>>, vector<1x8x32xf32>
    %205 = vector.shape_cast %204 : vector<1x8x32xf32> to vector<8x32xf32>
    %c1_113 = arith.constant 1 : index
    %c0_114 = arith.constant 0 : index
    %c0_115 = arith.constant 0 : index
    %206 = vector.load %arg4[%c1_113, %c0_114, %c0_115] : memref<2x32x128xf32, #tpu.memory_space<vmem>>, vector<1x32x128xf32>
    %207 = vector.shape_cast %206 : vector<1x32x128xf32> to vector<32x128xf32>
    %cst_116 = arith.constant dense<0.000000e+00> : vector<8x128xf32>
    %208 = tpu.matmul %205, %207, %cst_116 {dimension_numbers = #tpu.dot_dimension_numbers<[1], [0], [0], [1], [0, 0, 1, 1], [], []>} : vector<8x32xf32>, vector<32x128xf32>, vector<8x128xf32> -> vector<8x128xf32>
    %209 = arith.addf %203, %208 : vector<8x128xf32>
    %210 = vector.extract_strided_slice %209 {offsets = [0, 0], sizes = [8, 32], strides = [1, 1]} : vector<8x128xf32> to vector<8x32xf32>
    %211 = arith.negf %210 : vector<8x32xf32>
    %212 = math.exp %211 : vector<8x32xf32>
    %cst_117 = arith.constant 1.000000e+00 : f32
    %213 = vector.broadcast %cst_117 : f32 to vector<8x32xf32>
    %214 = arith.addf %213, %212 : vector<8x32xf32>
    %215 = arith.divf %213, %214 : vector<8x32xf32>
    %216 = vector.extract_strided_slice %209 {offsets = [0, 32], sizes = [8, 32], strides = [1, 1]} : vector<8x128xf32> to vector<8x32xf32>
    %217 = arith.negf %216 : vector<8x32xf32>
    %218 = math.exp %217 : vector<8x32xf32>
    %cst_118 = arith.constant 1.000000e+00 : f32
    %219 = vector.broadcast %cst_118 : f32 to vector<8x32xf32>
    %220 = arith.addf %219, %218 : vector<8x32xf32>
    %221 = arith.divf %219, %220 : vector<8x32xf32>
    %222 = vector.extract_strided_slice %209 {offsets = [0, 64], sizes = [8, 32], strides = [1, 1]} : vector<8x128xf32> to vector<8x32xf32>
    %223 = math.tanh %222 : vector<8x32xf32>
    %224 = vector.extract_strided_slice %209 {offsets = [0, 96], sizes = [8, 32], strides = [1, 1]} : vector<8x128xf32> to vector<8x32xf32>
    %225 = arith.negf %224 : vector<8x32xf32>
    %226 = math.exp %225 : vector<8x32xf32>
    %cst_119 = arith.constant 1.000000e+00 : f32
    %227 = vector.broadcast %cst_119 : f32 to vector<8x32xf32>
    %228 = arith.addf %227, %226 : vector<8x32xf32>
    %229 = arith.divf %227, %228 : vector<8x32xf32>
    %c1_120 = arith.constant 1 : index
    %c0_121 = arith.constant 0 : index
    %c0_122 = arith.constant 0 : index
    %230 = vector.load %arg10[%c1_120, %c0_121, %c0_122] : memref<2x8x32xf32, #tpu.memory_space<vmem>>, vector<1x8x32xf32>
    %231 = vector.shape_cast %230 : vector<1x8x32xf32> to vector<8x32xf32>
    %232 = arith.mulf %221, %231 : vector<8x32xf32>
    %233 = arith.mulf %215, %223 : vector<8x32xf32>
    %234 = arith.addf %232, %233 : vector<8x32xf32>
    %235 = math.tanh %234 : vector<8x32xf32>
    %236 = arith.mulf %229, %235 : vector<8x32xf32>
    %c1_123 = arith.constant 1 : index
    %c0_124 = arith.constant 0 : index
    %c0_125 = arith.constant 0 : index
    %237 = vector.load %arg10[%c1_123, %c0_124, %c0_125] : memref<2x8x32xf32, #tpu.memory_space<vmem>>, vector<1x8x32xf32>
    %238 = vector.shape_cast %237 : vector<1x8x32xf32> to vector<8x32xf32>
    %239 = vector.shape_cast %234 : vector<8x32xf32> to vector<1x8x32xf32>
    tpu.vector_store %arg10[%c1_123, %c0_124, %c0_125], %239 {strides = array<i32>} : memref<2x8x32xf32, #tpu.memory_space<vmem>>, vector<1x8x32xf32>,
    %c1_126 = arith.constant 1 : index
    %c0_127 = arith.constant 0 : index
    %c0_128 = arith.constant 0 : index
    %240 = vector.load %arg9[%c1_126, %c0_127, %c0_128] : memref<2x8x32xf32, #tpu.memory_space<vmem>>, vector<1x8x32xf32>
    %241 = vector.shape_cast %240 : vector<1x8x32xf32> to vector<8x32xf32>
    %242 = vector.shape_cast %236 : vector<8x32xf32> to vector<1x8x32xf32>
    tpu.vector_store %arg9[%c1_126, %c0_127, %c0_128], %242 {strides = array<i32>} : memref<2x8x32xf32, #tpu.memory_space<vmem>>, vector<1x8x32xf32>,
    %c1_i32_129 = arith.constant 1 : i32
    %c8_i32_130 = arith.constant 8 : i32
    %243 = arith.muli %c1_i32_129, %c8_i32_130 : i32
    %244 = tpu.assume_multiple %243, 8 : i32
    %245 = arith.index_cast %244 : i32 to index
    %c0_131 = arith.constant 0 : index
    %246 = vector.load %arg7[%245, %c0_131] : memref<32x128xf32, #tpu.memory_space<vmem>>, vector<8x128xf32>
    %c1_132 = arith.constant 1 : index
    %c0_133 = arith.constant 0 : index
    %c0_134 = arith.constant 0 : index
    %247 = vector.load %arg9[%c1_132, %c0_133, %c0_134] : memref<2x8x32xf32, #tpu.memory_space<vmem>>, vector<1x8x32xf32>
    %248 = vector.shape_cast %247 : vector<1x8x32xf32> to vector<8x32xf32>
    %c1_135 = arith.constant 1 : index
    %c0_136 = arith.constant 0 : index
    %c0_137 = arith.constant 0 : index
    %249 = vector.load %arg4[%c1_135, %c0_136, %c0_137] : memref<2x32x128xf32, #tpu.memory_space<vmem>>, vector<1x32x128xf32>
    %250 = vector.shape_cast %249 : vector<1x32x128xf32> to vector<32x128xf32>
    %cst_138 = arith.constant dense<0.000000e+00> : vector<8x128xf32>
    %251 = tpu.matmul %248, %250, %cst_138 {dimension_numbers = #tpu.dot_dimension_numbers<[1], [0], [0], [1], [0, 0, 1, 1], [], []>} : vector<8x32xf32>, vector<32x128xf32>, vector<8x128xf32> -> vector<8x128xf32>
    %252 = arith.addf %246, %251 : vector<8x128xf32>
    %253 = vector.extract_strided_slice %252 {offsets = [0, 0], sizes = [8, 32], strides = [1, 1]} : vector<8x128xf32> to vector<8x32xf32>
    %254 = arith.negf %253 : vector<8x32xf32>
    %255 = math.exp %254 : vector<8x32xf32>
    %cst_139 = arith.constant 1.000000e+00 : f32
    %256 = vector.broadcast %cst_139 : f32 to vector<8x32xf32>
    %257 = arith.addf %256, %255 : vector<8x32xf32>
    %258 = arith.divf %256, %257 : vector<8x32xf32>
    %259 = vector.extract_strided_slice %252 {offsets = [0, 32], sizes = [8, 32], strides = [1, 1]} : vector<8x128xf32> to vector<8x32xf32>
    %260 = arith.negf %259 : vector<8x32xf32>
    %261 = math.exp %260 : vector<8x32xf32>
    %cst_140 = arith.constant 1.000000e+00 : f32
    %262 = vector.broadcast %cst_140 : f32 to vector<8x32xf32>
    %263 = arith.addf %262, %261 : vector<8x32xf32>
    %264 = arith.divf %262, %263 : vector<8x32xf32>
    %265 = vector.extract_strided_slice %252 {offsets = [0, 64], sizes = [8, 32], strides = [1, 1]} : vector<8x128xf32> to vector<8x32xf32>
    %266 = math.tanh %265 : vector<8x32xf32>
    %267 = vector.extract_strided_slice %252 {offsets = [0, 96], sizes = [8, 32], strides = [1, 1]} : vector<8x128xf32> to vector<8x32xf32>
    %268 = arith.negf %267 : vector<8x32xf32>
    %269 = math.exp %268 : vector<8x32xf32>
    %cst_141 = arith.constant 1.000000e+00 : f32
    %270 = vector.broadcast %cst_141 : f32 to vector<8x32xf32>
    %271 = arith.addf %270, %269 : vector<8x32xf32>
    %272 = arith.divf %270, %271 : vector<8x32xf32>
    %c1_142 = arith.constant 1 : index
    %c0_143 = arith.constant 0 : index
    %c0_144 = arith.constant 0 : index
    %273 = vector.load %arg10[%c1_142, %c0_143, %c0_144] : memref<2x8x32xf32, #tpu.memory_space<vmem>>, vector<1x8x32xf32>
    %274 = vector.shape_cast %273 : vector<1x8x32xf32> to vector<8x32xf32>
    %275 = arith.mulf %264, %274 : vector<8x32xf32>
    %276 = arith.mulf %258, %266 : vector<8x32xf32>
    %277 = arith.addf %275, %276 : vector<8x32xf32>
    %278 = math.tanh %277 : vector<8x32xf32>
    %279 = arith.mulf %272, %278 : vector<8x32xf32>
    %c1_145 = arith.constant 1 : index
    %c0_146 = arith.constant 0 : index
    %c0_147 = arith.constant 0 : index
    %280 = vector.load %arg10[%c1_145, %c0_146, %c0_147] : memref<2x8x32xf32, #tpu.memory_space<vmem>>, vector<1x8x32xf32>
    %281 = vector.shape_cast %280 : vector<1x8x32xf32> to vector<8x32xf32>
    %282 = vector.shape_cast %277 : vector<8x32xf32> to vector<1x8x32xf32>
    tpu.vector_store %arg10[%c1_145, %c0_146, %c0_147], %282 {strides = array<i32>} : memref<2x8x32xf32, #tpu.memory_space<vmem>>, vector<1x8x32xf32>,
    %c1_148 = arith.constant 1 : index
    %c0_149 = arith.constant 0 : index
    %c0_150 = arith.constant 0 : index
    %283 = vector.load %arg9[%c1_148, %c0_149, %c0_150] : memref<2x8x32xf32, #tpu.memory_space<vmem>>, vector<1x8x32xf32>
    %284 = vector.shape_cast %283 : vector<1x8x32xf32> to vector<8x32xf32>
    %285 = vector.shape_cast %279 : vector<8x32xf32> to vector<1x8x32xf32>
    tpu.vector_store %arg9[%c1_148, %c0_149, %c0_150], %285 {strides = array<i32>} : memref<2x8x32xf32, #tpu.memory_space<vmem>>, vector<1x8x32xf32>,
    %c2_i32_151 = arith.constant 2 : i32
    %c8_i32_152 = arith.constant 8 : i32
    %286 = arith.muli %c2_i32_151, %c8_i32_152 : i32
    %287 = tpu.assume_multiple %286, 8 : i32
    %288 = arith.index_cast %287 : i32 to index
    %c0_153 = arith.constant 0 : index
    %289 = vector.load %arg7[%288, %c0_153] : memref<32x128xf32, #tpu.memory_space<vmem>>, vector<8x128xf32>
    %c1_154 = arith.constant 1 : index
    %c0_155 = arith.constant 0 : index
    %c0_156 = arith.constant 0 : index
    %290 = vector.load %arg9[%c1_154, %c0_155, %c0_156] : memref<2x8x32xf32, #tpu.memory_space<vmem>>, vector<1x8x32xf32>
    %291 = vector.shape_cast %290 : vector<1x8x32xf32> to vector<8x32xf32>
    %c1_157 = arith.constant 1 : index
    %c0_158 = arith.constant 0 : index
    %c0_159 = arith.constant 0 : index
    %292 = vector.load %arg4[%c1_157, %c0_158, %c0_159] : memref<2x32x128xf32, #tpu.memory_space<vmem>>, vector<1x32x128xf32>
    %293 = vector.shape_cast %292 : vector<1x32x128xf32> to vector<32x128xf32>
    %cst_160 = arith.constant dense<0.000000e+00> : vector<8x128xf32>
    %294 = tpu.matmul %291, %293, %cst_160 {dimension_numbers = #tpu.dot_dimension_numbers<[1], [0], [0], [1], [0, 0, 1, 1], [], []>} : vector<8x32xf32>, vector<32x128xf32>, vector<8x128xf32> -> vector<8x128xf32>
    %295 = arith.addf %289, %294 : vector<8x128xf32>
    %296 = vector.extract_strided_slice %295 {offsets = [0, 0], sizes = [8, 32], strides = [1, 1]} : vector<8x128xf32> to vector<8x32xf32>
    %297 = arith.negf %296 : vector<8x32xf32>
    %298 = math.exp %297 : vector<8x32xf32>
    %cst_161 = arith.constant 1.000000e+00 : f32
    %299 = vector.broadcast %cst_161 : f32 to vector<8x32xf32>
    %300 = arith.addf %299, %298 : vector<8x32xf32>
    %301 = arith.divf %299, %300 : vector<8x32xf32>
    %302 = vector.extract_strided_slice %295 {offsets = [0, 32], sizes = [8, 32], strides = [1, 1]} : vector<8x128xf32> to vector<8x32xf32>
    %303 = arith.negf %302 : vector<8x32xf32>
    %304 = math.exp %303 : vector<8x32xf32>
    %cst_162 = arith.constant 1.000000e+00 : f32
    %305 = vector.broadcast %cst_162 : f32 to vector<8x32xf32>
    %306 = arith.addf %305, %304 : vector<8x32xf32>
    %307 = arith.divf %305, %306 : vector<8x32xf32>
    %308 = vector.extract_strided_slice %295 {offsets = [0, 64], sizes = [8, 32], strides = [1, 1]} : vector<8x128xf32> to vector<8x32xf32>
    %309 = math.tanh %308 : vector<8x32xf32>
    %310 = vector.extract_strided_slice %295 {offsets = [0, 96], sizes = [8, 32], strides = [1, 1]} : vector<8x128xf32> to vector<8x32xf32>
    %311 = arith.negf %310 : vector<8x32xf32>
    %312 = math.exp %311 : vector<8x32xf32>
    %cst_163 = arith.constant 1.000000e+00 : f32
    %313 = vector.broadcast %cst_163 : f32 to vector<8x32xf32>
    %314 = arith.addf %313, %312 : vector<8x32xf32>
    %315 = arith.divf %313, %314 : vector<8x32xf32>
    %c1_164 = arith.constant 1 : index
    %c0_165 = arith.constant 0 : index
    %c0_166 = arith.constant 0 : index
    %316 = vector.load %arg10[%c1_164, %c0_165, %c0_166] : memref<2x8x32xf32, #tpu.memory_space<vmem>>, vector<1x8x32xf32>
    %317 = vector.shape_cast %316 : vector<1x8x32xf32> to vector<8x32xf32>
    %318 = arith.mulf %307, %317 : vector<8x32xf32>
    %319 = arith.mulf %301, %309 : vector<8x32xf32>
    %320 = arith.addf %318, %319 : vector<8x32xf32>
    %321 = math.tanh %320 : vector<8x32xf32>
    %322 = arith.mulf %315, %321 : vector<8x32xf32>
    %c1_167 = arith.constant 1 : index
    %c0_168 = arith.constant 0 : index
    %c0_169 = arith.constant 0 : index
    %323 = vector.load %arg10[%c1_167, %c0_168, %c0_169] : memref<2x8x32xf32, #tpu.memory_space<vmem>>, vector<1x8x32xf32>
    %324 = vector.shape_cast %323 : vector<1x8x32xf32> to vector<8x32xf32>
    %325 = vector.shape_cast %320 : vector<8x32xf32> to vector<1x8x32xf32>
    tpu.vector_store %arg10[%c1_167, %c0_168, %c0_169], %325 {strides = array<i32>} : memref<2x8x32xf32, #tpu.memory_space<vmem>>, vector<1x8x32xf32>,
    %c1_170 = arith.constant 1 : index
    %c0_171 = arith.constant 0 : index
    %c0_172 = arith.constant 0 : index
    %326 = vector.load %arg9[%c1_170, %c0_171, %c0_172] : memref<2x8x32xf32, #tpu.memory_space<vmem>>, vector<1x8x32xf32>
    %327 = vector.shape_cast %326 : vector<1x8x32xf32> to vector<8x32xf32>
    %328 = vector.shape_cast %322 : vector<8x32xf32> to vector<1x8x32xf32>
    tpu.vector_store %arg9[%c1_170, %c0_171, %c0_172], %328 {strides = array<i32>} : memref<2x8x32xf32, #tpu.memory_space<vmem>>, vector<1x8x32xf32>,
    %c3_i32_173 = arith.constant 3 : i32
    %c8_i32_174 = arith.constant 8 : i32
    %329 = arith.muli %c3_i32_173, %c8_i32_174 : i32
    %330 = tpu.assume_multiple %329, 8 : i32
    %331 = arith.index_cast %330 : i32 to index
    %c0_175 = arith.constant 0 : index
    %332 = vector.load %arg7[%331, %c0_175] : memref<32x128xf32, #tpu.memory_space<vmem>>, vector<8x128xf32>
    %c1_176 = arith.constant 1 : index
    %c0_177 = arith.constant 0 : index
    %c0_178 = arith.constant 0 : index
    %333 = vector.load %arg9[%c1_176, %c0_177, %c0_178] : memref<2x8x32xf32, #tpu.memory_space<vmem>>, vector<1x8x32xf32>
    %334 = vector.shape_cast %333 : vector<1x8x32xf32> to vector<8x32xf32>
    %c1_179 = arith.constant 1 : index
    %c0_180 = arith.constant 0 : index
    %c0_181 = arith.constant 0 : index
    %335 = vector.load %arg4[%c1_179, %c0_180, %c0_181] : memref<2x32x128xf32, #tpu.memory_space<vmem>>, vector<1x32x128xf32>
    %336 = vector.shape_cast %335 : vector<1x32x128xf32> to vector<32x128xf32>
    %cst_182 = arith.constant dense<0.000000e+00> : vector<8x128xf32>
    %337 = tpu.matmul %334, %336, %cst_182 {dimension_numbers = #tpu.dot_dimension_numbers<[1], [0], [0], [1], [0, 0, 1, 1], [], []>} : vector<8x32xf32>, vector<32x128xf32>, vector<8x128xf32> -> vector<8x128xf32>
    %338 = arith.addf %332, %337 : vector<8x128xf32>
    %339 = vector.extract_strided_slice %338 {offsets = [0, 0], sizes = [8, 32], strides = [1, 1]} : vector<8x128xf32> to vector<8x32xf32>
    %340 = arith.negf %339 : vector<8x32xf32>
    %341 = math.exp %340 : vector<8x32xf32>
    %cst_183 = arith.constant 1.000000e+00 : f32
    %342 = vector.broadcast %cst_183 : f32 to vector<8x32xf32>
    %343 = arith.addf %342, %341 : vector<8x32xf32>
    %344 = arith.divf %342, %343 : vector<8x32xf32>
    %345 = vector.extract_strided_slice %338 {offsets = [0, 32], sizes = [8, 32], strides = [1, 1]} : vector<8x128xf32> to vector<8x32xf32>
    %346 = arith.negf %345 : vector<8x32xf32>
    %347 = math.exp %346 : vector<8x32xf32>
    %cst_184 = arith.constant 1.000000e+00 : f32
    %348 = vector.broadcast %cst_184 : f32 to vector<8x32xf32>
    %349 = arith.addf %348, %347 : vector<8x32xf32>
    %350 = arith.divf %348, %349 : vector<8x32xf32>
    %351 = vector.extract_strided_slice %338 {offsets = [0, 64], sizes = [8, 32], strides = [1, 1]} : vector<8x128xf32> to vector<8x32xf32>
    %352 = math.tanh %351 : vector<8x32xf32>
    %353 = vector.extract_strided_slice %338 {offsets = [0, 96], sizes = [8, 32], strides = [1, 1]} : vector<8x128xf32> to vector<8x32xf32>
    %354 = arith.negf %353 : vector<8x32xf32>
    %355 = math.exp %354 : vector<8x32xf32>
    %cst_185 = arith.constant 1.000000e+00 : f32
    %356 = vector.broadcast %cst_185 : f32 to vector<8x32xf32>
    %357 = arith.addf %356, %355 : vector<8x32xf32>
    %358 = arith.divf %356, %357 : vector<8x32xf32>
    %c1_186 = arith.constant 1 : index
    %c0_187 = arith.constant 0 : index
    %c0_188 = arith.constant 0 : index
    %359 = vector.load %arg10[%c1_186, %c0_187, %c0_188] : memref<2x8x32xf32, #tpu.memory_space<vmem>>, vector<1x8x32xf32>
    %360 = vector.shape_cast %359 : vector<1x8x32xf32> to vector<8x32xf32>
    %361 = arith.mulf %350, %360 : vector<8x32xf32>
    %362 = arith.mulf %344, %352 : vector<8x32xf32>
    %363 = arith.addf %361, %362 : vector<8x32xf32>
    %364 = math.tanh %363 : vector<8x32xf32>
    %365 = arith.mulf %358, %364 : vector<8x32xf32>
    %c1_189 = arith.constant 1 : index
    %c0_190 = arith.constant 0 : index
    %c0_191 = arith.constant 0 : index
    %366 = vector.load %arg10[%c1_189, %c0_190, %c0_191] : memref<2x8x32xf32, #tpu.memory_space<vmem>>, vector<1x8x32xf32>
    %367 = vector.shape_cast %366 : vector<1x8x32xf32> to vector<8x32xf32>
    %368 = vector.shape_cast %363 : vector<8x32xf32> to vector<1x8x32xf32>
    tpu.vector_store %arg10[%c1_189, %c0_190, %c0_191], %368 {strides = array<i32>} : memref<2x8x32xf32, #tpu.memory_space<vmem>>, vector<1x8x32xf32>,
    %c1_192 = arith.constant 1 : index
    %c0_193 = arith.constant 0 : index
    %c0_194 = arith.constant 0 : index
    %369 = vector.load %arg9[%c1_192, %c0_193, %c0_194] : memref<2x8x32xf32, #tpu.memory_space<vmem>>, vector<1x8x32xf32>
    %370 = vector.shape_cast %369 : vector<1x8x32xf32> to vector<8x32xf32>
    %371 = vector.shape_cast %365 : vector<8x32xf32> to vector<1x8x32xf32>
    tpu.vector_store %arg9[%c1_192, %c0_193, %c0_194], %371 {strides = array<i32>} : memref<2x8x32xf32, #tpu.memory_space<vmem>>, vector<1x8x32xf32>,
    %c4_i32_195 = arith.constant 4 : i32
    %c1_i32_196 = arith.constant 1 : i32
    %372 = arith.cmpi eq, %arg0, %c1_i32_196 : i32
    %373 = arith.extui %372 : i1 to i32
    %c0_i32_197 = arith.constant 0 : i32
    %374 = arith.cmpi ne, %373, %c0_i32_197 : i32
    scf.if %374 {
      %c1_198 = arith.constant 1 : index
      %c0_199 = arith.constant 0 : index
      %c0_200 = arith.constant 0 : index
      %375 = vector.load %arg9[%c1_198, %c0_199, %c0_200] : memref<2x8x32xf32, #tpu.memory_space<vmem>>, vector<1x8x32xf32>
      %376 = vector.shape_cast %375 : vector<1x8x32xf32> to vector<8x32xf32>
      %c0_201 = arith.constant 0 : index
      %c0_202 = arith.constant 0 : index
      %377 = vector.load %arg6[%c0_201, %c0_202] : memref<8x32xf32, #tpu.memory_space<vmem>>, vector<8x32xf32>
      tpu.vector_store %arg6[%c0_201, %c0_202], %376 {strides = array<i32>} : memref<8x32xf32, #tpu.memory_space<vmem>>, vector<8x32xf32>,
    } else {
    }
    return
  }
  func.func @transform_0(%arg0: i32) -> (i32, i32) {
    %c0_i32 = arith.constant 0 : i32
    %c0_i32_0 = arith.constant 0 : i32
    return %arg0, %c0_i32 : i32, i32
  }
  func.func @transform_1(%arg0: i32) -> (i32, i32) {
    %c0_i32 = arith.constant 0 : i32
    %c0_i32_0 = arith.constant 0 : i32
    %c0_i32_1 = arith.constant 0 : i32
    return %c0_i32, %c0_i32_0 : i32, i32
  }
  func.func @transform_2(%arg0: i32) -> (i32, i32, i32) {
    %c0_i32 = arith.constant 0 : i32
    %c0_i32_0 = arith.constant 0 : i32
    %c0_i32_1 = arith.constant 0 : i32
    %c0_i32_2 = arith.constant 0 : i32
    return %c0_i32, %c0_i32_0, %c0_i32_1 : i32, i32, i32
  }
  func.func @transform_3(%arg0: i32) -> (i32, i32, i32) {
    %c0_i32 = arith.constant 0 : i32
    %c0_i32_0 = arith.constant 0 : i32
    %c0_i32_1 = arith.constant 0 : i32
    %c0_i32_2 = arith.constant 0 : i32
    return %c0_i32, %c0_i32_0, %c0_i32_1 : i32, i32, i32
  }
  func.func @transform_4(%arg0: i32) -> (i32, i32, i32) {
    %c0_i32 = arith.constant 0 : i32
    %c0_i32_0 = arith.constant 0 : i32
    %c0_i32_1 = arith.constant 0 : i32
    %c0_i32_2 = arith.constant 0 : i32
    return %c0_i32, %c0_i32_0, %c0_i32_1 : i32, i32, i32
  }
  func.func @transform_5(%arg0: i32) -> (i32, i32) {
    %c0_i32 = arith.constant 0 : i32
    %c0_i32_0 = arith.constant 0 : i32
    %c0_i32_1 = arith.constant 0 : i32
    return %c0_i32, %c0_i32_0 : i32, i32
  }
}

</mosaic_0001>

<bundles_post_ra>
// kernel: tpu_custom_call.1
= control target key start
LH: loop header
LB: loop body
LE: loop exit
PB: predicated region body
PF: predicated region fallthrough
CT: control target
= control target key end

     0   :  { %10 = vsyncpa [#allocation7], 0  ;;  %s1546_s0 = inlined_call_operand.vmem [shape: f32[64,16], index: 0, kind: input, shape index: {}]   ;;  %s1547_s1 = inlined_call_operand.vmem [shape: f32[16,128], index: 1, kind: input, shape index: {}]   ;;  %s1548_s2 = inlined_call_operand.hbm [shape: f32[1,32,128], index: 2, kind: input, shape index: {}]   ;;  %s1549_s3 = inlined_call_operand.vmem [shape: f32[2,32,128], index: 3, kind: input, shape index: {}]   ;;  %s1550_s4 = inlined_call_operand.vmem [shape: f32[2,1,128], index: 4, kind: input, shape index: {}]   ;;  %s1551_s5 = inlined_call_operand.hbm [shape: f32[8,32], index: 5, kind: output, shape index: {}]  }
   0x1   :  { %11 = vsyncpa [#allocation8], 0  ;;  %s1354_s18 = smov 0  }
   0x2 LB: > { %s167_s21 = sshll.u32 %s1548_s2, 4  ;;  %s1363_s22 = sadd.s32 4294967295, %s1314_s18   ;;  %s1314_s18 = sphi %s1354_s18, %s17_s18   ;;  %s168_s21 = int_to_ptr.hbm [resolvable:$true] %s167_s21 }
   0x3   : > { %p1090_p0 = scmp.ge.s32.totalorder %s1314_s18, 1  ;;  %p153_p1 = scmp.lt.s32.totalorder %s1314_s18, 3 }
   0x4   : > { %p1091_p2 = scmp.ne.s32.totalorder %s1363_s22, 0  ;;  %p1156_p3 = scmp.eq.s32.totalorder %s1363_s22, 0 }
   0x5   : > { %p154_p4 = pnand %p1090_p0, %p153_p1  ;;  %s1316_s23 = smov [#allocation6]  }
   0x6   : > { %s169_s24 = sshll.u32 %s1316_s23, 4  ;;  %s1317_s25 = smov 128   ;;  %s170_s24 = int_to_ptr.vmem [resolvable:$true] %s169_s24 }
   0x7   : > { %p1152_p5 = pneg %p154_p4  ;;  %s1318_s26 = smov 8  }
   0x8   : > { %200 = sbr.rel (%p154_p4) target bundleno = 3545 (0xdd9), region = 40 }
   0x9   : > { %p1153_p6 = pnand %p1156_p3, %p1152_p5 }
   0xb   : > { %1155 = dma.hbm_to_vmem [thread:$0]  (!%p1153_p6), %s168_s21, 512, %s170_s24, [#allocation7], %s1317_s25, %s1317_s25, %s1318_s26  }
   0xd   : > { %1305 = dma.done.wait (%p1156_p3), [#allocation7], 512  }
   0xe   : > { %1307 = vsyncadd (%p1156_p3), [#allocation7], 4294966784  ;;  %s1095_s27 = sshll.u32 %s1363_s22, 2 }
   0xf   : > { %p225_p7 = scmp.lt.s32.totalorder %s1095_s27, 7  ;;  %233 = sbr.rel (%p1091_p2) target bundleno = 25 (0x19), region = 48 }
  0x11   : > { %s1553_s27 = smov (!%p225_p7, %s1095_s27), 7 }
  0x12   : > { %s1096_s28 = sshll.u32 %s1553_s27, 3 }
  0x13   : > { %s1373_s6 = scalar_lea.vmem %s1546_s0, %s1096_s28 }
  0x14   : > { %vm234_vm0 = vcmask 261120   ;;  %v1319_v0 = vmov 0.0  }
  0x15   : > { %235 = vst.msk [vmem:[#allocation4] sm:$0xff] %vm234_vm0, %v1319_v0 }
  0x16   : > { %236 = vst.msk [vmem:[#allocation4 + $0x8] sm:$0xff] %vm234_vm0, %v1319_v0 }
  0x17   : > { %237 = vst.msk [vmem:[#allocation5] sm:$0xff] %vm234_vm0, %v1319_v0 }
  0x18   : > { %238 = vst.msk [vmem:[#allocation5 + $0x8] sm:$0xff] %vm234_vm0, %v1319_v0 }
  0x19 PF: > { %v300_v1 = vld [vmem:[%s1549_s3 + $0x18] sm:$0xff]  ;;  %v244_v2 = vld [vmem:[%s1547_s1 + $0x8] sm:$0xff]  ;;  %v299_v3 = vld [vmem:[%s1549_s3 + $0x10] sm:$0xff]  ;;  %vm249_vm1 = vcmask 130048   ;;  %vm301_vm2 = vcmask 261120   ;;  %s1320_s23 = smov 64  }
  0x1a   : > { %317 = vmatpush.msra.mxu1 %v300_v1  ;;  %276 = vmatpush.msra.mxu0 %v244_v2  ;;  %v243_v4 = vld [vmem:[%s1547_s1] sm:$0xff]  ;;  %v298_v6 = vld [vmem:[%s1549_s3 + $0x8] sm:$0xff]  ;;  %s1321_s24 = smov 32   ;;  %s1322_s25 = smov 96   ;;  %v641_v38 = vld [vmem:[#allocation6 + $0x18] sm:$0xff] }
  0x1b   : > { %v239_v5 = vld [vmem:[%s1373_s6] sm:$0xff]  ;;  %401 = vmatpush.msra.mxu3 %v300_v1  ;;  %v640_v39 = vld [vmem:[#allocation6 + $0x10] sm:$0xff]  ;;  %671 = vmatpush.msra.mxu2 %v641_v38  ;;  %v639_v40 = vld [vmem:[#allocation6 + $0x8] sm:$0xff]  ;;  %p1139_p8 = scmp.ne.s32.totalorder %s1363_s22, 1 }
  0x1c   : > { %318 = vmatpush.msra.mxu1 %v299_v3  ;;  %277 = vmatpush.msra.mxu0 %v243_v4  ;;  %v297_v7 = vld [vmem:[%s1549_s3] sm:$0xff]  ;;  %v240_v42 = vld [vmem:[%s1373_s6 + $0x8] sm:$0xff] }
  0x1d   : > { %1098 = vmatmul.msk.f32.vlgmr.msra.gmra.mxu0 %vm249_vm1, %v239_v5  ;;  %402 = vmatpush.msra.mxu3 %v299_v3  ;;  %v296_v8 = vld [vmem:[#allocation4] sm:$0xff] }
  0x1e   : > { %319 = vmatpush.msra.mxu1 %v298_v6  ;;  %v1401_v9 = vld [vmem:[%s1550_s4] ss:$0 sm:$0xff]  ;;  %v346_v15 = vld [vmem:[#allocation5] sm:$0xff]  ;;  %672 = vmatpush.msra.mxu2 %v640_v39 }
  0x1f   : > { %403 = vmatpush.msra.mxu3 %v298_v6  ;;  %v638_v41 = vld [vmem:[#allocation6] sm:$0xff] }
  0x20   : > { %320 = vmatpush.msra.mxu1 %v297_v7  ;;  %673 = vmatpush.msra.mxu2 %v639_v40 }
  0x21   : > { %1102 = vmatmul.msk.f32.vlgmr.msra.gmra.mxu1 %vm301_vm2, %v296_v8  ;;  %404 = vmatpush.msra.mxu3 %v297_v7 }
  0x22   : > { %571 = vmatpush.msrb.mxu1 %v300_v1  ;;  %674 = vmatpush.msra.mxu2 %v638_v41 }
  0x23   : > { %486 = vmatpush.msrb.mxu3 %v300_v1 }
  0x24   : > { %572 = vmatpush.msrb.mxu1 %v299_v3 }
  0x25   : > { %487 = vmatpush.msrb.mxu3 %v299_v3  ;;  %1099 = vmatmul.msk.f32.gmra.mxu0 %vm249_vm1, %v240_v42 }
  0x26   : > { %573 = vmatpush.msrb.mxu1 %v298_v6 }
  0x27   : > { %488 = vmatpush.msrb.mxu3 %v298_v6 }
  0x28   : > { %574 = vmatpush.msrb.mxu1 %v297_v7 }
  0x29   : > { %489 = vmatpush.msrb.mxu3 %v297_v7 }
  0x9a   : > { %v279_v10 = vpop.f32.mrf.mxu0 }
  0x9b   : > { %v280_v11 = vadd.f32 %v1401_v9, %v279_v10 }
  0x9e   : > { %v322_v12 = vpop.f32.mrf.mxu1 }
  0x9f   : > { %v325_v13 = vadd.f32 %v322_v12, %v280_v11 }
  0xa1   : > { %1178 = vtanh.f32 %v325_v13  ;;  %v1103_v16 = vmul.f32 -1.442695, %v325_v13 }
  0xa2   : > { %v282_v48 = vpop.f32.mrf.mxu0 }
  0xa3   : > { %1180 = vpow2.f32 %v1103_v16  ;;  %v283_v49 = vadd.f32 %v1401_v9, %v282_v48  ;;  %v241_v16 = vld [vmem:[%s1373_s6 + $0x10] sm:$0xff] }
  0xa4   : > { %1100 = vmatmul.msk.f32.gmra.mxu0 %vm249_vm1, %v241_v16 }
  0xa7   : > { %v1179_v14 = vpop.eup %1178 }
  0xa8   : > { %353 = vrot.lane.b32.xlu0 %v1179_v14, %s1320_s23  ;;  %v1429_v14 = vld [vmem:[%s1549_s3 + $0x38] sm:$0xff] }
  0xa9   : > { %v1181_v17 = vpop.eup %1180  ;;  %798 = vmatpush.msra.mxu1 %v1429_v14 }
  0xaa   : > { %v329_v18 = vadd.f32 1.0, %v1181_v17  ;;  %v1442_v17 = vld [vmem:[%s1549_s3 + $0x28] sm:$0xff] }
  0xac   : > { %1182 = vrcp.f32 %v329_v18  ;;  %v341_v24 = vand.u32 2147483648, %v329_v18  ;;  %vm335_vm4 = vweird.f32 %v329_v18  ;;  %v339_v25 = vand.u32 2147483647, %v329_v18 }
  0xae   : > { %v342_v27 = vor.u32 1.1754944e-38, %v341_v24  ;;  %vm340_vm6 = vcmp.eq.f32.partialorder %v339_v25, 8.507059e+37 }
  0xb0   : > { %348 = vrot.lane.b32.xlu0 %v346_v15, %s1321_s24  ;;  %v1434_v15 = vld [vmem:[%s1549_s3 + $0x30] sm:$0xff] }
  0xb1   : > { %799 = vmatpush.msra.mxu1 %v1434_v15 }
  0xb2   : > { %v1183_v19 = vpop.eup %1182 }
  0xb3   : > { %v331_v20 = vmul.f32 %v1183_v19, %v329_v18  ;;  %vm336_vm3 = vweird.f32 %v1183_v19  ;;  %v1449_v18 = vld [vmem:[%s1549_s3 + $0x20] sm:$0xff]  ;;  %800 = vmatpush.msra.mxu1 %v1442_v17 }
  0xb4   : > { %vm337_vm5 = vmor %vm335_vm4, %vm336_vm3 }
  0xb5   : > { %v332_v21 = vsub.f32 1.0, %v331_v20  ;;  %801 = vmatpush.msra.mxu1 %v1449_v18 }
  0xb7   : > { %v333_v22 = vmul.f32 %v1183_v19, %v332_v21 }
  0xb9   : > { %v334_v23 = vadd.f32 %v1183_v19, %v333_v22  ;;  %v694_v22 = vld [vmem:[#allocation4 + $0x8] sm:$0xff] }
  0xbb   : > { %v338_v26 = vsel %vm337_vm5, %v1183_v19, %v334_v23 }
  0xbc   : > { %v343_v29 = vsel %vm340_vm6, %v342_v27, %v338_v26  ;;  %v1469_v27 = vld [vmem:[%s1550_s4 + $0x1] ss:$0 sm:$0xff] }
 0x11a   : > { %v354_v28 = vpop.permute.xlu0 %353 }
 0x11b   : > { %v356_v30 = vmul.f32 %v354_v28, %v343_v29 }
 0x11d   : > { %358 = vrot.lane.b32.xlu1 %v356_v30, %s1321_s24 }
 0x121   : > { %v285_v23 = vpop.f32.mrf.mxu0 }
 0x122   : > { %v349_v31 = vpop.permute.xlu0 %348  ;;  %v286_v24 = vadd.f32 %v1401_v9, %v285_v23 }
 0x123   : > { %v351_v32 = vmul.f32 %v349_v31, %v343_v29 }
 0x18f   : > { %v359_v33 = vpop.permute.xlu1 %358 }
 0x190   : > { %v361_v34 = vadd.f32 %v359_v33, %v351_v32 }
 0x192   : > { %1184 = vtanh.f32 %v361_v34 }
 0x198   : > { %v1185_v35 = vpop.eup %1184 }
 0x199   : > { %364 = vrot.lane.b32.xlu1 %v1185_v35, %s1320_s23 }
 0x20b   : > { %v365_v36 = vpop.permute.xlu1 %364 }
 0x20c   : > { %v367_v37 = vmul.f32 %v365_v36, %v343_v29 }
 0x20e   : > { %374 = vrot.lane.b32.xlu2 %v367_v37, %s1321_s24 }
 0x216   : > { %369 = vrot.lane.b32.xlu2 %v361_v34, %s1322_s25  ;;  %v745_v34 = vld [vmem:[#allocation5 + $0x8] sm:$0xff] }
 0x268   : > { %v375_v43 = vpop.permute.xlu2 %374 }
 0x269   : > { %377 = vst.msk [vmem:[#allocation4] sm:$0xff] %vm301_vm2, %v375_v43 }
 0x26a   : > { %378 = vst.msk [vmem:[#allocation3] sm:$0xff] %vm301_vm2, %v375_v43 }
 0x270   : > { %v370_v44 = vpop.permute.xlu2 %369  ;;  %v381_v45 = vld [vmem:[#allocation4] sm:$0xff] }
 0x271   : > { %372 = vst.msk [vmem:[#allocation5] sm:$0xff] %vm301_vm2, %v370_v44  ;;  %1104 = vmatmul.msk.f32.vlgmr.msra.gmra.mxu3 %vm301_vm2, %v381_v45  ;;  %v634_v46 = vld [vmem:[#allocation3] sm:$0xff] }
 0x272   : > { %1111 = vmatmul.msk.f32.vlgmr.msra.gmra.mxu2 %vm301_vm2, %v634_v46  ;;  %715 = vmatpush.msra.mxu3 %v1429_v14 }
 0x274   : > { %716 = vmatpush.msra.mxu3 %v1434_v15 }
 0x276   : > { %717 = vmatpush.msra.mxu3 %v1442_v17 }
 0x278   : > { %v430_v47 = vld [vmem:[#allocation5] sm:$0xff]  ;;  %718 = vmatpush.msra.mxu3 %v1449_v18 }
 0x279   : > { %432 = vrot.lane.b32.xlu1 %v430_v47, %s1321_s24 }
 0x2eb   : > { %v433_v4 = vpop.permute.xlu1 %432 }
 0x2f4   : > { %v406_v50 = vpop.f32.mrf.mxu3 }
 0x2f5   : > { %v409_v51 = vadd.f32 %v406_v50, %v283_v49  ;;  %v676_v28 = vpop.f32.mrf.mxu2 }
 0x2f6   : > { %v677_v29 = vadd.f32 %v1469_v27, %v676_v28 }
 0x2f7   : > { %1186 = vtanh.f32 %v409_v51  ;;  %v1105_v53 = vmul.f32 -1.442695, %v409_v51 }
 0x2f9   : > { %1188 = vpow2.f32 %v1105_v53 }
 0x2fd   : > { %v1187_v52 = vpop.eup %1186 }
 0x2fe   : > { %437 = vrot.lane.b32.xlu0 %v1187_v52, %s1320_s23 }
 0x2ff   : > { %v1189_v54 = vpop.eup %1188 }
 0x300   : > { %v413_v55 = vadd.f32 1.0, %v1189_v54 }
 0x302   : > { %1190 = vrcp.f32 %v413_v55  ;;  %v425_v61 = vand.u32 2147483648, %v413_v55  ;;  %vm419_vm8 = vweird.f32 %v413_v55  ;;  %v423_v62 = vand.u32 2147483647, %v413_v55 }
 0x304   : > { %v426_v0 = vor.u32 1.1754944e-38, %v425_v61  ;;  %vm424_vm10 = vcmp.eq.f32.partialorder %v423_v62, 8.507059e+37 }
 0x308   : > { %v1191_v56 = vpop.eup %1190 }
 0x309   : > { %v415_v57 = vmul.f32 %v1191_v56, %v413_v55  ;;  %vm420_vm7 = vweird.f32 %v1191_v56 }
 0x30a   : > { %vm421_vm9 = vmor %vm419_vm8, %vm420_vm7 }
 0x30b   : > { %v416_v58 = vsub.f32 1.0, %v415_v57 }
 0x30d   : > { %v417_v59 = vmul.f32 %v1191_v56, %v416_v58 }
 0x30f   : > { %v418_v60 = vadd.f32 %v1191_v56, %v417_v59 }
 0x311   : > { %v422_v63 = vsel %vm421_vm9, %v1191_v56, %v418_v60 }
 0x312   : > { %v427_v2 = vsel %vm424_vm10, %v426_v0, %v422_v63 }
 0x313   : > { %v435_v5 = vmul.f32 %v433_v4, %v427_v2 }
 0x370   : > { %v438_v1 = vpop.permute.xlu0 %437 }
 0x371   : > { %v440_v3 = vmul.f32 %v438_v1, %v427_v2 }
 0x373   : > { %442 = vrot.lane.b32.xlu2 %v440_v3, %s1321_s24 }
 0x3cd   : > { %v443_v6 = vpop.permute.xlu2 %442 }
 0x3ce   : > { %v445_v7 = vadd.f32 %v443_v6, %v435_v5 }
 0x3d0   : > { %1192 = vtanh.f32 %v445_v7  ;;  %453 = vrot.lane.b32.xlu2 %v445_v7, %s1322_s25 }
 0x3d6   : > { %v1193_v8 = vpop.eup %1192 }
 0x3d7   : > { %448 = vrot.lane.b32.xlu0 %v1193_v8, %s1320_s23 }
 0x42a   : > { %v454_v10 = vpop.permute.xlu2 %453 }
 0x42b   : > { %456 = vst.msk [vmem:[#allocation5] sm:$0xff] %vm301_vm2, %v454_v10 }
 0x432   : > { %v515_v11 = vld [vmem:[#allocation5] sm:$0xff] }
 0x433   : > { %517 = vrot.lane.b32.xlu2 %v515_v11, %s1321_s24 }
 0x449   : > { %v449_v12 = vpop.permute.xlu0 %448 }
 0x44a   : > { %v451_v13 = vmul.f32 %v449_v12, %v427_v2 }
 0x44c   : > { %458 = vrot.lane.b32.xlu1 %v451_v13, %s1321_s24 }
 0x48d   : > { %v518_v1 = vpop.permute.xlu2 %517 }
 0x4be   : > { %v459_v19 = vpop.permute.xlu1 %458 }
 0x4bf   : > { %461 = vst.msk [vmem:[#allocation4] sm:$0xff] %vm301_vm2, %v459_v19 }
 0x4c0   : > { %463 = vst.msk [vmem:[#allocation3 + $0x8] sm:$0xff] %vm301_vm2, %v459_v19 }
 0x4c6   : > { %v466_v20 = vld [vmem:[#allocation4] sm:$0xff] }
 0x4c7   : > { %1106 = vmatmul.msk.f32.vlgmr.msrb.gmra.mxu3 %vm301_vm2, %v466_v20  ;;  %v635_v21 = vld [vmem:[#allocation3 + $0x8] sm:$0xff] }
 0x4c8   : > { %1112 = vmatmul.msk.f32.gmra.mxu2 %vm301_vm2, %v635_v21  ;;  %880 = vmatpush.msrb.mxu3 %v1429_v14 }
 0x4ca   : > { %881 = vmatpush.msrb.mxu3 %v1434_v15 }
 0x4cc   : > { %882 = vmatpush.msrb.mxu3 %v1442_v17 }
 0x4ce   : > { %883 = vmatpush.msrb.mxu3 %v1449_v18 }
 0x4cf   : > { %1119 = vmatmul.msk.f32.vlgmr.msra.gmra.mxu3 %vm301_vm2, %v694_v22  ;;  %v242_v22 = vld [vmem:[%s1373_s6 + $0x18] sm:$0xff] }
 0x4d0   : > { %1101 = vmatmul.msk.f32.gmra.mxu0 %vm249_vm1, %v242_v22 }
 0x54a   : > { %v491_v25 = vpop.f32.mrf.mxu3 }
 0x54b   : > { %v494_v26 = vadd.f32 %v491_v25, %v286_v24 }
 0x54d   : > { %1194 = vtanh.f32 %v494_v26  ;;  %v1107_v35 = vmul.f32 -1.442695, %v494_v26 }
 0x552   : > { %v720_v30 = vpop.f32.mrf.mxu3 }
 0x553   : > { %v1195_v31 = vpop.eup %1194  ;;  %v723_v32 = vadd.f32 %v720_v30, %v677_v29  ;;  %v679_v30 = vpop.f32.mrf.mxu2 }
 0x554   : > { %522 = vrot.lane.b32.xlu0 %v1195_v31, %s1320_s23  ;;  %v680_v31 = vadd.f32 %v1469_v27, %v679_v30 }
 0x555   : > { %1196 = vtanh.f32 %v723_v32  ;;  %v1120_v36 = vmul.f32 -1.442695, %v723_v32 }
 0x556   : > { %1198 = vpow2.f32 %v1107_v35 }
 0x557   : > { %1200 = vpow2.f32 %v1120_v36 }
 0x55b   : > { %v1197_v33 = vpop.eup %1196 }
 0x55c   : > { %752 = vrot.lane.b32.xlu1 %v1197_v33, %s1320_s23  ;;  %v1199_v37 = vpop.eup %1198 }
 0x55d   : > { %v498_v38 = vadd.f32 1.0, %v1199_v37  ;;  %v1201_v39 = vpop.eup %1200 }
 0x55e   : > { %v727_v40 = vadd.f32 1.0, %v1201_v39 }
 0x55f   : > { %1202 = vrcp.f32 %v498_v38  ;;  %v510_v49 = vand.u32 2147483648, %v498_v38  ;;  %vm504_vm12 = vweird.f32 %v498_v38  ;;  %v508_v50 = vand.u32 2147483647, %v498_v38 }
 0x560   : > { %1204 = vrcp.f32 %v727_v40  ;;  %v739_v58 = vand.u32 2147483648, %v727_v40  ;;  %vm733_vm0 = vweird.f32 %v727_v40  ;;  %v737_v59 = vand.u32 2147483647, %v727_v40 }
 0x561   : > { %v511_v53 = vor.u32 1.1754944e-38, %v510_v49  ;;  %vm509_vm14 = vcmp.eq.f32.partialorder %v508_v50, 8.507059e+37 }
 0x562   : > { %v740_v61 = vor.u32 1.1754944e-38, %v739_v58  ;;  %vm738_vm4 = vcmp.eq.f32.partialorder %v737_v59, 8.507059e+37 }
 0x564   : > { %747 = vrot.lane.b32.xlu1 %v745_v34, %s1321_s24 }
 0x565   : > { %v1203_v41 = vpop.eup %1202 }
 0x566   : > { %v500_v42 = vmul.f32 %v1203_v41, %v498_v38  ;;  %v1205_v44 = vpop.eup %1204  ;;  %vm505_vm11 = vweird.f32 %v1203_v41 }
 0x567   : > { %v729_v46 = vmul.f32 %v1205_v44, %v727_v40  ;;  %vm506_vm13 = vmor %vm504_vm12, %vm505_vm11  ;;  %vm734_vm15 = vweird.f32 %v1205_v44 }
 0x568   : > { %v501_v43 = vsub.f32 1.0, %v500_v42  ;;  %vm735_vm3 = vmor %vm733_vm0, %vm734_vm15 }
 0x569   : > { %v730_v48 = vsub.f32 1.0, %v729_v46 }
 0x56a   : > { %v502_v45 = vmul.f32 %v1203_v41, %v501_v43 }
 0x56b   : > { %v731_v52 = vmul.f32 %v1205_v44, %v730_v48  ;;  %v288_v48 = vpop.f32.mrf.mxu0 }
 0x56c   : > { %v503_v47 = vadd.f32 %v1203_v41, %v502_v45 }
 0x56d   : > { %v732_v57 = vadd.f32 %v1205_v44, %v731_v52 }
 0x56e   : > { %v507_v51 = vsel %vm506_vm13, %v1203_v41, %v503_v47 }
 0x56f   : > { %v512_v55 = vsel %vm509_vm14, %v511_v53, %v507_v51  ;;  %v736_v60 = vsel %vm735_vm3, %v1205_v44, %v732_v57  ;;  %v289_v51 = vadd.f32 %v1401_v9, %v288_v48 }
 0x570   : > { %v741_v63 = vsel %vm738_vm4, %v740_v61, %v736_v60  ;;  %v520_v7 = vmul.f32 %v518_v1, %v512_v55 }
 0x5c6   : > { %v523_v54 = vpop.permute.xlu0 %522 }
 0x5c7   : > { %v525_v56 = vmul.f32 %v523_v54, %v512_v55 }
 0x5c9   : > { %527 = vrot.lane.b32.xlu0 %v525_v56, %s1321_s24 }
 0x5ce   : > { %v753_v62 = vpop.permute.xlu1 %752 }
 0x5cf   : > { %v755_v0 = vmul.f32 %v753_v62, %v741_v63 }
 0x5d1   : > { %757 = vrot.lane.b32.xlu2 %v755_v0, %s1321_s24 }
 0x5d6   : > { %v748_v2 = vpop.permute.xlu1 %747 }
 0x5d7   : > { %v750_v3 = vmul.f32 %v748_v2, %v741_v63 }
 0x62b   : > { %v758_v4 = vpop.permute.xlu2 %757 }
 0x62c   : > { %v760_v5 = vadd.f32 %v758_v4, %v750_v3 }
 0x62e   : > { %1206 = vtanh.f32 %v760_v5 }
 0x634   : > { %v1207_v6 = vpop.eup %1206 }
 0x635   : > { %763 = vrot.lane.b32.xlu1 %v1207_v6, %s1320_s23 }
 0x63b   : > { %v528_v8 = vpop.permute.xlu0 %527 }
 0x63c   : > { %v530_v10 = vadd.f32 %v528_v8, %v520_v7 }
 0x63d   : > { %768 = vrot.lane.b32.xlu1 %v760_v5, %s1322_s25 }
 0x63e   : > { %1208 = vtanh.f32 %v530_v10 }
 0x644   : > { %v1209_v11 = vpop.eup %1208 }
 0x645   : > { %533 = vrot.lane.b32.xlu0 %v1209_v11, %s1320_s23 }
 0x6a7   : > { %v764_v12 = vpop.permute.xlu1 %763 }
 0x6a8   : > { %v766_v13 = vmul.f32 %v764_v12, %v741_v63 }
 0x6aa   : > { %773 = vrot.lane.b32.xlu0 %v766_v13, %s1321_s24 }
 0x6af   : > { %v769_v16 = vpop.permute.xlu1 %768 }
 0x6b0   : > { %771 = vst.msk [vmem:[#allocation5 + $0x8] sm:$0xff] %vm301_vm2, %v769_v16 }
 0x6b7   : > { %v534_v19 = vpop.permute.xlu0 %533  ;;  %v827_v20 = vld [vmem:[#allocation5 + $0x8] sm:$0xff] }
 0x6b8   : > { %v536_v21 = vmul.f32 %v534_v19, %v512_v55  ;;  %829 = vrot.lane.b32.xlu0 %v827_v20, %s1321_s24 }
 0x6ba   : > { %543 = vrot.lane.b32.xlu2 %v536_v21, %s1321_s24 }
 0x714   : > { %v544_v23 = vpop.permute.xlu2 %543 }
 0x715   : > { %546 = vst.msk [vmem:[#allocation4] sm:$0xff] %vm301_vm2, %v544_v23 }
 0x716   : > { %548 = vst.msk [vmem:[#allocation3 + $0x10] sm:$0xff] %vm301_vm2, %v544_v23 }
 0x71c   : > { %v774_v24 = vpop.permute.xlu0 %773  ;;  %v551_v25 = vld [vmem:[#allocation4] sm:$0xff] }
 0x71d   : > { %776 = vst.msk [vmem:[#allocation4 + $0x8] sm:$0xff] %vm301_vm2, %v774_v24  ;;  %1108 = vmatmul.msk.f32.vlgmr.msrb.gmra.mxu1 %vm301_vm2, %v551_v25  ;;  %v636_v26 = vld [vmem:[#allocation3 + $0x10] sm:$0xff] }
 0x71e   : > { %1113 = vmatmul.msk.f32.gmra.mxu2 %vm301_vm2, %v636_v26  ;;  %962 = vmatpush.msrb.mxu1 %v1429_v14 }
 0x720   : > { %963 = vmatpush.msrb.mxu1 %v1434_v15 }
 0x722   : > { %964 = vmatpush.msrb.mxu1 %v1442_v17 }
 0x724   : > { %v778_v28 = vld [vmem:[#allocation4 + $0x8] sm:$0xff]  ;;  %965 = vmatpush.msrb.mxu1 %v1449_v18 }
 0x725   : > { %1125 = vmatmul.msk.f32.vlgmr.msra.gmra.mxu1 %vm301_vm2, %v778_v28 }
 0x72a   : > { %v830_v46 = vpop.permute.xlu0 %829 }
 0x79a   : > { %v576_v29 = vpop.f32.mrf.mxu1 }
 0x79b   : > { %v579_v52 = vadd.f32 %v576_v29, %v289_v51 }
 0x79d   : > { %v1109_v57 = vmul.f32 -1.442695, %v579_v52 }
 0x7a1   : > { %v682_v22 = vpop.f32.mrf.mxu2 }
 0x7a2   : > { %v803_v32 = vpop.f32.mrf.mxu1  ;;  %v683_v23 = vadd.f32 %v1469_v27, %v682_v22 }
 0x7a3   : > { %v806_v33 = vadd.f32 %v803_v32, %v680_v31 }
 0x7a5   : > { %1210 = vtanh.f32 %v806_v33  ;;  %v1126_v14 = vmul.f32 -1.442695, %v806_v33 }
 0x7a7   : > { %1212 = vpow2.f32 %v1126_v14 }
 0x7ab   : > { %v1211_v34 = vpop.eup %1210 }
 0x7ac   : > { %834 = vrot.lane.b32.xlu2 %v1211_v34, %s1320_s23 }
 0x7ad   : > { %v1213_v15 = vpop.eup %1212 }
 0x7ae   : > { %v810_v35 = vadd.f32 1.0, %v1213_v15 }
 0x7b0   : > { %1214 = vrcp.f32 %v810_v35  ;;  %v822_v39 = vand.u32 2147483648, %v810_v35  ;;  %vm816_vm5 = vweird.f32 %v810_v35  ;;  %v820_v40 = vand.u32 2147483647, %v810_v35 }
 0x7b2   : > { %v823_v42 = vor.u32 1.1754944e-38, %v822_v39  ;;  %vm821_vm7 = vcmp.eq.f32.partialorder %v820_v40, 8.507059e+37 }
 0x7b6   : > { %v1215_v17 = vpop.eup %1214 }
 0x7b7   : > { %v812_v36 = vmul.f32 %v1215_v17, %v810_v35  ;;  %vm817_vm1 = vweird.f32 %v1215_v17 }
 0x7b8   : > { %vm818_vm6 = vmor %vm816_vm5, %vm817_vm1 }
 0x7b9   : > { %v813_v18 = vsub.f32 1.0, %v812_v36 }
 0x7bb   : > { %v814_v37 = vmul.f32 %v1215_v17, %v813_v18 }
 0x7bd   : > { %v815_v38 = vadd.f32 %v1215_v17, %v814_v37 }
 0x7bf   : > { %v819_v41 = vsel %vm818_vm6, %v1215_v17, %v815_v38 }
 0x7c0   : > { %v824_v44 = vsel %vm821_vm7, %v823_v42, %v819_v41 }
 0x7c1   : > { %v832_v47 = vmul.f32 %v830_v46, %v824_v44 }
 0x806   : > { %v835_v43 = vpop.permute.xlu2 %834 }
 0x807   : > { %v837_v45 = vmul.f32 %v835_v43, %v824_v44 }
 0x809   : > { %839 = vrot.lane.b32.xlu1 %v837_v45, %s1321_s24 }
 0x811   : > { %538 = vrot.lane.b32.xlu1 %v530_v10, %s1322_s25 }
 0x87b   : > { %v840_v49 = vpop.permute.xlu1 %839 }
 0x87c   : > { %v842_v50 = vadd.f32 %v840_v49, %v832_v47 }
 0x87e   : > { %1216 = vtanh.f32 %v842_v50 }
 0x87f   : > { %1218 = vtanh.f32 %v579_v52 }
 0x880   : > { %1220 = vpow2.f32 %v1109_v57 }
 0x883   : > { %v539_v53 = vpop.permute.xlu1 %538 }
 0x884   : > { %v1217_v54 = vpop.eup %1216  ;;  %541 = vst.msk [vmem:[#allocation5] sm:$0xff] %vm301_vm2, %v539_v53 }
 0x885   : > { %845 = vrot.lane.b32.xlu2 %v1217_v54, %s1320_s23  ;;  %v1219_v55 = vpop.eup %1218 }
 0x886   : > { %v1221_v58 = vpop.eup %1220 }
 0x887   : > { %v583_v59 = vadd.f32 1.0, %v1221_v58 }
 0x889   : > { %1222 = vrcp.f32 %v583_v59  ;;  %v595_v2 = vand.u32 2147483648, %v583_v59  ;;  %vm589_vm9 = vweird.f32 %v583_v59  ;;  %v593_v3 = vand.u32 2147483647, %v583_v59 }
 0x88b   : > { %v600_v56 = vld [vmem:[#allocation5] sm:$0xff]  ;;  %v596_v5 = vor.u32 1.1754944e-38, %v595_v2  ;;  %vm594_vm11 = vcmp.eq.f32.partialorder %v593_v3, 8.507059e+37 }
 0x88d   : > { %607 = vrot.lane.b32.xlu2 %v1219_v55, %s1320_s23 }
 0x88f   : > { %v1223_v9 = vpop.eup %1222 }
 0x890   : > { %v585_v60 = vmul.f32 %v1223_v9, %v583_v59  ;;  %vm590_vm8 = vweird.f32 %v1223_v9 }
 0x891   : > { %vm591_vm10 = vmor %vm589_vm9, %vm590_vm8 }
 0x892   : > { %v586_v63 = vsub.f32 1.0, %v585_v60 }
 0x894   : > { %v587_v0 = vmul.f32 %v1223_v9, %v586_v63 }
 0x895   : > { %602 = vrot.lane.b32.xlu2 %v600_v56, %s1321_s24 }
 0x896   : > { %v588_v1 = vadd.f32 %v1223_v9, %v587_v0 }
 0x898   : > { %v592_v4 = vsel %vm591_vm10, %v1223_v9, %v588_v1 }
 0x899   : > { %v597_v7 = vsel %vm594_vm11, %v596_v5, %v592_v4 }
 0x8df   : > { %v846_v61 = vpop.permute.xlu2 %845 }
 0x8e0   : > { %v848_v62 = vmul.f32 %v846_v61, %v824_v44 }
 0x8e2   : > { %855 = vrot.lane.b32.xlu0 %v848_v62, %s1321_s24 }
 0x8e7   : > { %v608_v6 = vpop.permute.xlu2 %607 }
 0x8e8   : > { %v610_v8 = vmul.f32 %v608_v6, %v597_v7 }
 0x8ea   : > { %850 = vrot.lane.b32.xlu0 %v842_v50, %s1322_s25 }
 0x8ef   : > { %v603_v13 = vpop.permute.xlu2 %602 }
 0x8f0   : > { %v605_v16 = vmul.f32 %v603_v13, %v597_v7 }
 0x8f2   : > { %612 = vrot.lane.b32.xlu0 %v610_v8, %s1321_s24 }
 0x954   : > { %v856_v10 = vpop.permute.xlu0 %855 }
 0x955   : > { %858 = vst.msk [vmem:[#allocation4 + $0x8] sm:$0xff] %vm301_vm2, %v856_v10 }
 0x95c   : > { %v851_v11 = vpop.permute.xlu0 %850  ;;  %v860_v12 = vld [vmem:[#allocation4 + $0x8] sm:$0xff] }
 0x95d   : > { %853 = vst.msk [vmem:[#allocation5 + $0x8] sm:$0xff] %vm301_vm2, %v851_v11  ;;  %1131 = vmatmul.msk.f32.vlgmr.msrb.gmra.mxu3 %vm301_vm2, %v860_v12 }
 0x964   : > { %v613_v19 = vpop.permute.xlu0 %612  ;;  %v909_v28 = vld [vmem:[#allocation5 + $0x8] sm:$0xff] }
 0x965   : > { %v615_v20 = vadd.f32 %v613_v19, %v605_v16 }
 0x967   : > { %1224 = vtanh.f32 %v615_v20 }
 0x96d   : > { %v1225_v21 = vpop.eup %1224 }
 0x96e   : > { %618 = vrot.lane.b32.xlu0 %v1225_v21, %s1320_s23 }
 0x9e0   : > { %v885_v24 = vpop.f32.mrf.mxu3  ;;  %v619_v40 = vpop.permute.xlu0 %618 }
 0x9e1   : > { %v888_v25 = vadd.f32 %v885_v24, %v683_v23  ;;  %v621_v41 = vmul.f32 %v619_v40, %v597_v7 }
 0x9e3   : > { %1226 = vtanh.f32 %v888_v25  ;;  %v1132_v29 = vmul.f32 -1.442695, %v888_v25 }
 0x9e5   : > { %1228 = vpow2.f32 %v1132_v29 }
 0x9e9   : > { %v1227_v26 = vpop.eup %1226 }
 0x9ea   : > { %916 = vrot.lane.b32.xlu1 %v1227_v26, %s1320_s23 }
 0x9eb   : > { %v1229_v30 = vpop.eup %1228 }
 0x9ec   : > { %v892_v31 = vadd.f32 1.0, %v1229_v30 }
 0x9ee   : > { %1230 = vrcp.f32 %v892_v31  ;;  %v904_v35 = vand.u32 2147483648, %v892_v31  ;;  %vm898_vm13 = vweird.f32 %v892_v31  ;;  %v902_v17 = vand.u32 2147483647, %v892_v31 }
 0x9f0   : > { %v905_v18 = vor.u32 1.1754944e-38, %v904_v35  ;;  %vm903_vm15 = vcmp.eq.f32.partialorder %v902_v17, 8.507059e+37 }
 0x9f2   : > { %911 = vrot.lane.b32.xlu1 %v909_v28, %s1321_s24 }
 0x9f4   : > { %v1231_v32 = vpop.eup %1230 }
 0x9f5   : > { %v894_v33 = vmul.f32 %v1231_v32, %v892_v31  ;;  %vm899_vm12 = vweird.f32 %v1231_v32 }
 0x9f6   : > { %vm900_vm14 = vmor %vm898_vm13, %vm899_vm12 }
 0x9f7   : > { %v895_v34 = vsub.f32 1.0, %v894_v33 }
 0x9f9   : > { %v896_v14 = vmul.f32 %v1231_v32, %v895_v34 }
 0x9fb   : > { %v897_v15 = vadd.f32 %v1231_v32, %v896_v14 }
 0x9fd   : > { %v901_v36 = vsel %vm900_vm14, %v1231_v32, %v897_v15 }
 0x9fe   : > { %v906_v38 = vsel %vm903_vm15, %v905_v18, %v901_v36 }
 0xa5c   : > { %v917_v37 = vpop.permute.xlu1 %916 }
 0xa5d   : > { %v919_v39 = vmul.f32 %v917_v37, %v906_v38 }
 0xa5f   : > { %921 = vrot.lane.b32.xlu2 %v919_v39, %s1321_s24 }
 0xa64   : > { %v912_v42 = vpop.permute.xlu1 %911 }
 0xa65   : > { %v914_v43 = vmul.f32 %v912_v42, %v906_v38 }
 0xa67   : > { %628 = vrot.lane.b32.xlu2 %v621_v41, %s1321_s24 }
 0xab9   : > { %v922_v44 = vpop.permute.xlu2 %921 }
 0xaba   : > { %v924_v45 = vadd.f32 %v922_v44, %v914_v43 }
 0xabc   : > { %1232 = vtanh.f32 %v924_v45 }
 0xac1   : > { %v629_v46 = vpop.permute.xlu2 %628 }
 0xac2   : > { %v1233_v47 = vpop.eup %1232  ;;  %631 = vst.msk [vmem:[#allocation4] sm:$0xff] %vm301_vm2, %v629_v46 }
 0xac3   : > { %633 = vst.msk [vmem:[#allocation3 + $0x18] sm:$0xff] %vm301_vm2, %v629_v46  ;;  %927 = vrot.lane.b32.xlu1 %v1233_v47, %s1320_s23 }
 0xaca   : > { %v637_v48 = vld [vmem:[#allocation3 + $0x18] sm:$0xff] }
 0xacb   : > { %1114 = vmatmul.msk.f32.gmra.mxu2 %vm301_vm2, %v637_v48  ;;  %932 = vrot.lane.b32.xlu1 %v924_v45, %s1322_s25 }
 0xb35   : > { %v928_v49 = vpop.permute.xlu1 %927 }
 0xb36   : > { %v930_v50 = vmul.f32 %v928_v49, %v906_v38 }
 0xb38   : > { %937 = vrot.lane.b32.xlu0 %v930_v50, %s1321_s24 }
 0xb3d   : > { %v933_v51 = vpop.permute.xlu1 %932 }
 0xb3e   : > { %935 = vst.msk [vmem:[#allocation5 + $0x8] sm:$0xff] %vm301_vm2, %v933_v51 }
 0xb45   : > { %v991_v52 = vld [vmem:[#allocation5 + $0x8] sm:$0xff] }
 0xb46   : > { %993 = vrot.lane.b32.xlu0 %v991_v52, %s1321_s24 }
 0xb4e   : > { %623 = vrot.lane.b32.xlu0 %v615_v20, %s1322_s25  ;;  %v685_v57 = vpop.f32.mrf.mxu2 }
 0xb4f   : > { %v686_v58 = vadd.f32 %v1469_v27, %v685_v57 }
 0xbaa   : > { %v938_v53 = vpop.permute.xlu0 %937 }
 0xbab   : > { %940 = vst.msk [vmem:[#allocation4 + $0x8] sm:$0xff] %vm301_vm2, %v938_v53 }
 0xbb2   : > { %v942_v54 = vld [vmem:[#allocation4 + $0x8] sm:$0xff] }
 0xbb3   : > { %1137 = vmatmul.msk.f32.vlgmr.msrb.gmra.mxu1 %vm301_vm2, %v942_v54 }
 0xbb8   : > { %v994_v55 = vpop.permute.xlu0 %993 }
 0xbc0   : > { %v624_v56 = vpop.permute.xlu0 %623 }
 0xbc1   : > { %626 = vst.msk [vmem:[#allocation5] sm:$0xff] %vm301_vm2, %v624_v56 }
 0xc30   : > { %v967_v59 = vpop.f32.mrf.mxu1 }
 0xc31   : > { %v970_v9 = vadd.f32 %v967_v59, %v686_v58 }
 0xc33   : > { %1234 = vtanh.f32 %v970_v9  ;;  %v1138_v61 = vmul.f32 -1.442695, %v970_v9 }
 0xc35   : > { %1236 = vpow2.f32 %v1138_v61 }
 0xc39   : > { %v1235_v60 = vpop.eup %1234 }
 0xc3a   : > { %998 = vrot.lane.b32.xlu2 %v1235_v60, %s1320_s23 }
 0xc3b   : > { %v1237_v62 = vpop.eup %1236 }
 0xc3c   : > { %v974_v63 = vadd.f32 1.0, %v1237_v62 }
 0xc3e   : > { %1238 = vrcp.f32 %v974_v63  ;;  %v986_v5 = vand.u32 2147483648, %v974_v63  ;;  %vm980_vm3 = vweird.f32 %v974_v63  ;;  %v984_v27 = vand.u32 2147483647, %v974_v63 }
 0xc40   : > { %v987_v7 = vor.u32 1.1754944e-38, %v986_v5  ;;  %vm985_vm1 = vcmp.eq.f32.partialorder %v984_v27, 8.507059e+37 }
 0xc44   : > { %v1239_v0 = vpop.eup %1238 }
 0xc45   : > { %v976_v1 = vmul.f32 %v1239_v0, %v974_v63  ;;  %vm981_vm0 = vweird.f32 %v1239_v0 }
 0xc46   : > { %vm982_vm4 = vmor %vm980_vm3, %vm981_vm0 }
 0xc47   : > { %v977_v2 = vsub.f32 1.0, %v976_v1 }
 0xc49   : > { %v978_v3 = vmul.f32 %v1239_v0, %v977_v2 }
 0xc4b   : > { %v979_v4 = vadd.f32 %v1239_v0, %v978_v3 }
 0xc4d   : > { %v983_v6 = vsel %vm982_vm4, %v1239_v0, %v979_v4 }
 0xc4e   : > { %v988_v10 = vsel %vm985_vm1, %v987_v7, %v983_v6 }
 0xc4f   : > { %v996_v12 = vmul.f32 %v994_v55, %v988_v10 }
 0xc94   : > { %v999_v8 = vpop.permute.xlu2 %998 }
 0xc95   : > { %v1001_v11 = vmul.f32 %v999_v8, %v988_v10 }
 0xc97   : > { %1003 = vrot.lane.b32.xlu1 %v1001_v11, %s1321_s24 }
 0xd09   : > { %v1004_v13 = vpop.permute.xlu1 %1003 }
 0xd0a   : > { %v1006_v16 = vadd.f32 %v1004_v13, %v996_v12 }
 0xd0c   : > { %1240 = vtanh.f32 %v1006_v16  ;;  %1014 = vrot.lane.b32.xlu1 %v1006_v16, %s1322_s25 }
 0xd12   : > { %v1241_v19 = vpop.eup %1240 }
 0xd13   : > { %1009 = vrot.lane.b32.xlu2 %v1241_v19, %s1320_s23 }
 0xd6d   : > { %v1010_v20 = vpop.permute.xlu2 %1009 }
 0xd6e   : > { %v1012_v21 = vmul.f32 %v1010_v20, %v988_v10 }
 0xd70   : > { %1019 = vrot.lane.b32.xlu2 %v1012_v21, %s1321_s24 }
 0xd7e   : > { %v1015_v22 = vpop.permute.xlu1 %1014 }
 0xd7f   : > { %1017 = vst.msk [vmem:[#allocation5 + $0x8] sm:$0xff] %vm301_vm2, %v1015_v22 }
 0xdc7   : > { %1026 = sbr.rel (%p1139_p8) target bundleno = 3540 (0xdd4), region = 52 }
 0xdca   : > { %v1020_v23 = vpop.permute.xlu2 %1019 }
 0xdcb   : > { %1022 = vst.msk [vmem:[#allocation4 + $0x8] sm:$0xff] %vm301_vm2, %v1020_v23 }
 0xdd2   : > { %v1027_v24 = vld [vmem:[#allocation4 + $0x8] sm:$0xff] }
 0xdd3   : > { %1028 = vst.msk [vmem:[#allocation9] sm:$0xff] %vm301_vm2, %v1027_v24 }
 0xdd4 PF: > { %p1158_p9 = scmp.eq.s32.totalorder %s1363_s22, 1  ;;  %s1323_s6 = smov [#allocation9]  }
 0xdd5   : > { %s1035_s12 = sshll.u32 %s1323_s6, 4  ;;  %s1037_s15 = sshll.u32 %s1551_s5, 4  ;;  %s1036_s12 = int_to_ptr.vmem [resolvable:$true] %s1035_s12  ;;  %s1038_s15 = int_to_ptr.hbm [resolvable:$true] %s1037_s15 }
 0xdd6   : > { %1149 = dma.vmem_to_hbm [thread:$0]  (%p1158_p9), %s1036_s12, 128, %s1038_s15, [#allocation8]  }
 0xdd7   : > { %1309 = dma.done.wait (%p1158_p9), [#allocation8], 128  }
 0xdd8   : > { %1311 = vsyncadd (%p1158_p9), [#allocation8], 4294967168 }
 0xdd9 PF: > { %s17_s18 = sadd.s32 1, %s1314_s18  }
 0xdda   : > { %p14_p10 = scmp.ge.s32.totalorder %s17_s18, 4  }
 0xddc   :  { %16 = sbr.rel (!%p14_p10) target bundleno = 2 (0x2), region = 90 }
 0xde1   :  { %1051 = vsyncpa [#allocation7], 1 }
 0xde2   :  { %1053 = vsyncpa [#allocation7 + $0x1], 1 }
 0xde3   :  { %1054 = vsyncpa [#allocation8], 1 }
 0xde4   :  { %1056 = vsyncpa [#allocation8 + $0x1], 1 }

// kernel: tpu_custom_call.1
= control target key start
LH: loop header
LB: loop body
LE: loop exit
PB: predicated region body
PF: predicated region fallthrough
CT: control target
= control target key end

     0   :  { %10 = vsyncpa [#allocation7], 0  ;;  %s1546_s0 = inlined_call_operand.vmem [shape: f32[64,16], index: 0, kind: input, shape index: {}]   ;;  %s1547_s1 = inlined_call_operand.vmem [shape: f32[16,128], index: 1, kind: input, shape index: {}]   ;;  %s1548_s2 = inlined_call_operand.hbm [shape: f32[1,32,128], index: 2, kind: input, shape index: {}]   ;;  %s1549_s3 = inlined_call_operand.vmem [shape: f32[2,32,128], index: 3, kind: input, shape index: {}]   ;;  %s1550_s4 = inlined_call_operand.vmem [shape: f32[2,1,128], index: 4, kind: input, shape index: {}]   ;;  %s1551_s5 = inlined_call_operand.hbm [shape: f32[8,32], index: 5, kind: output, shape index: {}]  }
   0x1   :  { %11 = vsyncpa [#allocation8], 0  ;;  %s1354_s18 = smov 0  }
   0x2 LB: > { %s167_s21 = sshll.u32 %s1548_s2, 4  ;;  %s1363_s22 = sadd.s32 4294967295, %s1314_s18   ;;  %s1314_s18 = sphi %s1354_s18, %s17_s18   ;;  %s168_s21 = int_to_ptr.hbm [resolvable:$true] %s167_s21 }
   0x3   : > { %p1090_p0 = scmp.ge.s32.totalorder %s1314_s18, 1  ;;  %p153_p1 = scmp.lt.s32.totalorder %s1314_s18, 3 }
   0x4   : > { %p1091_p2 = scmp.ne.s32.totalorder %s1363_s22, 0  ;;  %p1156_p3 = scmp.eq.s32.totalorder %s1363_s22, 0 }
   0x5   : > { %p154_p4 = pnand %p1090_p0, %p153_p1  ;;  %s1316_s23 = smov [#allocation6]  }
   0x6   : > { %s169_s24 = sshll.u32 %s1316_s23, 4  ;;  %s1317_s25 = smov 128   ;;  %s170_s24 = int_to_ptr.vmem [resolvable:$true] %s169_s24 }
   0x7   : > { %p1152_p5 = pneg %p154_p4  ;;  %s1318_s26 = smov 8  }
   0x8   : > { %200 = sbr.rel (%p154_p4) target bundleno = 3545 (0xdd9), region = 40 }
   0x9   : > { %p1153_p6 = pnand %p1156_p3, %p1152_p5 }
   0xb   : > { %1155 = dma.hbm_to_vmem [thread:$0]  (!%p1153_p6), %s168_s21, 512, %s170_s24, [#allocation7], %s1317_s25, %s1317_s25, %s1318_s26  }
   0xd   : > { %1305 = dma.done.wait (%p1156_p3), [#allocation7], 512  }
   0xe   : > { %1307 = vsyncadd (%p1156_p3), [#allocation7], 4294966784  ;;  %s1095_s27 = sshll.u32 %s1363_s22, 2 }
   0xf   : > { %p225_p7 = scmp.lt.s32.totalorder %s1095_s27, 7  ;;  %233 = sbr.rel (%p1091_p2) target bundleno = 25 (0x19), region = 48 }
  0x11   : > { %s1553_s27 = smov (!%p225_p7, %s1095_s27), 7 }
  0x12   : > { %s1096_s28 = sshll.u32 %s1553_s27, 3 }
  0x13   : > { %s1373_s6 = scalar_lea.vmem %s1546_s0, %s1096_s28 }
  0x14   : > { %vm234_vm0 = vcmask 261120   ;;  %v1319_v0 = vmov 0.0  }
  0x15   : > { %235 = vst.msk [vmem:[#allocation4] sm:$0xff] %vm234_vm0, %v1319_v0 }
  0x16   : > { %236 = vst.msk [vmem:[#allocation4 + $0x8] sm:$0xff] %vm234_vm0, %v1319_v0 }
  0x17   : > { %237 = vst.msk [vmem:[#allocation5] sm:$0xff] %vm234_vm0, %v1319_v0 }
  0x18   : > { %238 = vst.msk [vmem:[#allocation5 + $0x8] sm:$0xff] %vm234_vm0, %v1319_v0 }
  0x19 PF: > { %v300_v1 = vld [vmem:[%s1549_s3 + $0x18] sm:$0xff]  ;;  %v244_v2 = vld [vmem:[%s1547_s1 + $0x8] sm:$0xff]  ;;  %v299_v3 = vld [vmem:[%s1549_s3 + $0x10] sm:$0xff]  ;;  %vm249_vm1 = vcmask 130048   ;;  %vm301_vm2 = vcmask 261120   ;;  %s1320_s23 = smov 64  }
  0x1a   : > { %317 = vmatpush.msra.mxu1 %v300_v1  ;;  %276 = vmatpush.msra.mxu0 %v244_v2  ;;  %v243_v4 = vld [vmem:[%s1547_s1] sm:$0xff]  ;;  %v298_v6 = vld [vmem:[%s1549_s3 + $0x8] sm:$0xff]  ;;  %s1321_s24 = smov 32   ;;  %s1322_s25 = smov 96   ;;  %v641_v38 = vld [vmem:[#allocation6 + $0x18] sm:$0xff] }
  0x1b   : > { %v239_v5 = vld [vmem:[%s1373_s6] sm:$0xff]  ;;  %401 = vmatpush.msra.mxu3 %v300_v1  ;;  %v640_v39 = vld [vmem:[#allocation6 + $0x10] sm:$0xff]  ;;  %671 = vmatpush.msra.mxu2 %v641_v38  ;;  %v639_v40 = vld [vmem:[#allocation6 + $0x8] sm:$0xff]  ;;  %p1139_p8 = scmp.ne.s32.totalorder %s1363_s22, 1 }
  0x1c   : > { %318 = vmatpush.msra.mxu1 %v299_v3  ;;  %277 = vmatpush.msra.mxu0 %v243_v4  ;;  %v297_v7 = vld [vmem:[%s1549_s3] sm:$0xff]  ;;  %v240_v42 = vld [vmem:[%s1373_s6 + $0x8] sm:$0xff] }
  0x1d   : > { %1098 = vmatmul.msk.f32.vlgmr.msra.gmra.mxu0 %vm249_vm1, %v239_v5  ;;  %402 = vmatpush.msra.mxu3 %v299_v3  ;;  %v296_v8 = vld [vmem:[#allocation4] sm:$0xff] }
  0x1e   : > { %319 = vmatpush.msra.mxu1 %v298_v6  ;;  %v1401_v9 = vld [vmem:[%s1550_s4] ss:$0 sm:$0xff]  ;;  %v346_v15 = vld [vmem:[#allocation5] sm:$0xff]  ;;  %672 = vmatpush.msra.mxu2 %v640_v39 }
  0x1f   : > { %403 = vmatpush.msra.mxu3 %v298_v6  ;;  %v638_v41 = vld [vmem:[#allocation6] sm:$0xff] }
  0x20   : > { %320 = vmatpush.msra.mxu1 %v297_v7  ;;  %673 = vmatpush.msra.mxu2 %v639_v40 }
  0x21   : > { %1102 = vmatmul.msk.f32.vlgmr.msra.gmra.mxu1 %vm301_vm2, %v296_v8  ;;  %404 = vmatpush.msra.mxu3 %v297_v7 }
  0x22   : > { %571 = vmatpush.msrb.mxu1 %v300_v1  ;;  %674 = vmatpush.msra.mxu2 %v638_v41 }
  0x23   : > { %486 = vmatpush.msrb.mxu3 %v300_v1 }
  0x24   : > { %572 = vmatpush.msrb.mxu1 %v299_v3 }
  0x25   : > { %487 = vmatpush.msrb.mxu3 %v299_v3  ;;  %1099 = vmatmul.msk.f32.gmra.mxu0 %vm249_vm1, %v240_v42 }
  0x26   : > { %573 = vmatpush.msrb.mxu1 %v298_v6 }
  0x27   : > { %488 = vmatpush.msrb.mxu3 %v298_v6 }
  0x28   : > { %574 = vmatpush.msrb.mxu1 %v297_v7 }
  0x29   : > { %489 = vmatpush.msrb.mxu3 %v297_v7 }
  0x9a   : > { %v279_v10 = vpop.f32.mrf.mxu0 }
  0x9b   : > { %v280_v11 = vadd.f32 %v1401_v9, %v279_v10 }
  0x9e   : > { %v322_v12 = vpop.f32.mrf.mxu1 }
  0x9f   : > { %v325_v13 = vadd.f32 %v322_v12, %v280_v11 }
  0xa1   : > { %1178 = vtanh.f32 %v325_v13  ;;  %v1103_v16 = vmul.f32 -1.442695, %v325_v13 }
  0xa2   : > { %v282_v48 = vpop.f32.mrf.mxu0 }
  0xa3   : > { %1180 = vpow2.f32 %v1103_v16  ;;  %v283_v49 = vadd.f32 %v1401_v9, %v282_v48  ;;  %v241_v16 = vld [vmem:[%s1373_s6 + $0x10] sm:$0xff] }
  0xa4   : > { %1100 = vmatmul.msk.f32.gmra.mxu0 %vm249_vm1, %v241_v16 }
  0xa7   : > { %v1179_v14 = vpop.eup %1178 }
  0xa8   : > { %353 = vrot.lane.b32.xlu0 %v1179_v14, %s1320_s23  ;;  %v1429_v14 = vld [vmem:[%s1549_s3 + $0x38] sm:$0xff] }
  0xa9   : > { %v1181_v17 = vpop.eup %1180  ;;  %798 = vmatpush.msra.mxu1 %v1429_v14 }
  0xaa   : > { %v329_v18 = vadd.f32 1.0, %v1181_v17  ;;  %v1442_v17 = vld [vmem:[%s1549_s3 + $0x28] sm:$0xff] }
  0xac   : > { %1182 = vrcp.f32 %v329_v18  ;;  %v341_v24 = vand.u32 2147483648, %v329_v18  ;;  %vm335_vm4 = vweird.f32 %v329_v18  ;;  %v339_v25 = vand.u32 2147483647, %v329_v18 }
  0xae   : > { %v342_v27 = vor.u32 1.1754944e-38, %v341_v24  ;;  %vm340_vm6 = vcmp.eq.f32.partialorder %v339_v25, 8.507059e+37 }
  0xb0   : > { %348 = vrot.lane.b32.xlu0 %v346_v15, %s1321_s24  ;;  %v1434_v15 = vld [vmem:[%s1549_s3 + $0x30] sm:$0xff] }
  0xb1   : > { %799 = vmatpush.msra.mxu1 %v1434_v15 }
  0xb2   : > { %v1183_v19 = vpop.eup %1182 }
  0xb3   : > { %v331_v20 = vmul.f32 %v1183_v19, %v329_v18  ;;  %vm336_vm3 = vweird.f32 %v1183_v19  ;;  %v1449_v18 = vld [vmem:[%s1549_s3 + $0x20] sm:$0xff]  ;;  %800 = vmatpush.msra.mxu1 %v1442_v17 }
  0xb4   : > { %vm337_vm5 = vmor %vm335_vm4, %vm336_vm3 }
  0xb5   : > { %v332_v21 = vsub.f32 1.0, %v331_v20  ;;  %801 = vmatpush.msra.mxu1 %v1449_v18 }
  0xb7   : > { %v333_v22 = vmul.f32 %v1183_v19, %v332_v21 }
  0xb9   : > { %v334_v23 = vadd.f32 %v1183_v19, %v333_v22  ;;  %v694_v22 = vld [vmem:[#allocation4 + $0x8] sm:$0xff] }
  0xbb   : > { %v338_v26 = vsel %vm337_vm5, %v1183_v19, %v334_v23 }
  0xbc   : > { %v343_v29 = vsel %vm340_vm6, %v342_v27, %v338_v26  ;;  %v1469_v27 = vld [vmem:[%s1550_s4 + $0x1] ss:$0 sm:$0xff] }
 0x11a   : > { %v354_v28 = vpop.permute.xlu0 %353 }
 0x11b   : > { %v356_v30 = vmul.f32 %v354_v28, %v343_v29 }
 0x11d   : > { %358 = vrot.lane.b32.xlu1 %v356_v30, %s1321_s24 }
 0x121   : > { %v285_v23 = vpop.f32.mrf.mxu0 }
 0x122   : > { %v349_v31 = vpop.permute.xlu0 %348  ;;  %v286_v24 = vadd.f32 %v1401_v9, %v285_v23 }
 0x123   : > { %v351_v32 = vmul.f32 %v349_v31, %v343_v29 }
 0x18f   : > { %v359_v33 = vpop.permute.xlu1 %358 }
 0x190   : > { %v361_v34 = vadd.f32 %v359_v33, %v351_v32 }
 0x192   : > { %1184 = vtanh.f32 %v361_v34 }
 0x198   : > { %v1185_v35 = vpop.eup %1184 }
 0x199   : > { %364 = vrot.lane.b32.xlu1 %v1185_v35, %s1320_s23 }
 0x20b   : > { %v365_v36 = vpop.permute.xlu1 %364 }
 0x20c   : > { %v367_v37 = vmul.f32 %v365_v36, %v343_v29 }
 0x20e   : > { %374 = vrot.lane.b32.xlu2 %v367_v37, %s1321_s24 }
 0x216   : > { %369 = vrot.lane.b32.xlu2 %v361_v34, %s1322_s25  ;;  %v745_v34 = vld [vmem:[#allocation5 + $0x8] sm:$0xff] }
 0x268   : > { %v375_v43 = vpop.permute.xlu2 %374 }
 0x269   : > { %377 = vst.msk [vmem:[#allocation4] sm:$0xff] %vm301_vm2, %v375_v43 }
 0x26a   : > { %378 = vst.msk [vmem:[#allocation3] sm:$0xff] %vm301_vm2, %v375_v43 }
 0x270   : > { %v370_v44 = vpop.permute.xlu2 %369  ;;  %v381_v45 = vld [vmem:[#allocation4] sm:$0xff] }
 0x271   : > { %372 = vst.msk [vmem:[#allocation5] sm:$0xff] %vm301_vm2, %v370_v44  ;;  %1104 = vmatmul.msk.f32.vlgmr.msra.gmra.mxu3 %vm301_vm2, %v381_v45  ;;  %v634_v46 = vld [vmem:[#allocation3] sm:$0xff] }
 0x272   : > { %1111 = vmatmul.msk.f32.vlgmr.msra.gmra.mxu2 %vm301_vm2, %v634_v46  ;;  %715 = vmatpush.msra.mxu3 %v1429_v14 }
 0x274   : > { %716 = vmatpush.msra.mxu3 %v1434_v15 }
 0x276   : > { %717 = vmatpush.msra.mxu3 %v1442_v17 }
 0x278   : > { %v430_v47 = vld [vmem:[#allocation5] sm:$0xff]  ;;  %718 = vmatpush.msra.mxu3 %v1449_v18 }
 0x279   : > { %432 = vrot.lane.b32.xlu1 %v430_v47, %s1321_s24 }
 0x2eb   : > { %v433_v4 = vpop.permute.xlu1 %432 }
 0x2f4   : > { %v406_v50 = vpop.f32.mrf.mxu3 }
 0x2f5   : > { %v409_v51 = vadd.f32 %v406_v50, %v283_v49  ;;  %v676_v28 = vpop.f32.mrf.mxu2 }
 0x2f6   : > { %v677_v29 = vadd.f32 %v1469_v27, %v676_v28 }
 0x2f7   : > { %1186 = vtanh.f32 %v409_v51  ;;  %v1105_v53 = vmul.f32 -1.442695, %v409_v51 }
 0x2f9   : > { %1188 = vpow2.f32 %v1105_v53 }
 0x2fd   : > { %v1187_v52 = vpop.eup %1186 }
 0x2fe   : > { %437 = vrot.lane.b32.xlu0 %v1187_v52, %s1320_s23 }
 0x2ff   : > { %v1189_v54 = vpop.eup %1188 }
 0x300   : > { %v413_v55 = vadd.f32 1.0, %v1189_v54 }
 0x302   : > { %1190 = vrcp.f32 %v413_v55  ;;  %v425_v61 = vand.u32 2147483648, %v413_v55  ;;  %vm419_vm8 = vweird.f32 %v413_v55  ;;  %v423_v62 = vand.u32 2147483647, %v413_v55 }
 0x304   : > { %v426_v0 = vor.u32 1.1754944e-38, %v425_v61  ;;  %vm424_vm10 = vcmp.eq.f32.partialorder %v423_v62, 8.507059e+37 }
 0x308   : > { %v1191_v56 = vpop.eup %1190 }
 0x309   : > { %v415_v57 = vmul.f32 %v1191_v56, %v413_v55  ;;  %vm420_vm7 = vweird.f32 %v1191_v56 }
 0x30a   : > { %vm421_vm9 = vmor %vm419_vm8, %vm420_vm7 }
 0x30b   : > { %v416_v58 = vsub.f32 1.0, %v415_v57 }
 0x30d   : > { %v417_v59 = vmul.f32 %v1191_v56, %v416_v58 }
 0x30f   : > { %v418_v60 = vadd.f32 %v1191_v56, %v417_v59 }
 0x311   : > { %v422_v63 = vsel %vm421_vm9, %v1191_v56, %v418_v60 }
 0x312   : > { %v427_v2 = vsel %vm424_vm10, %v426_v0, %v422_v63 }
 0x313   : > { %v435_v5 = vmul.f32 %v433_v4, %v427_v2 }
 0x370   : > { %v438_v1 = vpop.permute.xlu0 %437 }
 0x371   : > { %v440_v3 = vmul.f32 %v438_v1, %v427_v2 }
 0x373   : > { %442 = vrot.lane.b32.xlu2 %v440_v3, %s1321_s24 }
 0x3cd   : > { %v443_v6 = vpop.permute.xlu2 %442 }
 0x3ce   : > { %v445_v7 = vadd.f32 %v443_v6, %v435_v5 }
 0x3d0   : > { %1192 = vtanh.f32 %v445_v7  ;;  %453 = vrot.lane.b32.xlu2 %v445_v7, %s1322_s25 }
 0x3d6   : > { %v1193_v8 = vpop.eup %1192 }
 0x3d7   : > { %448 = vrot.lane.b32.xlu0 %v1193_v8, %s1320_s23 }
 0x42a   : > { %v454_v10 = vpop.permute.xlu2 %453 }
 0x42b   : > { %456 = vst.msk [vmem:[#allocation5] sm:$0xff] %vm301_vm2, %v454_v10 }
 0x432   : > { %v515_v11 = vld [vmem:[#allocation5] sm:$0xff] }
 0x433   : > { %517 = vrot.lane.b32.xlu2 %v515_v11, %s1321_s24 }
 0x449   : > { %v449_v12 = vpop.permute.xlu0 %448 }
 0x44a   : > { %v451_v13 = vmul.f32 %v449_v12, %v427_v2 }
 0x44c   : > { %458 = vrot.lane.b32.xlu1 %v451_v13, %s1321_s24 }
 0x48d   : > { %v518_v1 = vpop.permute.xlu2 %517 }
 0x4be   : > { %v459_v19 = vpop.permute.xlu1 %458 }
 0x4bf   : > { %461 = vst.msk [vmem:[#allocation4] sm:$0xff] %vm301_vm2, %v459_v19 }
 0x4c0   : > { %463 = vst.msk [vmem:[#allocation3 + $0x8] sm:$0xff] %vm301_vm2, %v459_v19 }
 0x4c6   : > { %v466_v20 = vld [vmem:[#allocation4] sm:$0xff] }
 0x4c7   : > { %1106 = vmatmul.msk.f32.vlgmr.msrb.gmra.mxu3 %vm301_vm2, %v466_v20  ;;  %v635_v21 = vld [vmem:[#allocation3 + $0x8] sm:$0xff] }
 0x4c8   : > { %1112 = vmatmul.msk.f32.gmra.mxu2 %vm301_vm2, %v635_v21  ;;  %880 = vmatpush.msrb.mxu3 %v1429_v14 }
 0x4ca   : > { %881 = vmatpush.msrb.mxu3 %v1434_v15 }
 0x4cc   : > { %882 = vmatpush.msrb.mxu3 %v1442_v17 }
 0x4ce   : > { %883 = vmatpush.msrb.mxu3 %v1449_v18 }
 0x4cf   : > { %1119 = vmatmul.msk.f32.vlgmr.msra.gmra.mxu3 %vm301_vm2, %v694_v22  ;;  %v242_v22 = vld [vmem:[%s1373_s6 + $0x18] sm:$0xff] }
 0x4d0   : > { %1101 = vmatmul.msk.f32.gmra.mxu0 %vm249_vm1, %v242_v22 }
 0x54a   : > { %v491_v25 = vpop.f32.mrf.mxu3 }
 0x54b   : > { %v494_v26 = vadd.f32 %v491_v25, %v286_v24 }
 0x54d   : > { %1194 = vtanh.f32 %v494_v26  ;;  %v1107_v35 = vmul.f32 -1.442695, %v494_v26 }
 0x552   : > { %v720_v30 = vpop.f32.mrf.mxu3 }
 0x553   : > { %v1195_v31 = vpop.eup %1194  ;;  %v723_v32 = vadd.f32 %v720_v30, %v677_v29  ;;  %v679_v30 = vpop.f32.mrf.mxu2 }
 0x554   : > { %522 = vrot.lane.b32.xlu0 %v1195_v31, %s1320_s23  ;;  %v680_v31 = vadd.f32 %v1469_v27, %v679_v30 }
 0x555   : > { %1196 = vtanh.f32 %v723_v32  ;;  %v1120_v36 = vmul.f32 -1.442695, %v723_v32 }
 0x556   : > { %1198 = vpow2.f32 %v1107_v35 }
 0x557   : > { %1200 = vpow2.f32 %v1120_v36 }
 0x55b   : > { %v1197_v33 = vpop.eup %1196 }
 0x55c   : > { %752 = vrot.lane.b32.xlu1 %v1197_v33, %s1320_s23  ;;  %v1199_v37 = vpop.eup %1198 }
 0x55d   : > { %v498_v38 = vadd.f32 1.0, %v1199_v37  ;;  %v1201_v39 = vpop.eup %1200 }
 0x55e   : > { %v727_v40 = vadd.f32 1.0, %v1201_v39 }
 0x55f   : > { %1202 = vrcp.f32 %v498_v38  ;;  %v510_v49 = vand.u32 2147483648, %v498_v38  ;;  %vm504_vm12 = vweird.f32 %v498_v38  ;;  %v508_v50 = vand.u32 2147483647, %v498_v38 }
 0x560   : > { %1204 = vrcp.f32 %v727_v40  ;;  %v739_v58 = vand.u32 2147483648, %v727_v40  ;;  %vm733_vm0 = vweird.f32 %v727_v40  ;;  %v737_v59 = vand.u32 2147483647, %v727_v40 }
 0x561   : > { %v511_v53 = vor.u32 1.1754944e-38, %v510_v49  ;;  %vm509_vm14 = vcmp.eq.f32.partialorder %v508_v50, 8.507059e+37 }
 0x562   : > { %v740_v61 = vor.u32 1.1754944e-38, %v739_v58  ;;  %vm738_vm4 = vcmp.eq.f32.partialorder %v737_v59, 8.507059e+37 }
 0x564   : > { %747 = vrot.lane.b32.xlu1 %v745_v34, %s1321_s24 }
 0x565   : > { %v1203_v41 = vpop.eup %1202 }
 0x566   : > { %v500_v42 = vmul.f32 %v1203_v41, %v498_v38  ;;  %v1205_v44 = vpop.eup %1204  ;;  %vm505_vm11 = vweird.f32 %v1203_v41 }
 0x567   : > { %v729_v46 = vmul.f32 %v1205_v44, %v727_v40  ;;  %vm506_vm13 = vmor %vm504_vm12, %vm505_vm11  ;;  %vm734_vm15 = vweird.f32 %v1205_v44 }
 0x568   : > { %v501_v43 = vsub.f32 1.0, %v500_v42  ;;  %vm735_vm3 = vmor %vm733_vm0, %vm734_vm15 }
 0x569   : > { %v730_v48 = vsub.f32 1.0, %v729_v46 }
 0x56a   : > { %v502_v45 = vmul.f32 %v1203_v41, %v501_v43 }
 0x56b   : > { %v731_v52 = vmul.f32 %v1205_v44, %v730_v48  ;;  %v288_v48 = vpop.f32.mrf.mxu0 }
 0x56c   : > { %v503_v47 = vadd.f32 %v1203_v41, %v502_v45 }
 0x56d   : > { %v732_v57 = vadd.f32 %v1205_v44, %v731_v52 }
 0x56e   : > { %v507_v51 = vsel %vm506_vm13, %v1203_v41, %v503_v47 }
 0x56f   : > { %v512_v55 = vsel %vm509_vm14, %v511_v53, %v507_v51  ;;  %v736_v60 = vsel %vm735_vm3, %v1205_v44, %v732_v57  ;;  %v289_v51 = vadd.f32 %v1401_v9, %v288_v48 }
 0x570   : > { %v741_v63 = vsel %vm738_vm4, %v740_v61, %v736_v60  ;;  %v520_v7 = vmul.f32 %v518_v1, %v512_v55 }
 0x5c6   : > { %v523_v54 = vpop.permute.xlu0 %522 }
 0x5c7   : > { %v525_v56 = vmul.f32 %v523_v54, %v512_v55 }
 0x5c9   : > { %527 = vrot.lane.b32.xlu0 %v525_v56, %s1321_s24 }
 0x5ce   : > { %v753_v62 = vpop.permute.xlu1 %752 }
 0x5cf   : > { %v755_v0 = vmul.f32 %v753_v62, %v741_v63 }
 0x5d1   : > { %757 = vrot.lane.b32.xlu2 %v755_v0, %s1321_s24 }
 0x5d6   : > { %v748_v2 = vpop.permute.xlu1 %747 }
 0x5d7   : > { %v750_v3 = vmul.f32 %v748_v2, %v741_v63 }
 0x62b   : > { %v758_v4 = vpop.permute.xlu2 %757 }
 0x62c   : > { %v760_v5 = vadd.f32 %v758_v4, %v750_v3 }
 0x62e   : > { %1206 = vtanh.f32 %v760_v5 }
 0x634   : > { %v1207_v6 = vpop.eup %1206 }
 0x635   : > { %763 = vrot.lane.b32.xlu1 %v1207_v6, %s1320_s23 }
 0x63b   : > { %v528_v8 = vpop.permute.xlu0 %527 }
 0x63c   : > { %v530_v10 = vadd.f32 %v528_v8, %v520_v7 }
 0x63d   : > { %768 = vrot.lane.b32.xlu1 %v760_v5, %s1322_s25 }
 0x63e   : > { %1208 = vtanh.f32 %v530_v10 }
 0x644   : > { %v1209_v11 = vpop.eup %1208 }
 0x645   : > { %533 = vrot.lane.b32.xlu0 %v1209_v11, %s1320_s23 }
 0x6a7   : > { %v764_v12 = vpop.permute.xlu1 %763 }
 0x6a8   : > { %v766_v13 = vmul.f32 %v764_v12, %v741_v63 }
 0x6aa   : > { %773 = vrot.lane.b32.xlu0 %v766_v13, %s1321_s24 }
 0x6af   : > { %v769_v16 = vpop.permute.xlu1 %768 }
 0x6b0   : > { %771 = vst.msk [vmem:[#allocation5 + $0x8] sm:$0xff] %vm301_vm2, %v769_v16 }
 0x6b7   : > { %v534_v19 = vpop.permute.xlu0 %533  ;;  %v827_v20 = vld [vmem:[#allocation5 + $0x8] sm:$0xff] }
 0x6b8   : > { %v536_v21 = vmul.f32 %v534_v19, %v512_v55  ;;  %829 = vrot.lane.b32.xlu0 %v827_v20, %s1321_s24 }
 0x6ba   : > { %543 = vrot.lane.b32.xlu2 %v536_v21, %s1321_s24 }
 0x714   : > { %v544_v23 = vpop.permute.xlu2 %543 }
 0x715   : > { %546 = vst.msk [vmem:[#allocation4] sm:$0xff] %vm301_vm2, %v544_v23 }
 0x716   : > { %548 = vst.msk [vmem:[#allocation3 + $0x10] sm:$0xff] %vm301_vm2, %v544_v23 }
 0x71c   : > { %v774_v24 = vpop.permute.xlu0 %773  ;;  %v551_v25 = vld [vmem:[#allocation4] sm:$0xff] }
 0x71d   : > { %776 = vst.msk [vmem:[#allocation4 + $0x8] sm:$0xff] %vm301_vm2, %v774_v24  ;;  %1108 = vmatmul.msk.f32.vlgmr.msrb.gmra.mxu1 %vm301_vm2, %v551_v25  ;;  %v636_v26 = vld [vmem:[#allocation3 + $0x10] sm:$0xff] }
 0x71e   : > { %1113 = vmatmul.msk.f32.gmra.mxu2 %vm301_vm2, %v636_v26  ;;  %962 = vmatpush.msrb.mxu1 %v1429_v14 }
 0x720   : > { %963 = vmatpush.msrb.mxu1 %v1434_v15 }
 0x722   : > { %964 = vmatpush.msrb.mxu1 %v1442_v17 }
 0x724   : > { %v778_v28 = vld [vmem:[#allocation4 + $0x8] sm:$0xff]  ;;  %965 = vmatpush.msrb.mxu1 %v1449_v18 }
 0x725   : > { %1125 = vmatmul.msk.f32.vlgmr.msra.gmra.mxu1 %vm301_vm2, %v778_v28 }
 0x72a   : > { %v830_v46 = vpop.permute.xlu0 %829 }
 0x79a   : > { %v576_v29 = vpop.f32.mrf.mxu1 }
 0x79b   : > { %v579_v52 = vadd.f32 %v576_v29, %v289_v51 }
 0x79d   : > { %v1109_v57 = vmul.f32 -1.442695, %v579_v52 }
 0x7a1   : > { %v682_v22 = vpop.f32.mrf.mxu2 }
 0x7a2   : > { %v803_v32 = vpop.f32.mrf.mxu1  ;;  %v683_v23 = vadd.f32 %v1469_v27, %v682_v22 }
 0x7a3   : > { %v806_v33 = vadd.f32 %v803_v32, %v680_v31 }
 0x7a5   : > { %1210 = vtanh.f32 %v806_v33  ;;  %v1126_v14 = vmul.f32 -1.442695, %v806_v33 }
 0x7a7   : > { %1212 = vpow2.f32 %v1126_v14 }
 0x7ab   : > { %v1211_v34 = vpop.eup %1210 }
 0x7ac   : > { %834 = vrot.lane.b32.xlu2 %v1211_v34, %s1320_s23 }
 0x7ad   : > { %v1213_v15 = vpop.eup %1212 }
 0x7ae   : > { %v810_v35 = vadd.f32 1.0, %v1213_v15 }
 0x7b0   : > { %1214 = vrcp.f32 %v810_v35  ;;  %v822_v39 = vand.u32 2147483648, %v810_v35  ;;  %vm816_vm5 = vweird.f32 %v810_v35  ;;  %v820_v40 = vand.u32 2147483647, %v810_v35 }
 0x7b2   : > { %v823_v42 = vor.u32 1.1754944e-38, %v822_v39  ;;  %vm821_vm7 = vcmp.eq.f32.partialorder %v820_v40, 8.507059e+37 }
 0x7b6   : > { %v1215_v17 = vpop.eup %1214 }
 0x7b7   : > { %v812_v36 = vmul.f32 %v1215_v17, %v810_v35  ;;  %vm817_vm1 = vweird.f32 %v1215_v17 }
 0x7b8   : > { %vm818_vm6 = vmor %vm816_vm5, %vm817_vm1 }
 0x7b9   : > { %v813_v18 = vsub.f32 1.0, %v812_v36 }
 0x7bb   : > { %v814_v37 = vmul.f32 %v1215_v17, %v813_v18 }
 0x7bd   : > { %v815_v38 = vadd.f32 %v1215_v17, %v814_v37 }
 0x7bf   : > { %v819_v41 = vsel %vm818_vm6, %v1215_v17, %v815_v38 }
 0x7c0   : > { %v824_v44 = vsel %vm821_vm7, %v823_v42, %v819_v41 }
 0x7c1   : > { %v832_v47 = vmul.f32 %v830_v46, %v824_v44 }
 0x806   : > { %v835_v43 = vpop.permute.xlu2 %834 }
 0x807   : > { %v837_v45 = vmul.f32 %v835_v43, %v824_v44 }
 0x809   : > { %839 = vrot.lane.b32.xlu1 %v837_v45, %s1321_s24 }
 0x811   : > { %538 = vrot.lane.b32.xlu1 %v530_v10, %s1322_s25 }
 0x87b   : > { %v840_v49 = vpop.permute.xlu1 %839 }
 0x87c   : > { %v842_v50 = vadd.f32 %v840_v49, %v832_v47 }
 0x87e   : > { %1216 = vtanh.f32 %v842_v50 }
 0x87f   : > { %1218 = vtanh.f32 %v579_v52 }
 0x880   : > { %1220 = vpow2.f32 %v1109_v57 }
 0x883   : > { %v539_v53 = vpop.permute.xlu1 %538 }
 0x884   : > { %v1217_v54 = vpop.eup %1216  ;;  %541 = vst.msk [vmem:[#allocation5] sm:$0xff] %vm301_vm2, %v539_v53 }
 0x885   : > { %845 = vrot.lane.b32.xlu2 %v1217_v54, %s1320_s23  ;;  %v1219_v55 = vpop.eup %1218 }
 0x886   : > { %v1221_v58 = vpop.eup %1220 }
 0x887   : > { %v583_v59 = vadd.f32 1.0, %v1221_v58 }
 0x889   : > { %1222 = vrcp.f32 %v583_v59  ;;  %v595_v2 = vand.u32 2147483648, %v583_v59  ;;  %vm589_vm9 = vweird.f32 %v583_v59  ;;  %v593_v3 = vand.u32 2147483647, %v583_v59 }
 0x88b   : > { %v600_v56 = vld [vmem:[#allocation5] sm:$0xff]  ;;  %v596_v5 = vor.u32 1.1754944e-38, %v595_v2  ;;  %vm594_vm11 = vcmp.eq.f32.partialorder %v593_v3, 8.507059e+37 }
 0x88d   : > { %607 = vrot.lane.b32.xlu2 %v1219_v55, %s1320_s23 }
 0x88f   : > { %v1223_v9 = vpop.eup %1222 }
 0x890   : > { %v585_v60 = vmul.f32 %v1223_v9, %v583_v59  ;;  %vm590_vm8 = vweird.f32 %v1223_v9 }
 0x891   : > { %vm591_vm10 = vmor %vm589_vm9, %vm590_vm8 }
 0x892   : > { %v586_v63 = vsub.f32 1.0, %v585_v60 }
 0x894   : > { %v587_v0 = vmul.f32 %v1223_v9, %v586_v63 }
 0x895   : > { %602 = vrot.lane.b32.xlu2 %v600_v56, %s1321_s24 }
 0x896   : > { %v588_v1 = vadd.f32 %v1223_v9, %v587_v0 }
 0x898   : > { %v592_v4 = vsel %vm591_vm10, %v1223_v9, %v588_v1 }
 0x899   : > { %v597_v7 = vsel %vm594_vm11, %v596_v5, %v592_v4 }
 0x8df   : > { %v846_v61 = vpop.permute.xlu2 %845 }
 0x8e0   : > { %v848_v62 = vmul.f32 %v846_v61, %v824_v44 }
 0x8e2   : > { %855 = vrot.lane.b32.xlu0 %v848_v62, %s1321_s24 }
 0x8e7   : > { %v608_v6 = vpop.permute.xlu2 %607 }
 0x8e8   : > { %v610_v8 = vmul.f32 %v608_v6, %v597_v7 }
 0x8ea   : > { %850 = vrot.lane.b32.xlu0 %v842_v50, %s1322_s25 }
 0x8ef   : > { %v603_v13 = vpop.permute.xlu2 %602 }
 0x8f0   : > { %v605_v16 = vmul.f32 %v603_v13, %v597_v7 }
 0x8f2   : > { %612 = vrot.lane.b32.xlu0 %v610_v8, %s1321_s24 }
 0x954   : > { %v856_v10 = vpop.permute.xlu0 %855 }
 0x955   : > { %858 = vst.msk [vmem:[#allocation4 + $0x8] sm:$0xff] %vm301_vm2, %v856_v10 }
 0x95c   : > { %v851_v11 = vpop.permute.xlu0 %850  ;;  %v860_v12 = vld [vmem:[#allocation4 + $0x8] sm:$0xff] }
 0x95d   : > { %853 = vst.msk [vmem:[#allocation5 + $0x8] sm:$0xff] %vm301_vm2, %v851_v11  ;;  %1131 = vmatmul.msk.f32.vlgmr.msrb.gmra.mxu3 %vm301_vm2, %v860_v12 }
 0x964   : > { %v613_v19 = vpop.permute.xlu0 %612  ;;  %v909_v28 = vld [vmem:[#allocation5 + $0x8] sm:$0xff] }
 0x965   : > { %v615_v20 = vadd.f32 %v613_v19, %v605_v16 }
 0x967   : > { %1224 = vtanh.f32 %v615_v20 }
 0x96d   : > { %v1225_v21 = vpop.eup %1224 }
 0x96e   : > { %618 = vrot.lane.b32.xlu0 %v1225_v21, %s1320_s23 }
 0x9e0   : > { %v885_v24 = vpop.f32.mrf.mxu3  ;;  %v619_v40 = vpop.permute.xlu0 %618 }
 0x9e1   : > { %v888_v25 = vadd.f32 %v885_v24, %v683_v23  ;;  %v621_v41 = vmul.f32 %v619_v40, %v597_v7 }
 0x9e3   : > { %1226 = vtanh.f32 %v888_v25  ;;  %v1132_v29 = vmul.f32 -1.442695, %v888_v25 }
 0x9e5   : > { %1228 = vpow2.f32 %v1132_v29 }
 0x9e9   : > { %v1227_v26 = vpop.eup %1226 }
 0x9ea   : > { %916 = vrot.lane.b32.xlu1 %v1227_v26, %s1320_s23 }
 0x9eb   : > { %v1229_v30 = vpop.eup %1228 }
 0x9ec   : > { %v892_v31 = vadd.f32 1.0, %v1229_v30 }
 0x9ee   : > { %1230 = vrcp.f32 %v892_v31  ;;  %v904_v35 = vand.u32 2147483648, %v892_v31  ;;  %vm898_vm13 = vweird.f32 %v892_v31  ;;  %v902_v17 = vand.u32 2147483647, %v892_v31 }
 0x9f0   : > { %v905_v18 = vor.u32 1.1754944e-38, %v904_v35  ;;  %vm903_vm15 = vcmp.eq.f32.partialorder %v902_v17, 8.507059e+37 }
 0x9f2   : > { %911 = vrot.lane.b32.xlu1 %v909_v28, %s1321_s24 }
 0x9f4   : > { %v1231_v32 = vpop.eup %1230 }
 0x9f5   : > { %v894_v33 = vmul.f32 %v1231_v32, %v892_v31  ;;  %vm899_vm12 = vweird.f32 %v1231_v32 }
 0x9f6   : > { %vm900_vm14 = vmor %vm898_vm13, %vm899_vm12 }
 0x9f7   : > { %v895_v34 = vsub.f32 1.0, %v894_v33 }
 0x9f9   : > { %v896_v14 = vmul.f32 %v1231_v32, %v895_v34 }
 0x9fb   : > { %v897_v15 = vadd.f32 %v1231_v32, %v896_v14 }
 0x9fd   : > { %v901_v36 = vsel %vm900_vm14, %v1231_v32, %v897_v15 }
 0x9fe   : > { %v906_v38 = vsel %vm903_vm15, %v905_v18, %v901_v36 }
 0xa5c   : > { %v917_v37 = vpop.permute.xlu1 %916 }
 0xa5d   : > { %v919_v39 = vmul.f32 %v917_v37, %v906_v38 }
 0xa5f   : > { %921 = vrot.lane.b32.xlu2 %v919_v39, %s1321_s24 }
 0xa64   : > { %v912_v42 = vpop.permute.xlu1 %911 }
 0xa65   : > { %v914_v43 = vmul.f32 %v912_v42, %v906_v38 }
 0xa67   : > { %628 = vrot.lane.b32.xlu2 %v621_v41, %s1321_s24 }
 0xab9   : > { %v922_v44 = vpop.permute.xlu2 %921 }
 0xaba   : > { %v924_v45 = vadd.f32 %v922_v44, %v914_v43 }
 0xabc   : > { %1232 = vtanh.f32 %v924_v45 }
 0xac1   : > { %v629_v46 = vpop.permute.xlu2 %628 }
 0xac2   : > { %v1233_v47 = vpop.eup %1232  ;;  %631 = vst.msk [vmem:[#allocation4] sm:$0xff] %vm301_vm2, %v629_v46 }
 0xac3   : > { %633 = vst.msk [vmem:[#allocation3 + $0x18] sm:$0xff] %vm301_vm2, %v629_v46  ;;  %927 = vrot.lane.b32.xlu1 %v1233_v47, %s1320_s23 }
 0xaca   : > { %v637_v48 = vld [vmem:[#allocation3 + $0x18] sm:$0xff] }
 0xacb   : > { %1114 = vmatmul.msk.f32.gmra.mxu2 %vm301_vm2, %v637_v48  ;;  %932 = vrot.lane.b32.xlu1 %v924_v45, %s1322_s25 }
 0xb35   : > { %v928_v49 = vpop.permute.xlu1 %927 }
 0xb36   : > { %v930_v50 = vmul.f32 %v928_v49, %v906_v38 }
 0xb38   : > { %937 = vrot.lane.b32.xlu0 %v930_v50, %s1321_s24 }
 0xb3d   : > { %v933_v51 = vpop.permute.xlu1 %932 }
 0xb3e   : > { %935 = vst.msk [vmem:[#allocation5 + $0x8] sm:$0xff] %vm301_vm2, %v933_v51 }
 0xb45   : > { %v991_v52 = vld [vmem:[#allocation5 + $0x8] sm:$0xff] }
 0xb46   : > { %993 = vrot.lane.b32.xlu0 %v991_v52, %s1321_s24 }
 0xb4e   : > { %623 = vrot.lane.b32.xlu0 %v615_v20, %s1322_s25  ;;  %v685_v57 = vpop.f32.mrf.mxu2 }
 0xb4f   : > { %v686_v58 = vadd.f32 %v1469_v27, %v685_v57 }
 0xbaa   : > { %v938_v53 = vpop.permute.xlu0 %937 }
 0xbab   : > { %940 = vst.msk [vmem:[#allocation4 + $0x8] sm:$0xff] %vm301_vm2, %v938_v53 }
 0xbb2   : > { %v942_v54 = vld [vmem:[#allocation4 + $0x8] sm:$0xff] }
 0xbb3   : > { %1137 = vmatmul.msk.f32.vlgmr.msrb.gmra.mxu1 %vm301_vm2, %v942_v54 }
 0xbb8   : > { %v994_v55 = vpop.permute.xlu0 %993 }
 0xbc0   : > { %v624_v56 = vpop.permute.xlu0 %623 }
 0xbc1   : > { %626 = vst.msk [vmem:[#allocation5] sm:$0xff] %vm301_vm2, %v624_v56 }
 0xc30   : > { %v967_v59 = vpop.f32.mrf.mxu1 }
 0xc31   : > { %v970_v9 = vadd.f32 %v967_v59, %v686_v58 }
 0xc33   : > { %1234 = vtanh.f32 %v970_v9  ;;  %v1138_v61 = vmul.f32 -1.442695, %v970_v9 }
 0xc35   : > { %1236 = vpow2.f32 %v1138_v61 }
 0xc39   : > { %v1235_v60 = vpop.eup %1234 }
 0xc3a   : > { %998 = vrot.lane.b32.xlu2 %v1235_v60, %s1320_s23 }
 0xc3b   : > { %v1237_v62 = vpop.eup %1236 }
 0xc3c   : > { %v974_v63 = vadd.f32 1.0, %v1237_v62 }
 0xc3e   : > { %1238 = vrcp.f32 %v974_v63  ;;  %v986_v5 = vand.u32 2147483648, %v974_v63  ;;  %vm980_vm3 = vweird.f32 %v974_v63  ;;  %v984_v27 = vand.u32 2147483647, %v974_v63 }
 0xc40   : > { %v987_v7 = vor.u32 1.1754944e-38, %v986_v5  ;;  %vm985_vm1 = vcmp.eq.f32.partialorder %v984_v27, 8.507059e+37 }
 0xc44   : > { %v1239_v0 = vpop.eup %1238 }
 0xc45   : > { %v976_v1 = vmul.f32 %v1239_v0, %v974_v63  ;;  %vm981_vm0 = vweird.f32 %v1239_v0 }
 0xc46   : > { %vm982_vm4 = vmor %vm980_vm3, %vm981_vm0 }
 0xc47   : > { %v977_v2 = vsub.f32 1.0, %v976_v1 }
 0xc49   : > { %v978_v3 = vmul.f32 %v1239_v0, %v977_v2 }
 0xc4b   : > { %v979_v4 = vadd.f32 %v1239_v0, %v978_v3 }
 0xc4d   : > { %v983_v6 = vsel %vm982_vm4, %v1239_v0, %v979_v4 }
 0xc4e   : > { %v988_v10 = vsel %vm985_vm1, %v987_v7, %v983_v6 }
 0xc4f   : > { %v996_v12 = vmul.f32 %v994_v55, %v988_v10 }
 0xc94   : > { %v999_v8 = vpop.permute.xlu2 %998 }
 0xc95   : > { %v1001_v11 = vmul.f32 %v999_v8, %v988_v10 }
 0xc97   : > { %1003 = vrot.lane.b32.xlu1 %v1001_v11, %s1321_s24 }
 0xd09   : > { %v1004_v13 = vpop.permute.xlu1 %1003 }
 0xd0a   : > { %v1006_v16 = vadd.f32 %v1004_v13, %v996_v12 }
 0xd0c   : > { %1240 = vtanh.f32 %v1006_v16  ;;  %1014 = vrot.lane.b32.xlu1 %v1006_v16, %s1322_s25 }
 0xd12   : > { %v1241_v19 = vpop.eup %1240 }
 0xd13   : > { %1009 = vrot.lane.b32.xlu2 %v1241_v19, %s1320_s23 }
 0xd6d   : > { %v1010_v20 = vpop.permute.xlu2 %1009 }
 0xd6e   : > { %v1012_v21 = vmul.f32 %v1010_v20, %v988_v10 }
 0xd70   : > { %1019 = vrot.lane.b32.xlu2 %v1012_v21, %s1321_s24 }
 0xd7e   : > { %v1015_v22 = vpop.permute.xlu1 %1014 }
 0xd7f   : > { %1017 = vst.msk [vmem:[#allocation5 + $0x8] sm:$0xff] %vm301_vm2, %v1015_v22 }
 0xdc7   : > { %1026 = sbr.rel (%p1139_p8) target bundleno = 3540 (0xdd4), region = 52 }
 0xdca   : > { %v1020_v23 = vpop.permute.xlu2 %1019 }
 0xdcb   : > { %1022 = vst.msk [vmem:[#allocation4 + $0x8] sm:$0xff] %vm301_vm2, %v1020_v23 }
 0xdd2   : > { %v1027_v24 = vld [vmem:[#allocation4 + $0x8] sm:$0xff] }
 0xdd3   : > { %1028 = vst.msk [vmem:[#allocation9] sm:$0xff] %vm301_vm2, %v1027_v24 }
 0xdd4 PF: > { %p1158_p9 = scmp.eq.s32.totalorder %s1363_s22, 1  ;;  %s1323_s6 = smov [#allocation9]  }
 0xdd5   : > { %s1035_s12 = sshll.u32 %s1323_s6, 4  ;;  %s1037_s15 = sshll.u32 %s1551_s5, 4  ;;  %s1036_s12 = int_to_ptr.vmem [resolvable:$true] %s1035_s12  ;;  %s1038_s15 = int_to_ptr.hbm [resolvable:$true] %s1037_s15 }
 0xdd6   : > { %1149 = dma.vmem_to_hbm [thread:$0]  (%p1158_p9), %s1036_s12, 128, %s1038_s15, [#allocation8]  }
 0xdd7   : > { %1309 = dma.done.wait (%p1158_p9), [#allocation8], 128  }
 0xdd8   : > { %1311 = vsyncadd (%p1158_p9), [#allocation8], 4294967168 }
 0xdd9 PF: > { %s17_s18 = sadd.s32 1, %s1314_s18  }
 0xdda   : > { %p14_p10 = scmp.ge.s32.totalorder %s17_s18, 4  }
 0xddc   :  { %16 = sbr.rel (!%p14_p10) target bundleno = 2 (0x2), region = 90 }
 0xde1   :  { %1051 = vsyncpa [#allocation7], 1 }
 0xde2   :  { %1053 = vsyncpa [#allocation7 + $0x1], 1 }
 0xde3   :  { %1054 = vsyncpa [#allocation8], 1 }
 0xde4   :  { %1056 = vsyncpa [#allocation8 + $0x1], 1 }

</bundles_post_ra>
